<compile_context>
chip_gen: v7x
topology: tpu7x:2x2x1
jax: 0.10.0
libtpu: 0.0.40
codegen_flags: <defaults>
</compile_context>

<pallas_src>
import functools
import math

import jax
import jax.numpy as jnp
from jax.experimental import pallas as pl
from jax.experimental.pallas import tpu as pltpu

_LOG_2PI = math.log(2.0 * math.pi)


# ----------------------------- in-kernel helpers ------------------------------


def _layer_norm(x, eps=1e-5):
    # torch.nn.LayerNorm with default affine init (gamma=1, beta=0).
    # TODO(synk): trained LayerNorm gamma/beta (checkpoint port) are not plumbed.
    mu = jnp.mean(x, axis=-1, keepdims=True)
    xc = x - mu
    var = jnp.mean(xc * xc, axis=-1, keepdims=True)
    return xc * jax.lax.rsqrt(var + eps)


def _mlp2(x, w1, b1, w2, b2):
    """relu(x @ W1 + b1) @ W2 + b2  (depth-2 build_mlp).

    When Din is tiny (<=4) the first layer is a couple of VPU broadcast FMAs
    instead of a zero-padded MXU matmul.
    """
    din = x.shape[-1]
    if din <= 4:
        h = x[:, 0:1] * w1[0:1, :]
        for i in range(1, din):
            h = h + x[:, i:i + 1] * w1[i:i + 1, :]
        h = h + b1
    else:
        h = jnp.dot(x, w1, preferred_element_type=jnp.float32) + b1
    h = jnp.maximum(h, 0.0)
    return jnp.dot(h, w2, preferred_element_type=jnp.float32) + b2


def _mha(q_in, k_in, v_in, wq, wk, wv, wo, bo, *, num_heads, scale):
    """TNP MultiHeadAttn: x = LN(q + MHA(q,k,v)); out = LN(x + relu(x @ Wo + bo))."""
    q = jnp.dot(q_in, wq, preferred_element_type=jnp.float32)   # [Nq, D]
    k = jnp.dot(k_in, wk, preferred_element_type=jnp.float32)   # [Nk, D]
    v = jnp.dot(v_in, wv, preferred_element_type=jnp.float32)   # [Nk, D]
    d = q.shape[-1]
    hd = d // num_heads
    dn = (((1,), (1,)), ((), ()))        # contract last dims -> no explicit k.T
    heads = []
    for h in range(num_heads):           # static unrolled; tiny head count/dims
        sl = slice(h * hd, (h + 1) * hd)
        logits = jax.lax.dot_general(q[:, sl], k[:, sl], dn,
                                     preferred_element_type=jnp.float32) * scale
        logits = logits - jnp.max(logits, axis=-1, keepdims=True)
        p = jnp.exp(logits)
        a = p * pl.reciprocal(jnp.sum(p, axis=-1, keepdims=True), approx=True)
        heads.append(jnp.dot(a, v[:, sl], preferred_element_type=jnp.float32))
    attn = jnp.concatenate(heads, axis=-1)                       # [Nq, D]
    x = _layer_norm(q + attn)
    y = jnp.dot(x, wo, preferred_element_type=jnp.float32) + bo
    return _layer_norm(x + jnp.maximum(y, 0.0))


# ----------------------------- fused kernel ------------------------------


def ipnp_fused_kernel(ctx_ref, x_ref, y_ref, hd_ref,
                      de_w1, de_b1, de_w2, de_b2,
                      sp_wq, sp_wk, sp_wv, sp_wo, sp_bo,
                      te_w1, te_b1, te_w2, te_b2,
                      tx_wq, tx_wk, tx_wv, tx_wo, tx_bo,
                      pr_w1, pr_b1, pr_w2, pr_b2,
                      ll_ref, *, num_heads, num_spin_blocks, scale, dim_y):
    f32 = jnp.float32
    ctx = ctx_ref[0].astype(f32)          # [Nc, dx+dy]
    x = x_ref[0].astype(f32)              # [N,  dx]
    yv = y_ref[0].astype(f32)             # [N,  dy]

    # context embedding MLP
    ctx_embed = _mlp2(ctx, de_w1[...], de_b1[...], de_w2[...], de_b2[...])  # [Nc, D]

    # Spin encoder: learned induced points repeatedly cross-attend to the context.
    h = hd_ref[...].astype(f32)           # [I, D], VMEM-resident across grid steps
    for i in range(num_spin_blocks):      # static loop; stacked weights stay in VMEM
        h = _mha(h, ctx_embed, ctx_embed,
                 sp_wq[i], sp_wk[i], sp_wv[i], sp_wo[i], sp_bo[i],
                 num_heads=num_heads, scale=scale)

    # target path + cross attention + predictor
    tgt = _mlp2(x, te_w1[...], te_b1[...], te_w2[...], te_b2[...])          # [N, D]
    enc = _mha(tgt, h, h, tx_wq[...], tx_wk[...], tx_wv[...], tx_wo[...],
               tx_bo[...], num_heads=num_heads, scale=scale)                # [N, D]
    dec = _mlp2(enc, pr_w1[...], pr_b1[...], pr_w2[...], pr_b2[...])        # [N, 2*dy]

    # Normal(mean, exp(logstd)).log_prob(y).sum(-1), fused into the same kernel.
    mean = dec[:, :dim_y]
    logstd = dec[:, dim_y:]
    z = (yv - mean) * jnp.exp(-logstd)
    lp = -0.5 * z * z - logstd - 0.5 * _LOG_2PI
    ll_ref[0] = jnp.sum(lp, axis=-1, keepdims=True).astype(ll_ref.dtype)


# ----------------------------- pallas_call wrapper ------------------------------


def _batched_spec(shape):
    rest = len(shape) - 1

    def imap(b):
        return (b,) + (0,) * rest

    return pl.BlockSpec((1,) + tuple(shape[1:]), imap)


def _resident_spec(shape):
    nd = len(shape)

    def imap(b):
        return (0,) * nd

    return pl.BlockSpec(tuple(shape), imap)


def ipnp_forward(params, xc, yc, xt, yt, *, num_heads):
    """Eval-mode IPNP forward (use_latent_path=False, bound_std=False)."""
    x = jnp.concatenate([xc, xt], axis=1)          # batch.x
    y = jnp.concatenate([yc, yt], axis=1)          # batch.y
    ctx = jnp.concatenate([xc, yc], axis=-1)       # [B, Nc, dx+dy]
    num_ctx = xc.shape[1]
    B, N, _ = x.shape
    dim_y = y.shape[-1]
    D = params["H_D"].shape[-1]

    de, sp = params["data_emb"], params["spin"]
    te, tx, pr = params["target_embed"], params["target_xattn"], params["predictor"]
    num_spin_blocks = sp["wq"].shape[0]
    scale = 1.0 / math.sqrt(D)      # TNP MultiHeadAttn scales logits by sqrt(dim_out)

    inputs = (ctx, x, y, params["H_D"],
              de["w1"], de["b1"], de["w2"], de["b2"],
              sp["wq"], sp["wk"], sp["wv"], sp["wo"], sp["bo"],
              te["w1"], te["b1"], te["w2"], te["b2"],
              tx["wq"], tx["wk"], tx["wv"], tx["wo"], tx["bo"],
              pr["w1"], pr["b1"], pr["w2"], pr["b2"])
    in_specs = ([_batched_spec(a.shape) for a in inputs[:3]]
                + [_resident_spec(a.shape) for a in inputs[3:]])

    kernel = functools.partial(
        ipnp_fused_kernel, num_heads=num_heads,
        num_spin_blocks=num_spin_blocks, scale=scale, dim_y=dim_y)

    ll = pl.pallas_call(
        kernel,
        out_shape=jax.ShapeDtypeStruct((B, N, 1), jnp.float32),
        grid=(B,),
        in_specs=in_specs,
        out_specs=pl.BlockSpec((1, N, 1), lambda b: (b, 0, 0)),
        compiler_params=pltpu.CompilerParams(dimension_semantics=("parallel",)),
    )(*inputs)[..., 0]                             # [B, N]

    return {"ctx_ll": jnp.mean(ll[:, :num_ctx]),
            "tar_ll": jnp.mean(ll[:, num_ctx:])}


# ----------------------------- parameter init ------------------------------


def _linear(key, din, dout, bias=True):
    kw, kb = jax.random.split(key)
    bound = 1.0 / math.sqrt(din)
    w = jax.random.uniform(kw, (din, dout), jnp.float32, -bound, bound)
    if not bias:
        return {"w": w}
    b = jax.random.uniform(kb, (1, dout), jnp.float32, -bound, bound)
    return {"w": w, "b": b}


def _init_mlp2(key, din, dhid, dout):
    k1, k2 = jax.random.split(key)
    l1, l2 = _linear(k1, din, dhid), _linear(k2, dhid, dout)
    return {"w1": l1["w"], "b1": l1["b"], "w2": l2["w"], "b2": l2["b"]}


def _init_mha(key, dq, dk, dv, dout):
    k1, k2, k3, k4 = jax.random.split(key, 4)
    lo = _linear(k4, dout, dout)
    return {"wq": _linear(k1, dq, dout, bias=False)["w"],
            "wk": _linear(k2, dk, dout, bias=False)["w"],
            "wv": _linear(k3, dv, dout, bias=False)["w"],
            "wo": lo["w"], "bo": lo["b"]}


def init_ipnp_params(key, *, dim_x, dim_y, data_emb_dim, num_induce,
                     num_heads, num_spin_blocks, dec_dim):
    del num_heads  # head count only affects the kernel, not parameter shapes
    D = data_emb_dim
    keys = jax.random.split(key, 5 + num_spin_blocks)
    bound = math.sqrt(6.0 / (num_induce + D))      # 'xavier' init of H_D
    H_D = jax.random.uniform(keys[0], (num_induce, D), jnp.float32, -bound, bound)
    blocks = [_init_mha(keys[1 + i], D, D, D, D) for i in range(num_spin_blocks)]
    spin = {name: jnp.stack([b[name] for b in blocks], axis=0)   # [S, ...] stacked
            for name in ("wq", "wk", "wv", "wo", "bo")}
    return {
        "data_emb": _init_mlp2(keys[1 + num_spin_blocks], dim_x + dim_y, D, D),
        "H_D": H_D,
        "spin": spin,
        "target_embed": _init_mlp2(keys[2 + num_spin_blocks], dim_x, D, D),
        "target_xattn": _init_mha(keys[3 + num_spin_blocks], D, D, D, D),
        "predictor": _init_mlp2(keys[4 + num_spin_blocks], D, dec_dim, 2 * dim_y),
    }


# ----------------------------- main ------------------------------


if __name__ == "__main__":
    B = 2
    dim_x, dim_y = 1, 1
    data_emb_dim = 64
    num_induce = 8
    num_heads = 4
    num_spin_blocks = 2
    dec_dim = 32
    num_ctx, num_tar = 8, 8

    key = jax.random.PRNGKey(0)
    k_param, k_xc, k_yc, k_xt, k_yt = jax.random.split(key, 5)
    params = init_ipnp_params(
        k_param, dim_x=dim_x, dim_y=dim_y, data_emb_dim=data_emb_dim,
        num_induce=num_induce, num_heads=num_heads,
        num_spin_blocks=num_spin_blocks, dec_dim=dec_dim)

    xc = jax.random.normal(k_xc, (B, num_ctx, dim_x), jnp.float32)
    yc = jax.random.normal(k_yc, (B, num_ctx, dim_y), jnp.float32)
    xt = jax.random.normal(k_xt, (B, num_tar, dim_x), jnp.float32)
    yt = jax.random.normal(k_yt, (B, num_tar, dim_y), jnp.float32)

    fwd = jax.jit(functools.partial(ipnp_forward, num_heads=num_heads))
    outs = fwd(params, xc, yc, xt, yt)
    jax.block_until_ready(outs)
    assert jnp.isfinite(outs["ctx_ll"]) and jnp.isfinite(outs["tar_ll"])
    print("KERNEL_OK")
</pallas_src>

<mosaic_0001>
module attributes {stable_mosaic.version = 11 : i64} {
  func.func @ipnp_fused_kernel(%arg0: i32, %arg1: memref<1x8x2xf32, #tpu.memory_space<vmem>>, %arg2: memref<1x16x1xf32, #tpu.memory_space<vmem>>, %arg3: memref<1x16x1xf32, #tpu.memory_space<vmem>>, %arg4: memref<8x64xf32, #tpu.memory_space<vmem>>, %arg5: memref<2x64xf32, #tpu.memory_space<vmem>>, %arg6: memref<1x64xf32, #tpu.memory_space<vmem>>, %arg7: memref<64x64xf32, #tpu.memory_space<vmem>>, %arg8: memref<1x64xf32, #tpu.memory_space<vmem>>, %arg9: memref<2x64x64xf32, #tpu.memory_space<vmem>>, %arg10: memref<2x64x64xf32, #tpu.memory_space<vmem>>, %arg11: memref<2x64x64xf32, #tpu.memory_space<vmem>>, %arg12: memref<2x64x64xf32, #tpu.memory_space<vmem>>, %arg13: memref<2x1x64xf32, #tpu.memory_space<vmem>>, %arg14: memref<1x64xf32, #tpu.memory_space<vmem>>, %arg15: memref<1x64xf32, #tpu.memory_space<vmem>>, %arg16: memref<64x64xf32, #tpu.memory_space<vmem>>, %arg17: memref<1x64xf32, #tpu.memory_space<vmem>>, %arg18: memref<64x64xf32, #tpu.memory_space<vmem>>, %arg19: memref<64x64xf32, #tpu.memory_space<vmem>>, %arg20: memref<64x64xf32, #tpu.memory_space<vmem>>, %arg21: memref<64x64xf32, #tpu.memory_space<vmem>>, %arg22: memref<1x64xf32, #tpu.memory_space<vmem>>, %arg23: memref<64x32xf32, #tpu.memory_space<vmem>>, %arg24: memref<1x32xf32, #tpu.memory_space<vmem>>, %arg25: memref<32x2xf32, #tpu.memory_space<vmem>>, %arg26: memref<1x2xf32, #tpu.memory_space<vmem>>, %arg27: memref<1x16x1xf32, #tpu.memory_space<vmem>>) attributes {dimension_semantics = [#tpu.dimension_semantics<parallel>], iteration_bounds = array<i64: 2>, scalar_prefetch = 0 : i64, scratch_operands = 0 : i64, tpu.core_type = #tpu.core_type<tc>, window_params = [{transform_indices = @transform_0, window_bounds = array<i64: 1, 8, 2>}, {transform_indices = @transform_1, window_bounds = array<i64: 1, 16, 1>}, {transform_indices = @transform_2, window_bounds = array<i64: 1, 16, 1>}, {pipeline_mode = #tpu.pipeline_mode<synchronous>, transform_indices = @transform_3, window_bounds = array<i64: 8, 64>}, {pipeline_mode = #tpu.pipeline_mode<synchronous>, transform_indices = @transform_4, window_bounds = array<i64: 2, 64>}, {pipeline_mode = #tpu.pipeline_mode<synchronous>, transform_indices = @transform_5, window_bounds = array<i64: 1, 64>}, {pipeline_mode = #tpu.pipeline_mode<synchronous>, transform_indices = @transform_6, window_bounds = array<i64: 64, 64>}, {pipeline_mode = #tpu.pipeline_mode<synchronous>, transform_indices = @transform_7, window_bounds = array<i64: 1, 64>}, {pipeline_mode = #tpu.pipeline_mode<synchronous>, transform_indices = @transform_8, window_bounds = array<i64: 2, 64, 64>}, {pipeline_mode = #tpu.pipeline_mode<synchronous>, transform_indices = @transform_9, window_bounds = array<i64: 2, 64, 64>}, {pipeline_mode = #tpu.pipeline_mode<synchronous>, transform_indices = @transform_10, window_bounds = array<i64: 2, 64, 64>}, {pipeline_mode = #tpu.pipeline_mode<synchronous>, transform_indices = @transform_11, window_bounds = array<i64: 2, 64, 64>}, {pipeline_mode = #tpu.pipeline_mode<synchronous>, transform_indices = @transform_12, window_bounds = array<i64: 2, 1, 64>}, {pipeline_mode = #tpu.pipeline_mode<synchronous>, transform_indices = @transform_13, window_bounds = array<i64: 1, 64>}, {pipeline_mode = #tpu.pipeline_mode<synchronous>, transform_indices = @transform_14, window_bounds = array<i64: 1, 64>}, {pipeline_mode = #tpu.pipeline_mode<synchronous>, transform_indices = @transform_15, window_bounds = array<i64: 64, 64>}, {pipeline_mode = #tpu.pipeline_mode<synchronous>, transform_indices = @transform_16, window_bounds = array<i64: 1, 64>}, {pipeline_mode = #tpu.pipeline_mode<synchronous>, transform_indices = @transform_17, window_bounds = array<i64: 64, 64>}, {pipeline_mode = #tpu.pipeline_mode<synchronous>, transform_indices = @transform_18, window_bounds = array<i64: 64, 64>}, {pipeline_mode = #tpu.pipeline_mode<synchronous>, transform_indices = @transform_19, window_bounds = array<i64: 64, 64>}, {pipeline_mode = #tpu.pipeline_mode<synchronous>, transform_indices = @transform_20, window_bounds = array<i64: 64, 64>}, {pipeline_mode = #tpu.pipeline_mode<synchronous>, transform_indices = @transform_21, window_bounds = array<i64: 1, 64>}, {pipeline_mode = #tpu.pipeline_mode<synchronous>, transform_indices = @transform_22, window_bounds = array<i64: 64, 32>}, {pipeline_mode = #tpu.pipeline_mode<synchronous>, transform_indices = @transform_23, window_bounds = array<i64: 1, 32>}, {pipeline_mode = #tpu.pipeline_mode<synchronous>, transform_indices = @transform_24, window_bounds = array<i64: 32, 2>}, {pipeline_mode = #tpu.pipeline_mode<synchronous>, transform_indices = @transform_25, window_bounds = array<i64: 1, 2>}, {transform_indices = @transform_26, window_bounds = array<i64: 1, 16, 1>}]} {
    %c0 = arith.constant 0 : index
    %c0_0 = arith.constant 0 : index
    %c0_1 = arith.constant 0 : index
    %0 = vector.load %arg1[%c0, %c0_0, %c0_1] : memref<1x8x2xf32, #tpu.memory_space<vmem>>, vector<1x8x2xf32>
    %1 = vector.shape_cast %0 : vector<1x8x2xf32> to vector<8x2xf32>
    %c0_2 = arith.constant 0 : index
    %c0_3 = arith.constant 0 : index
    %c0_4 = arith.constant 0 : index
    %2 = vector.load %arg2[%c0_2, %c0_3, %c0_4] : memref<1x16x1xf32, #tpu.memory_space<vmem>>, vector<1x16x1xf32>
    %3 = vector.shape_cast %2 : vector<1x16x1xf32> to vector<16x1xf32>
    %c0_5 = arith.constant 0 : index
    %c0_6 = arith.constant 0 : index
    %c0_7 = arith.constant 0 : index
    %4 = vector.load %arg3[%c0_5, %c0_6, %c0_7] : memref<1x16x1xf32, #tpu.memory_space<vmem>>, vector<1x16x1xf32>
    %5 = vector.shape_cast %4 : vector<1x16x1xf32> to vector<16x1xf32>
    %c0_8 = arith.constant 0 : index
    %c0_9 = arith.constant 0 : index
    %6 = vector.load %arg5[%c0_8, %c0_9] : memref<2x64xf32, #tpu.memory_space<vmem>>, vector<2x64xf32>
    %c0_10 = arith.constant 0 : index
    %c0_11 = arith.constant 0 : index
    %7 = vector.load %arg6[%c0_10, %c0_11] : memref<1x64xf32, #tpu.memory_space<vmem>>, vector<1x64xf32>
    %c0_12 = arith.constant 0 : index
    %c0_13 = arith.constant 0 : index
    %8 = vector.load %arg7[%c0_12, %c0_13] : memref<64x64xf32, #tpu.memory_space<vmem>>, vector<64x64xf32>
    %c0_14 = arith.constant 0 : index
    %c0_15 = arith.constant 0 : index
    %9 = vector.load %arg8[%c0_14, %c0_15] : memref<1x64xf32, #tpu.memory_space<vmem>>, vector<1x64xf32>
    %10 = vector.extract_strided_slice %1 {offsets = [0, 0], sizes = [8, 1], strides = [1, 1]} : vector<8x2xf32> to vector<8x1xf32>
    %11 = vector.extract_strided_slice %6 {offsets = [0, 0], sizes = [1, 64], strides = [1, 1]} : vector<2x64xf32> to vector<1x64xf32>
    %12 = vector.broadcast %10 : vector<8x1xf32> to vector<8x64xf32>
    %13 = vector.broadcast %11 : vector<1x64xf32> to vector<8x64xf32>
    %14 = arith.mulf %12, %13 : vector<8x64xf32>
    %15 = vector.extract_strided_slice %1 {offsets = [0, 1], sizes = [8, 1], strides = [1, 1]} : vector<8x2xf32> to vector<8x1xf32>
    %16 = vector.extract_strided_slice %6 {offsets = [1, 0], sizes = [1, 64], strides = [1, 1]} : vector<2x64xf32> to vector<1x64xf32>
    %17 = vector.broadcast %15 : vector<8x1xf32> to vector<8x64xf32>
    %18 = vector.broadcast %16 : vector<1x64xf32> to vector<8x64xf32>
    %19 = arith.mulf %17, %18 : vector<8x64xf32>
    %20 = arith.addf %14, %19 : vector<8x64xf32>
    %21 = vector.broadcast %7 : vector<1x64xf32> to vector<8x64xf32>
    %22 = arith.addf %20, %21 : vector<8x64xf32>
    %cst = arith.constant 0.000000e+00 : f32
    %23 = vector.broadcast %cst : f32 to vector<8x64xf32>
    %24 = arith.maximumf %22, %23 : vector<8x64xf32>
    %cst_16 = arith.constant dense<0.000000e+00> : vector<8x64xf32>
    %25 = tpu.matmul %24, %8, %cst_16 {dimension_numbers = #tpu.dot_dimension_numbers<[1], [0], [0], [1], [0, 0, 1, 1], [], []>} : vector<8x64xf32>, vector<64x64xf32>, vector<8x64xf32> -> vector<8x64xf32>
    %26 = vector.broadcast %9 : vector<1x64xf32> to vector<8x64xf32>
    %27 = arith.addf %25, %26 : vector<8x64xf32>
    %c0_17 = arith.constant 0 : index
    %c0_18 = arith.constant 0 : index
    %28 = vector.load %arg4[%c0_17, %c0_18] : memref<8x64xf32, #tpu.memory_space<vmem>>, vector<8x64xf32>
    %c0_19 = arith.constant 0 : index
    %c0_20 = arith.constant 0 : index
    %c0_21 = arith.constant 0 : index
    %29 = vector.load %arg9[%c0_19, %c0_20, %c0_21] : memref<2x64x64xf32, #tpu.memory_space<vmem>>, vector<1x64x64xf32>
    %30 = vector.shape_cast %29 : vector<1x64x64xf32> to vector<64x64xf32>
    %c0_22 = arith.constant 0 : index
    %c0_23 = arith.constant 0 : index
    %c0_24 = arith.constant 0 : index
    %31 = vector.load %arg10[%c0_22, %c0_23, %c0_24] : memref<2x64x64xf32, #tpu.memory_space<vmem>>, vector<1x64x64xf32>
    %32 = vector.shape_cast %31 : vector<1x64x64xf32> to vector<64x64xf32>
    %c0_25 = arith.constant 0 : index
    %c0_26 = arith.constant 0 : index
    %c0_27 = arith.constant 0 : index
    %33 = vector.load %arg11[%c0_25, %c0_26, %c0_27] : memref<2x64x64xf32, #tpu.memory_space<vmem>>, vector<1x64x64xf32>
    %34 = vector.shape_cast %33 : vector<1x64x64xf32> to vector<64x64xf32>
    %c0_28 = arith.constant 0 : index
    %c0_29 = arith.constant 0 : index
    %c0_30 = arith.constant 0 : index
    %35 = vector.load %arg12[%c0_28, %c0_29, %c0_30] : memref<2x64x64xf32, #tpu.memory_space<vmem>>, vector<1x64x64xf32>
    %36 = vector.shape_cast %35 : vector<1x64x64xf32> to vector<64x64xf32>
    %c0_31 = arith.constant 0 : index
    %c0_32 = arith.constant 0 : index
    %c0_33 = arith.constant 0 : index
    %37 = vector.load %arg13[%c0_31, %c0_32, %c0_33] : memref<2x1x64xf32, #tpu.memory_space<vmem>>, vector<1x1x64xf32>
    %38 = vector.shape_cast %37 : vector<1x1x64xf32> to vector<1x64xf32>
    %cst_34 = arith.constant dense<0.000000e+00> : vector<8x64xf32>
    %39 = tpu.matmul %28, %30, %cst_34 {dimension_numbers = #tpu.dot_dimension_numbers<[1], [0], [0], [1], [0, 0, 1, 1], [], []>} : vector<8x64xf32>, vector<64x64xf32>, vector<8x64xf32> -> vector<8x64xf32>
    %cst_35 = arith.constant dense<0.000000e+00> : vector<8x64xf32>
    %40 = tpu.matmul %27, %32, %cst_35 {dimension_numbers = #tpu.dot_dimension_numbers<[1], [0], [0], [1], [0, 0, 1, 1], [], []>} : vector<8x64xf32>, vector<64x64xf32>, vector<8x64xf32> -> vector<8x64xf32>
    %cst_36 = arith.constant dense<0.000000e+00> : vector<8x64xf32>
    %41 = tpu.matmul %27, %34, %cst_36 {dimension_numbers = #tpu.dot_dimension_numbers<[1], [0], [0], [1], [0, 0, 1, 1], [], []>} : vector<8x64xf32>, vector<64x64xf32>, vector<8x64xf32> -> vector<8x64xf32>
    %42 = vector.extract_strided_slice %39 {offsets = [0, 0], sizes = [8, 16], strides = [1, 1]} : vector<8x64xf32> to vector<8x16xf32>
    %43 = vector.extract_strided_slice %40 {offsets = [0, 0], sizes = [8, 16], strides = [1, 1]} : vector<8x64xf32> to vector<8x16xf32>
    %cst_37 = arith.constant dense<0.000000e+00> : vector<8x8xf32>
    %44 = tpu.matmul %42, %43, %cst_37 {dimension_numbers = #tpu.dot_dimension_numbers<[1], [1], [0], [0], [0, 0, 1, 0], [], []>} : vector<8x16xf32>, vector<8x16xf32>, vector<8x8xf32> -> vector<8x8xf32>
    %cst_38 = arith.constant 1.250000e-01 : f32
    %45 = vector.broadcast %cst_38 : f32 to vector<8x8xf32>
    %46 = arith.mulf %44, %45 : vector<8x8xf32>
    %cst_39 = arith.constant dense<0xFF800000> : vector<8xf32>
    %47 = vector.multi_reduction <maximumf>, %46, %cst_39 [1] : vector<8x8xf32> to vector<8xf32>
    %48 = vector.shape_cast %47 : vector<8xf32> to vector<8x1xf32>
    %49 = vector.broadcast %48 : vector<8x1xf32> to vector<8x8xf32>
    %50 = arith.subf %46, %49 : vector<8x8xf32>
    %51 = math.exp %50 : vector<8x8xf32>
    %cst_40 = arith.constant dense<0.000000e+00> : vector<8xf32>
    %52 = vector.multi_reduction <add>, %51, %cst_40 [1] : vector<8x8xf32> to vector<8xf32>
    %53 = vector.shape_cast %52 : vector<8xf32> to vector<8x1xf32>
    %54 = tpu.reciprocal %53 {approx = true} : vector<8x1xf32> -> vector<8x1xf32>
    %55 = vector.broadcast %54 : vector<8x1xf32> to vector<8x8xf32>
    %56 = arith.mulf %51, %55 : vector<8x8xf32>
    %57 = vector.extract_strided_slice %41 {offsets = [0, 0], sizes = [8, 16], strides = [1, 1]} : vector<8x64xf32> to vector<8x16xf32>
    %cst_41 = arith.constant dense<0.000000e+00> : vector<8x16xf32>
    %58 = tpu.matmul %56, %57, %cst_41 {dimension_numbers = #tpu.dot_dimension_numbers<[1], [0], [0], [1], [0, 0, 1, 1], [], []>} : vector<8x8xf32>, vector<8x16xf32>, vector<8x16xf32> -> vector<8x16xf32>
    %59 = vector.extract_strided_slice %39 {offsets = [0, 16], sizes = [8, 16], strides = [1, 1]} : vector<8x64xf32> to vector<8x16xf32>
    %60 = vector.extract_strided_slice %40 {offsets = [0, 16], sizes = [8, 16], strides = [1, 1]} : vector<8x64xf32> to vector<8x16xf32>
    %cst_42 = arith.constant dense<0.000000e+00> : vector<8x8xf32>
    %61 = tpu.matmul %59, %60, %cst_42 {dimension_numbers = #tpu.dot_dimension_numbers<[1], [1], [0], [0], [0, 0, 1, 0], [], []>} : vector<8x16xf32>, vector<8x16xf32>, vector<8x8xf32> -> vector<8x8xf32>
    %cst_43 = arith.constant 1.250000e-01 : f32
    %62 = vector.broadcast %cst_43 : f32 to vector<8x8xf32>
    %63 = arith.mulf %61, %62 : vector<8x8xf32>
    %cst_44 = arith.constant dense<0xFF800000> : vector<8xf32>
    %64 = vector.multi_reduction <maximumf>, %63, %cst_44 [1] : vector<8x8xf32> to vector<8xf32>
    %65 = vector.shape_cast %64 : vector<8xf32> to vector<8x1xf32>
    %66 = vector.broadcast %65 : vector<8x1xf32> to vector<8x8xf32>
    %67 = arith.subf %63, %66 : vector<8x8xf32>
    %68 = math.exp %67 : vector<8x8xf32>
    %cst_45 = arith.constant dense<0.000000e+00> : vector<8xf32>
    %69 = vector.multi_reduction <add>, %68, %cst_45 [1] : vector<8x8xf32> to vector<8xf32>
    %70 = vector.shape_cast %69 : vector<8xf32> to vector<8x1xf32>
    %71 = tpu.reciprocal %70 {approx = true} : vector<8x1xf32> -> vector<8x1xf32>
    %72 = vector.broadcast %71 : vector<8x1xf32> to vector<8x8xf32>
    %73 = arith.mulf %68, %72 : vector<8x8xf32>
    %74 = vector.extract_strided_slice %41 {offsets = [0, 16], sizes = [8, 16], strides = [1, 1]} : vector<8x64xf32> to vector<8x16xf32>
    %cst_46 = arith.constant dense<0.000000e+00> : vector<8x16xf32>
    %75 = tpu.matmul %73, %74, %cst_46 {dimension_numbers = #tpu.dot_dimension_numbers<[1], [0], [0], [1], [0, 0, 1, 1], [], []>} : vector<8x8xf32>, vector<8x16xf32>, vector<8x16xf32> -> vector<8x16xf32>
    %76 = vector.extract_strided_slice %39 {offsets = [0, 32], sizes = [8, 16], strides = [1, 1]} : vector<8x64xf32> to vector<8x16xf32>
    %77 = vector.extract_strided_slice %40 {offsets = [0, 32], sizes = [8, 16], strides = [1, 1]} : vector<8x64xf32> to vector<8x16xf32>
    %cst_47 = arith.constant dense<0.000000e+00> : vector<8x8xf32>
    %78 = tpu.matmul %76, %77, %cst_47 {dimension_numbers = #tpu.dot_dimension_numbers<[1], [1], [0], [0], [0, 0, 1, 0], [], []>} : vector<8x16xf32>, vector<8x16xf32>, vector<8x8xf32> -> vector<8x8xf32>
    %cst_48 = arith.constant 1.250000e-01 : f32
    %79 = vector.broadcast %cst_48 : f32 to vector<8x8xf32>
    %80 = arith.mulf %78, %79 : vector<8x8xf32>
    %cst_49 = arith.constant dense<0xFF800000> : vector<8xf32>
    %81 = vector.multi_reduction <maximumf>, %80, %cst_49 [1] : vector<8x8xf32> to vector<8xf32>
    %82 = vector.shape_cast %81 : vector<8xf32> to vector<8x1xf32>
    %83 = vector.broadcast %82 : vector<8x1xf32> to vector<8x8xf32>
    %84 = arith.subf %80, %83 : vector<8x8xf32>
    %85 = math.exp %84 : vector<8x8xf32>
    %cst_50 = arith.constant dense<0.000000e+00> : vector<8xf32>
    %86 = vector.multi_reduction <add>, %85, %cst_50 [1] : vector<8x8xf32> to vector<8xf32>
    %87 = vector.shape_cast %86 : vector<8xf32> to vector<8x1xf32>
    %88 = tpu.reciprocal %87 {approx = true} : vector<8x1xf32> -> vector<8x1xf32>
    %89 = vector.broadcast %88 : vector<8x1xf32> to vector<8x8xf32>
    %90 = arith.mulf %85, %89 : vector<8x8xf32>
    %91 = vector.extract_strided_slice %41 {offsets = [0, 32], sizes = [8, 16], strides = [1, 1]} : vector<8x64xf32> to vector<8x16xf32>
    %cst_51 = arith.constant dense<0.000000e+00> : vector<8x16xf32>
    %92 = tpu.matmul %90, %91, %cst_51 {dimension_numbers = #tpu.dot_dimension_numbers<[1], [0], [0], [1], [0, 0, 1, 1], [], []>} : vector<8x8xf32>, vector<8x16xf32>, vector<8x16xf32> -> vector<8x16xf32>
    %93 = vector.extract_strided_slice %39 {offsets = [0, 48], sizes = [8, 16], strides = [1, 1]} : vector<8x64xf32> to vector<8x16xf32>
    %94 = vector.extract_strided_slice %40 {offsets = [0, 48], sizes = [8, 16], strides = [1, 1]} : vector<8x64xf32> to vector<8x16xf32>
    %cst_52 = arith.constant dense<0.000000e+00> : vector<8x8xf32>
    %95 = tpu.matmul %93, %94, %cst_52 {dimension_numbers = #tpu.dot_dimension_numbers<[1], [1], [0], [0], [0, 0, 1, 0], [], []>} : vector<8x16xf32>, vector<8x16xf32>, vector<8x8xf32> -> vector<8x8xf32>
    %cst_53 = arith.constant 1.250000e-01 : f32
    %96 = vector.broadcast %cst_53 : f32 to vector<8x8xf32>
    %97 = arith.mulf %95, %96 : vector<8x8xf32>
    %cst_54 = arith.constant dense<0xFF800000> : vector<8xf32>
    %98 = vector.multi_reduction <maximumf>, %97, %cst_54 [1] : vector<8x8xf32> to vector<8xf32>
    %99 = vector.shape_cast %98 : vector<8xf32> to vector<8x1xf32>
    %100 = vector.broadcast %99 : vector<8x1xf32> to vector<8x8xf32>
    %101 = arith.subf %97, %100 : vector<8x8xf32>
    %102 = math.exp %101 : vector<8x8xf32>
    %cst_55 = arith.constant dense<0.000000e+00> : vector<8xf32>
    %103 = vector.multi_reduction <add>, %102, %cst_55 [1] : vector<8x8xf32> to vector<8xf32>
    %104 = vector.shape_cast %103 : vector<8xf32> to vector<8x1xf32>
    %105 = tpu.reciprocal %104 {approx = true} : vector<8x1xf32> -> vector<8x1xf32>
    %106 = vector.broadcast %105 : vector<8x1xf32> to vector<8x8xf32>
    %107 = arith.mulf %102, %106 : vector<8x8xf32>
    %108 = vector.extract_strided_slice %41 {offsets = [0, 48], sizes = [8, 16], strides = [1, 1]} : vector<8x64xf32> to vector<8x16xf32>
    %cst_56 = arith.constant dense<0.000000e+00> : vector<8x16xf32>
    %109 = tpu.matmul %107, %108, %cst_56 {dimension_numbers = #tpu.dot_dimension_numbers<[1], [0], [0], [1], [0, 0, 1, 1], [], []>} : vector<8x8xf32>, vector<8x16xf32>, vector<8x16xf32> -> vector<8x16xf32>
    %110 = tpu.concatenate %58, %75, %92, %109 in 1 : vector<8x16xf32>, vector<8x16xf32>, vector<8x16xf32>, vector<8x16xf32> -> vector<8x64xf32>
    %111 = arith.addf %39, %110 : vector<8x64xf32>
    %cst_57 = arith.constant dense<0.000000e+00> : vector<8xf32>
    %112 = vector.multi_reduction <add>, %111, %cst_57 [1] : vector<8x64xf32> to vector<8xf32>
    %113 = vector.shape_cast %112 : vector<8xf32> to vector<8x1xf32>
    %cst_58 = arith.constant 6.400000e+01 : f32
    %114 = vector.broadcast %cst_58 : f32 to vector<8x1xf32>
    %115 = arith.divf %113, %114 : vector<8x1xf32>
    %116 = vector.broadcast %115 : vector<8x1xf32> to vector<8x64xf32>
    %117 = arith.subf %111, %116 : vector<8x64xf32>
    %118 = arith.mulf %117, %117 : vector<8x64xf32>
    %cst_59 = arith.constant dense<0.000000e+00> : vector<8xf32>
    %119 = vector.multi_reduction <add>, %118, %cst_59 [1] : vector<8x64xf32> to vector<8xf32>
    %120 = vector.shape_cast %119 : vector<8xf32> to vector<8x1xf32>
    %cst_60 = arith.constant 6.400000e+01 : f32
    %121 = vector.broadcast %cst_60 : f32 to vector<8x1xf32>
    %122 = arith.divf %120, %121 : vector<8x1xf32>
    %cst_61 = arith.constant 9.99999974E-6 : f32
    %123 = vector.broadcast %cst_61 : f32 to vector<8x1xf32>
    %124 = arith.addf %122, %123 : vector<8x1xf32>
    %125 = math.rsqrt %124 : vector<8x1xf32>
    %126 = vector.broadcast %125 : vector<8x1xf32> to vector<8x64xf32>
    %127 = arith.mulf %117, %126 : vector<8x64xf32>
    %cst_62 = arith.constant dense<0.000000e+00> : vector<8x64xf32>
    %128 = tpu.matmul %127, %36, %cst_62 {dimension_numbers = #tpu.dot_dimension_numbers<[1], [0], [0], [1], [0, 0, 1, 1], [], []>} : vector<8x64xf32>, vector<64x64xf32>, vector<8x64xf32> -> vector<8x64xf32>
    %129 = vector.broadcast %38 : vector<1x64xf32> to vector<8x64xf32>
    %130 = arith.addf %128, %129 : vector<8x64xf32>
    %cst_63 = arith.constant 0.000000e+00 : f32
    %131 = vector.broadcast %cst_63 : f32 to vector<8x64xf32>
    %132 = arith.maximumf %130, %131 : vector<8x64xf32>
    %133 = arith.addf %127, %132 : vector<8x64xf32>
    %cst_64 = arith.constant dense<0.000000e+00> : vector<8xf32>
    %134 = vector.multi_reduction <add>, %133, %cst_64 [1] : vector<8x64xf32> to vector<8xf32>
    %135 = vector.shape_cast %134 : vector<8xf32> to vector<8x1xf32>
    %cst_65 = arith.constant 6.400000e+01 : f32
    %136 = vector.broadcast %cst_65 : f32 to vector<8x1xf32>
    %137 = arith.divf %135, %136 : vector<8x1xf32>
    %138 = vector.broadcast %137 : vector<8x1xf32> to vector<8x64xf32>
    %139 = arith.subf %133, %138 : vector<8x64xf32>
    %140 = arith.mulf %139, %139 : vector<8x64xf32>
    %cst_66 = arith.constant dense<0.000000e+00> : vector<8xf32>
    %141 = vector.multi_reduction <add>, %140, %cst_66 [1] : vector<8x64xf32> to vector<8xf32>
    %142 = vector.shape_cast %141 : vector<8xf32> to vector<8x1xf32>
    %cst_67 = arith.constant 6.400000e+01 : f32
    %143 = vector.broadcast %cst_67 : f32 to vector<8x1xf32>
    %144 = arith.divf %142, %143 : vector<8x1xf32>
    %cst_68 = arith.constant 9.99999974E-6 : f32
    %145 = vector.broadcast %cst_68 : f32 to vector<8x1xf32>
    %146 = arith.addf %144, %145 : vector<8x1xf32>
    %147 = math.rsqrt %146 : vector<8x1xf32>
    %148 = vector.broadcast %147 : vector<8x1xf32> to vector<8x64xf32>
    %149 = arith.mulf %139, %148 : vector<8x64xf32>
    %c1 = arith.constant 1 : index
    %c0_69 = arith.constant 0 : index
    %c0_70 = arith.constant 0 : index
    %150 = vector.load %arg9[%c1, %c0_69, %c0_70] : memref<2x64x64xf32, #tpu.memory_space<vmem>>, vector<1x64x64xf32>
    %151 = vector.shape_cast %150 : vector<1x64x64xf32> to vector<64x64xf32>
    %c1_71 = arith.constant 1 : index
    %c0_72 = arith.constant 0 : index
    %c0_73 = arith.constant 0 : index
    %152 = vector.load %arg10[%c1_71, %c0_72, %c0_73] : memref<2x64x64xf32, #tpu.memory_space<vmem>>, vector<1x64x64xf32>
    %153 = vector.shape_cast %152 : vector<1x64x64xf32> to vector<64x64xf32>
    %c1_74 = arith.constant 1 : index
    %c0_75 = arith.constant 0 : index
    %c0_76 = arith.constant 0 : index
    %154 = vector.load %arg11[%c1_74, %c0_75, %c0_76] : memref<2x64x64xf32, #tpu.memory_space<vmem>>, vector<1x64x64xf32>
    %155 = vector.shape_cast %154 : vector<1x64x64xf32> to vector<64x64xf32>
    %c1_77 = arith.constant 1 : index
    %c0_78 = arith.constant 0 : index
    %c0_79 = arith.constant 0 : index
    %156 = vector.load %arg12[%c1_77, %c0_78, %c0_79] : memref<2x64x64xf32, #tpu.memory_space<vmem>>, vector<1x64x64xf32>
    %157 = vector.shape_cast %156 : vector<1x64x64xf32> to vector<64x64xf32>
    %c1_80 = arith.constant 1 : index
    %c0_81 = arith.constant 0 : index
    %c0_82 = arith.constant 0 : index
    %158 = vector.load %arg13[%c1_80, %c0_81, %c0_82] : memref<2x1x64xf32, #tpu.memory_space<vmem>>, vector<1x1x64xf32>
    %159 = vector.shape_cast %158 : vector<1x1x64xf32> to vector<1x64xf32>
    %cst_83 = arith.constant dense<0.000000e+00> : vector<8x64xf32>
    %160 = tpu.matmul %149, %151, %cst_83 {dimension_numbers = #tpu.dot_dimension_numbers<[1], [0], [0], [1], [0, 0, 1, 1], [], []>} : vector<8x64xf32>, vector<64x64xf32>, vector<8x64xf32> -> vector<8x64xf32>
    %cst_84 = arith.constant dense<0.000000e+00> : vector<8x64xf32>
    %161 = tpu.matmul %27, %153, %cst_84 {dimension_numbers = #tpu.dot_dimension_numbers<[1], [0], [0], [1], [0, 0, 1, 1], [], []>} : vector<8x64xf32>, vector<64x64xf32>, vector<8x64xf32> -> vector<8x64xf32>
    %cst_85 = arith.constant dense<0.000000e+00> : vector<8x64xf32>
    %162 = tpu.matmul %27, %155, %cst_85 {dimension_numbers = #tpu.dot_dimension_numbers<[1], [0], [0], [1], [0, 0, 1, 1], [], []>} : vector<8x64xf32>, vector<64x64xf32>, vector<8x64xf32> -> vector<8x64xf32>
    %163 = vector.extract_strided_slice %160 {offsets = [0, 0], sizes = [8, 16], strides = [1, 1]} : vector<8x64xf32> to vector<8x16xf32>
    %164 = vector.extract_strided_slice %161 {offsets = [0, 0], sizes = [8, 16], strides = [1, 1]} : vector<8x64xf32> to vector<8x16xf32>
    %cst_86 = arith.constant dense<0.000000e+00> : vector<8x8xf32>
    %165 = tpu.matmul %163, %164, %cst_86 {dimension_numbers = #tpu.dot_dimension_numbers<[1], [1], [0], [0], [0, 0, 1, 0], [], []>} : vector<8x16xf32>, vector<8x16xf32>, vector<8x8xf32> -> vector<8x8xf32>
    %cst_87 = arith.constant 1.250000e-01 : f32
    %166 = vector.broadcast %cst_87 : f32 to vector<8x8xf32>
    %167 = arith.mulf %165, %166 : vector<8x8xf32>
    %cst_88 = arith.constant dense<0xFF800000> : vector<8xf32>
    %168 = vector.multi_reduction <maximumf>, %167, %cst_88 [1] : vector<8x8xf32> to vector<8xf32>
    %169 = vector.shape_cast %168 : vector<8xf32> to vector<8x1xf32>
    %170 = vector.broadcast %169 : vector<8x1xf32> to vector<8x8xf32>
    %171 = arith.subf %167, %170 : vector<8x8xf32>
    %172 = math.exp %171 : vector<8x8xf32>
    %cst_89 = arith.constant dense<0.000000e+00> : vector<8xf32>
    %173 = vector.multi_reduction <add>, %172, %cst_89 [1] : vector<8x8xf32> to vector<8xf32>
    %174 = vector.shape_cast %173 : vector<8xf32> to vector<8x1xf32>
    %175 = tpu.reciprocal %174 {approx = true} : vector<8x1xf32> -> vector<8x1xf32>
    %176 = vector.broadcast %175 : vector<8x1xf32> to vector<8x8xf32>
    %177 = arith.mulf %172, %176 : vector<8x8xf32>
    %178 = vector.extract_strided_slice %162 {offsets = [0, 0], sizes = [8, 16], strides = [1, 1]} : vector<8x64xf32> to vector<8x16xf32>
    %cst_90 = arith.constant dense<0.000000e+00> : vector<8x16xf32>
    %179 = tpu.matmul %177, %178, %cst_90 {dimension_numbers = #tpu.dot_dimension_numbers<[1], [0], [0], [1], [0, 0, 1, 1], [], []>} : vector<8x8xf32>, vector<8x16xf32>, vector<8x16xf32> -> vector<8x16xf32>
    %180 = vector.extract_strided_slice %160 {offsets = [0, 16], sizes = [8, 16], strides = [1, 1]} : vector<8x64xf32> to vector<8x16xf32>
    %181 = vector.extract_strided_slice %161 {offsets = [0, 16], sizes = [8, 16], strides = [1, 1]} : vector<8x64xf32> to vector<8x16xf32>
    %cst_91 = arith.constant dense<0.000000e+00> : vector<8x8xf32>
    %182 = tpu.matmul %180, %181, %cst_91 {dimension_numbers = #tpu.dot_dimension_numbers<[1], [1], [0], [0], [0, 0, 1, 0], [], []>} : vector<8x16xf32>, vector<8x16xf32>, vector<8x8xf32> -> vector<8x8xf32>
    %cst_92 = arith.constant 1.250000e-01 : f32
    %183 = vector.broadcast %cst_92 : f32 to vector<8x8xf32>
    %184 = arith.mulf %182, %183 : vector<8x8xf32>
    %cst_93 = arith.constant dense<0xFF800000> : vector<8xf32>
    %185 = vector.multi_reduction <maximumf>, %184, %cst_93 [1] : vector<8x8xf32> to vector<8xf32>
    %186 = vector.shape_cast %185 : vector<8xf32> to vector<8x1xf32>
    %187 = vector.broadcast %186 : vector<8x1xf32> to vector<8x8xf32>
    %188 = arith.subf %184, %187 : vector<8x8xf32>
    %189 = math.exp %188 : vector<8x8xf32>
    %cst_94 = arith.constant dense<0.000000e+00> : vector<8xf32>
    %190 = vector.multi_reduction <add>, %189, %cst_94 [1] : vector<8x8xf32> to vector<8xf32>
    %191 = vector.shape_cast %190 : vector<8xf32> to vector<8x1xf32>
    %192 = tpu.reciprocal %191 {approx = true} : vector<8x1xf32> -> vector<8x1xf32>
    %193 = vector.broadcast %192 : vector<8x1xf32> to vector<8x8xf32>
    %194 = arith.mulf %189, %193 : vector<8x8xf32>
    %195 = vector.extract_strided_slice %162 {offsets = [0, 16], sizes = [8, 16], strides = [1, 1]} : vector<8x64xf32> to vector<8x16xf32>
    %cst_95 = arith.constant dense<0.000000e+00> : vector<8x16xf32>
    %196 = tpu.matmul %194, %195, %cst_95 {dimension_numbers = #tpu.dot_dimension_numbers<[1], [0], [0], [1], [0, 0, 1, 1], [], []>} : vector<8x8xf32>, vector<8x16xf32>, vector<8x16xf32> -> vector<8x16xf32>
    %197 = vector.extract_strided_slice %160 {offsets = [0, 32], sizes = [8, 16], strides = [1, 1]} : vector<8x64xf32> to vector<8x16xf32>
    %198 = vector.extract_strided_slice %161 {offsets = [0, 32], sizes = [8, 16], strides = [1, 1]} : vector<8x64xf32> to vector<8x16xf32>
    %cst_96 = arith.constant dense<0.000000e+00> : vector<8x8xf32>
    %199 = tpu.matmul %197, %198, %cst_96 {dimension_numbers = #tpu.dot_dimension_numbers<[1], [1], [0], [0], [0, 0, 1, 0], [], []>} : vector<8x16xf32>, vector<8x16xf32>, vector<8x8xf32> -> vector<8x8xf32>
    %cst_97 = arith.constant 1.250000e-01 : f32
    %200 = vector.broadcast %cst_97 : f32 to vector<8x8xf32>
    %201 = arith.mulf %199, %200 : vector<8x8xf32>
    %cst_98 = arith.constant dense<0xFF800000> : vector<8xf32>
    %202 = vector.multi_reduction <maximumf>, %201, %cst_98 [1] : vector<8x8xf32> to vector<8xf32>
    %203 = vector.shape_cast %202 : vector<8xf32> to vector<8x1xf32>
    %204 = vector.broadcast %203 : vector<8x1xf32> to vector<8x8xf32>
    %205 = arith.subf %201, %204 : vector<8x8xf32>
    %206 = math.exp %205 : vector<8x8xf32>
    %cst_99 = arith.constant dense<0.000000e+00> : vector<8xf32>
    %207 = vector.multi_reduction <add>, %206, %cst_99 [1] : vector<8x8xf32> to vector<8xf32>
    %208 = vector.shape_cast %207 : vector<8xf32> to vector<8x1xf32>
    %209 = tpu.reciprocal %208 {approx = true} : vector<8x1xf32> -> vector<8x1xf32>
    %210 = vector.broadcast %209 : vector<8x1xf32> to vector<8x8xf32>
    %211 = arith.mulf %206, %210 : vector<8x8xf32>
    %212 = vector.extract_strided_slice %162 {offsets = [0, 32], sizes = [8, 16], strides = [1, 1]} : vector<8x64xf32> to vector<8x16xf32>
    %cst_100 = arith.constant dense<0.000000e+00> : vector<8x16xf32>
    %213 = tpu.matmul %211, %212, %cst_100 {dimension_numbers = #tpu.dot_dimension_numbers<[1], [0], [0], [1], [0, 0, 1, 1], [], []>} : vector<8x8xf32>, vector<8x16xf32>, vector<8x16xf32> -> vector<8x16xf32>
    %214 = vector.extract_strided_slice %160 {offsets = [0, 48], sizes = [8, 16], strides = [1, 1]} : vector<8x64xf32> to vector<8x16xf32>
    %215 = vector.extract_strided_slice %161 {offsets = [0, 48], sizes = [8, 16], strides = [1, 1]} : vector<8x64xf32> to vector<8x16xf32>
    %cst_101 = arith.constant dense<0.000000e+00> : vector<8x8xf32>
    %216 = tpu.matmul %214, %215, %cst_101 {dimension_numbers = #tpu.dot_dimension_numbers<[1], [1], [0], [0], [0, 0, 1, 0], [], []>} : vector<8x16xf32>, vector<8x16xf32>, vector<8x8xf32> -> vector<8x8xf32>
    %cst_102 = arith.constant 1.250000e-01 : f32
    %217 = vector.broadcast %cst_102 : f32 to vector<8x8xf32>
    %218 = arith.mulf %216, %217 : vector<8x8xf32>
    %cst_103 = arith.constant dense<0xFF800000> : vector<8xf32>
    %219 = vector.multi_reduction <maximumf>, %218, %cst_103 [1] : vector<8x8xf32> to vector<8xf32>
    %220 = vector.shape_cast %219 : vector<8xf32> to vector<8x1xf32>
    %221 = vector.broadcast %220 : vector<8x1xf32> to vector<8x8xf32>
    %222 = arith.subf %218, %221 : vector<8x8xf32>
    %223 = math.exp %222 : vector<8x8xf32>
    %cst_104 = arith.constant dense<0.000000e+00> : vector<8xf32>
    %224 = vector.multi_reduction <add>, %223, %cst_104 [1] : vector<8x8xf32> to vector<8xf32>
    %225 = vector.shape_cast %224 : vector<8xf32> to vector<8x1xf32>
    %226 = tpu.reciprocal %225 {approx = true} : vector<8x1xf32> -> vector<8x1xf32>
    %227 = vector.broadcast %226 : vector<8x1xf32> to vector<8x8xf32>
    %228 = arith.mulf %223, %227 : vector<8x8xf32>
    %229 = vector.extract_strided_slice %162 {offsets = [0, 48], sizes = [8, 16], strides = [1, 1]} : vector<8x64xf32> to vector<8x16xf32>
    %cst_105 = arith.constant dense<0.000000e+00> : vector<8x16xf32>
    %230 = tpu.matmul %228, %229, %cst_105 {dimension_numbers = #tpu.dot_dimension_numbers<[1], [0], [0], [1], [0, 0, 1, 1], [], []>} : vector<8x8xf32>, vector<8x16xf32>, vector<8x16xf32> -> vector<8x16xf32>
    %231 = tpu.concatenate %179, %196, %213, %230 in 1 : vector<8x16xf32>, vector<8x16xf32>, vector<8x16xf32>, vector<8x16xf32> -> vector<8x64xf32>
    %232 = arith.addf %160, %231 : vector<8x64xf32>
    %cst_106 = arith.constant dense<0.000000e+00> : vector<8xf32>
    %233 = vector.multi_reduction <add>, %232, %cst_106 [1] : vector<8x64xf32> to vector<8xf32>
    %234 = vector.shape_cast %233 : vector<8xf32> to vector<8x1xf32>
    %cst_107 = arith.constant 6.400000e+01 : f32
    %235 = vector.broadcast %cst_107 : f32 to vector<8x1xf32>
    %236 = arith.divf %234, %235 : vector<8x1xf32>
    %237 = vector.broadcast %236 : vector<8x1xf32> to vector<8x64xf32>
    %238 = arith.subf %232, %237 : vector<8x64xf32>
    %239 = arith.mulf %238, %238 : vector<8x64xf32>
    %cst_108 = arith.constant dense<0.000000e+00> : vector<8xf32>
    %240 = vector.multi_reduction <add>, %239, %cst_108 [1] : vector<8x64xf32> to vector<8xf32>
    %241 = vector.shape_cast %240 : vector<8xf32> to vector<8x1xf32>
    %cst_109 = arith.constant 6.400000e+01 : f32
    %242 = vector.broadcast %cst_109 : f32 to vector<8x1xf32>
    %243 = arith.divf %241, %242 : vector<8x1xf32>
    %cst_110 = arith.constant 9.99999974E-6 : f32
    %244 = vector.broadcast %cst_110 : f32 to vector<8x1xf32>
    %245 = arith.addf %243, %244 : vector<8x1xf32>
    %246 = math.rsqrt %245 : vector<8x1xf32>
    %247 = vector.broadcast %246 : vector<8x1xf32> to vector<8x64xf32>
    %248 = arith.mulf %238, %247 : vector<8x64xf32>
    %cst_111 = arith.constant dense<0.000000e+00> : vector<8x64xf32>
    %249 = tpu.matmul %248, %157, %cst_111 {dimension_numbers = #tpu.dot_dimension_numbers<[1], [0], [0], [1], [0, 0, 1, 1], [], []>} : vector<8x64xf32>, vector<64x64xf32>, vector<8x64xf32> -> vector<8x64xf32>
    %250 = vector.broadcast %159 : vector<1x64xf32> to vector<8x64xf32>
    %251 = arith.addf %249, %250 : vector<8x64xf32>
    %cst_112 = arith.constant 0.000000e+00 : f32
    %252 = vector.broadcast %cst_112 : f32 to vector<8x64xf32>
    %253 = arith.maximumf %251, %252 : vector<8x64xf32>
    %254 = arith.addf %248, %253 : vector<8x64xf32>
    %cst_113 = arith.constant dense<0.000000e+00> : vector<8xf32>
    %255 = vector.multi_reduction <add>, %254, %cst_113 [1] : vector<8x64xf32> to vector<8xf32>
    %256 = vector.shape_cast %255 : vector<8xf32> to vector<8x1xf32>
    %cst_114 = arith.constant 6.400000e+01 : f32
    %257 = vector.broadcast %cst_114 : f32 to vector<8x1xf32>
    %258 = arith.divf %256, %257 : vector<8x1xf32>
    %259 = vector.broadcast %258 : vector<8x1xf32> to vector<8x64xf32>
    %260 = arith.subf %254, %259 : vector<8x64xf32>
    %261 = arith.mulf %260, %260 : vector<8x64xf32>
    %cst_115 = arith.constant dense<0.000000e+00> : vector<8xf32>
    %262 = vector.multi_reduction <add>, %261, %cst_115 [1] : vector<8x64xf32> to vector<8xf32>
    %263 = vector.shape_cast %262 : vector<8xf32> to vector<8x1xf32>
    %cst_116 = arith.constant 6.400000e+01 : f32
    %264 = vector.broadcast %cst_116 : f32 to vector<8x1xf32>
    %265 = arith.divf %263, %264 : vector<8x1xf32>
    %cst_117 = arith.constant 9.99999974E-6 : f32
    %266 = vector.broadcast %cst_117 : f32 to vector<8x1xf32>
    %267 = arith.addf %265, %266 : vector<8x1xf32>
    %268 = math.rsqrt %267 : vector<8x1xf32>
    %269 = vector.broadcast %268 : vector<8x1xf32> to vector<8x64xf32>
    %270 = arith.mulf %260, %269 : vector<8x64xf32>
    %c0_118 = arith.constant 0 : index
    %c0_119 = arith.constant 0 : index
    %271 = vector.load %arg14[%c0_118, %c0_119] : memref<1x64xf32, #tpu.memory_space<vmem>>, vector<1x64xf32>
    %c0_120 = arith.constant 0 : index
    %c0_121 = arith.constant 0 : index
    %272 = vector.load %arg15[%c0_120, %c0_121] : memref<1x64xf32, #tpu.memory_space<vmem>>, vector<1x64xf32>
    %c0_122 = arith.constant 0 : index
    %c0_123 = arith.constant 0 : index
    %273 = vector.load %arg16[%c0_122, %c0_123] : memref<64x64xf32, #tpu.memory_space<vmem>>, vector<64x64xf32>
    %c0_124 = arith.constant 0 : index
    %c0_125 = arith.constant 0 : index
    %274 = vector.load %arg17[%c0_124, %c0_125] : memref<1x64xf32, #tpu.memory_space<vmem>>, vector<1x64xf32>
    %275 = vector.broadcast %3 : vector<16x1xf32> to vector<16x64xf32>
    %276 = vector.broadcast %271 : vector<1x64xf32> to vector<16x64xf32>
    %277 = arith.mulf %275, %276 : vector<16x64xf32>
    %278 = vector.broadcast %272 : vector<1x64xf32> to vector<16x64xf32>
    %279 = arith.addf %277, %278 : vector<16x64xf32>
    %cst_126 = arith.constant 0.000000e+00 : f32
    %280 = vector.broadcast %cst_126 : f32 to vector<16x64xf32>
    %281 = arith.maximumf %279, %280 : vector<16x64xf32>
    %cst_127 = arith.constant dense<0.000000e+00> : vector<16x64xf32>
    %282 = tpu.matmul %281, %273, %cst_127 {dimension_numbers = #tpu.dot_dimension_numbers<[1], [0], [0], [1], [0, 0, 1, 1], [], []>} : vector<16x64xf32>, vector<64x64xf32>, vector<16x64xf32> -> vector<16x64xf32>
    %283 = vector.broadcast %274 : vector<1x64xf32> to vector<16x64xf32>
    %284 = arith.addf %282, %283 : vector<16x64xf32>
    %c0_128 = arith.constant 0 : index
    %c0_129 = arith.constant 0 : index
    %285 = vector.load %arg18[%c0_128, %c0_129] : memref<64x64xf32, #tpu.memory_space<vmem>>, vector<64x64xf32>
    %c0_130 = arith.constant 0 : index
    %c0_131 = arith.constant 0 : index
    %286 = vector.load %arg19[%c0_130, %c0_131] : memref<64x64xf32, #tpu.memory_space<vmem>>, vector<64x64xf32>
    %c0_132 = arith.constant 0 : index
    %c0_133 = arith.constant 0 : index
    %287 = vector.load %arg20[%c0_132, %c0_133] : memref<64x64xf32, #tpu.memory_space<vmem>>, vector<64x64xf32>
    %c0_134 = arith.constant 0 : index
    %c0_135 = arith.constant 0 : index
    %288 = vector.load %arg21[%c0_134, %c0_135] : memref<64x64xf32, #tpu.memory_space<vmem>>, vector<64x64xf32>
    %c0_136 = arith.constant 0 : index
    %c0_137 = arith.constant 0 : index
    %289 = vector.load %arg22[%c0_136, %c0_137] : memref<1x64xf32, #tpu.memory_space<vmem>>, vector<1x64xf32>
    %cst_138 = arith.constant dense<0.000000e+00> : vector<16x64xf32>
    %290 = tpu.matmul %284, %285, %cst_138 {dimension_numbers = #tpu.dot_dimension_numbers<[1], [0], [0], [1], [0, 0, 1, 1], [], []>} : vector<16x64xf32>, vector<64x64xf32>, vector<16x64xf32> -> vector<16x64xf32>
    %cst_139 = arith.constant dense<0.000000e+00> : vector<8x64xf32>
    %291 = tpu.matmul %270, %286, %cst_139 {dimension_numbers = #tpu.dot_dimension_numbers<[1], [0], [0], [1], [0, 0, 1, 1], [], []>} : vector<8x64xf32>, vector<64x64xf32>, vector<8x64xf32> -> vector<8x64xf32>
    %cst_140 = arith.constant dense<0.000000e+00> : vector<8x64xf32>
    %292 = tpu.matmul %270, %287, %cst_140 {dimension_numbers = #tpu.dot_dimension_numbers<[1], [0], [0], [1], [0, 0, 1, 1], [], []>} : vector<8x64xf32>, vector<64x64xf32>, vector<8x64xf32> -> vector<8x64xf32>
    %293 = vector.extract_strided_slice %290 {offsets = [0, 0], sizes = [16, 16], strides = [1, 1]} : vector<16x64xf32> to vector<16x16xf32>
    %294 = vector.extract_strided_slice %291 {offsets = [0, 0], sizes = [8, 16], strides = [1, 1]} : vector<8x64xf32> to vector<8x16xf32>
    %cst_141 = arith.constant dense<0.000000e+00> : vector<16x8xf32>
    %295 = tpu.matmul %293, %294, %cst_141 {dimension_numbers = #tpu.dot_dimension_numbers<[1], [1], [0], [0], [0, 0, 1, 0], [], []>} : vector<16x16xf32>, vector<8x16xf32>, vector<16x8xf32> -> vector<16x8xf32>
    %cst_142 = arith.constant 1.250000e-01 : f32
    %296 = vector.broadcast %cst_142 : f32 to vector<16x8xf32>
    %297 = arith.mulf %295, %296 : vector<16x8xf32>
    %cst_143 = arith.constant dense<0xFF800000> : vector<16xf32>
    %298 = vector.multi_reduction <maximumf>, %297, %cst_143 [1] : vector<16x8xf32> to vector<16xf32>
    %299 = vector.shape_cast %298 : vector<16xf32> to vector<16x1xf32>
    %300 = vector.broadcast %299 : vector<16x1xf32> to vector<16x8xf32>
    %301 = arith.subf %297, %300 : vector<16x8xf32>
    %302 = math.exp %301 : vector<16x8xf32>
    %cst_144 = arith.constant dense<0.000000e+00> : vector<16xf32>
    %303 = vector.multi_reduction <add>, %302, %cst_144 [1] : vector<16x8xf32> to vector<16xf32>
    %304 = vector.shape_cast %303 : vector<16xf32> to vector<16x1xf32>
    %305 = tpu.reciprocal %304 {approx = true} : vector<16x1xf32> -> vector<16x1xf32>
    %306 = vector.broadcast %305 : vector<16x1xf32> to vector<16x8xf32>
    %307 = arith.mulf %302, %306 : vector<16x8xf32>
    %308 = vector.extract_strided_slice %292 {offsets = [0, 0], sizes = [8, 16], strides = [1, 1]} : vector<8x64xf32> to vector<8x16xf32>
    %cst_145 = arith.constant dense<0.000000e+00> : vector<16x16xf32>
    %309 = tpu.matmul %307, %308, %cst_145 {dimension_numbers = #tpu.dot_dimension_numbers<[1], [0], [0], [1], [0, 0, 1, 1], [], []>} : vector<16x8xf32>, vector<8x16xf32>, vector<16x16xf32> -> vector<16x16xf32>
    %310 = vector.extract_strided_slice %290 {offsets = [0, 16], sizes = [16, 16], strides = [1, 1]} : vector<16x64xf32> to vector<16x16xf32>
    %311 = vector.extract_strided_slice %291 {offsets = [0, 16], sizes = [8, 16], strides = [1, 1]} : vector<8x64xf32> to vector<8x16xf32>
    %cst_146 = arith.constant dense<0.000000e+00> : vector<16x8xf32>
    %312 = tpu.matmul %310, %311, %cst_146 {dimension_numbers = #tpu.dot_dimension_numbers<[1], [1], [0], [0], [0, 0, 1, 0], [], []>} : vector<16x16xf32>, vector<8x16xf32>, vector<16x8xf32> -> vector<16x8xf32>
    %cst_147 = arith.constant 1.250000e-01 : f32
    %313 = vector.broadcast %cst_147 : f32 to vector<16x8xf32>
    %314 = arith.mulf %312, %313 : vector<16x8xf32>
    %cst_148 = arith.constant dense<0xFF800000> : vector<16xf32>
    %315 = vector.multi_reduction <maximumf>, %314, %cst_148 [1] : vector<16x8xf32> to vector<16xf32>
    %316 = vector.shape_cast %315 : vector<16xf32> to vector<16x1xf32>
    %317 = vector.broadcast %316 : vector<16x1xf32> to vector<16x8xf32>
    %318 = arith.subf %314, %317 : vector<16x8xf32>
    %319 = math.exp %318 : vector<16x8xf32>
    %cst_149 = arith.constant dense<0.000000e+00> : vector<16xf32>
    %320 = vector.multi_reduction <add>, %319, %cst_149 [1] : vector<16x8xf32> to vector<16xf32>
    %321 = vector.shape_cast %320 : vector<16xf32> to vector<16x1xf32>
    %322 = tpu.reciprocal %321 {approx = true} : vector<16x1xf32> -> vector<16x1xf32>
    %323 = vector.broadcast %322 : vector<16x1xf32> to vector<16x8xf32>
    %324 = arith.mulf %319, %323 : vector<16x8xf32>
    %325 = vector.extract_strided_slice %292 {offsets = [0, 16], sizes = [8, 16], strides = [1, 1]} : vector<8x64xf32> to vector<8x16xf32>
    %cst_150 = arith.constant dense<0.000000e+00> : vector<16x16xf32>
    %326 = tpu.matmul %324, %325, %cst_150 {dimension_numbers = #tpu.dot_dimension_numbers<[1], [0], [0], [1], [0, 0, 1, 1], [], []>} : vector<16x8xf32>, vector<8x16xf32>, vector<16x16xf32> -> vector<16x16xf32>
    %327 = vector.extract_strided_slice %290 {offsets = [0, 32], sizes = [16, 16], strides = [1, 1]} : vector<16x64xf32> to vector<16x16xf32>
    %328 = vector.extract_strided_slice %291 {offsets = [0, 32], sizes = [8, 16], strides = [1, 1]} : vector<8x64xf32> to vector<8x16xf32>
    %cst_151 = arith.constant dense<0.000000e+00> : vector<16x8xf32>
    %329 = tpu.matmul %327, %328, %cst_151 {dimension_numbers = #tpu.dot_dimension_numbers<[1], [1], [0], [0], [0, 0, 1, 0], [], []>} : vector<16x16xf32>, vector<8x16xf32>, vector<16x8xf32> -> vector<16x8xf32>
    %cst_152 = arith.constant 1.250000e-01 : f32
    %330 = vector.broadcast %cst_152 : f32 to vector<16x8xf32>
    %331 = arith.mulf %329, %330 : vector<16x8xf32>
    %cst_153 = arith.constant dense<0xFF800000> : vector<16xf32>
    %332 = vector.multi_reduction <maximumf>, %331, %cst_153 [1] : vector<16x8xf32> to vector<16xf32>
    %333 = vector.shape_cast %332 : vector<16xf32> to vector<16x1xf32>
    %334 = vector.broadcast %333 : vector<16x1xf32> to vector<16x8xf32>
    %335 = arith.subf %331, %334 : vector<16x8xf32>
    %336 = math.exp %335 : vector<16x8xf32>
    %cst_154 = arith.constant dense<0.000000e+00> : vector<16xf32>
    %337 = vector.multi_reduction <add>, %336, %cst_154 [1] : vector<16x8xf32> to vector<16xf32>
    %338 = vector.shape_cast %337 : vector<16xf32> to vector<16x1xf32>
    %339 = tpu.reciprocal %338 {approx = true} : vector<16x1xf32> -> vector<16x1xf32>
    %340 = vector.broadcast %339 : vector<16x1xf32> to vector<16x8xf32>
    %341 = arith.mulf %336, %340 : vector<16x8xf32>
    %342 = vector.extract_strided_slice %292 {offsets = [0, 32], sizes = [8, 16], strides = [1, 1]} : vector<8x64xf32> to vector<8x16xf32>
    %cst_155 = arith.constant dense<0.000000e+00> : vector<16x16xf32>
    %343 = tpu.matmul %341, %342, %cst_155 {dimension_numbers = #tpu.dot_dimension_numbers<[1], [0], [0], [1], [0, 0, 1, 1], [], []>} : vector<16x8xf32>, vector<8x16xf32>, vector<16x16xf32> -> vector<16x16xf32>
    %344 = vector.extract_strided_slice %290 {offsets = [0, 48], sizes = [16, 16], strides = [1, 1]} : vector<16x64xf32> to vector<16x16xf32>
    %345 = vector.extract_strided_slice %291 {offsets = [0, 48], sizes = [8, 16], strides = [1, 1]} : vector<8x64xf32> to vector<8x16xf32>
    %cst_156 = arith.constant dense<0.000000e+00> : vector<16x8xf32>
    %346 = tpu.matmul %344, %345, %cst_156 {dimension_numbers = #tpu.dot_dimension_numbers<[1], [1], [0], [0], [0, 0, 1, 0], [], []>} : vector<16x16xf32>, vector<8x16xf32>, vector<16x8xf32> -> vector<16x8xf32>
    %cst_157 = arith.constant 1.250000e-01 : f32
    %347 = vector.broadcast %cst_157 : f32 to vector<16x8xf32>
    %348 = arith.mulf %346, %347 : vector<16x8xf32>
    %cst_158 = arith.constant dense<0xFF800000> : vector<16xf32>
    %349 = vector.multi_reduction <maximumf>, %348, %cst_158 [1] : vector<16x8xf32> to vector<16xf32>
    %350 = vector.shape_cast %349 : vector<16xf32> to vector<16x1xf32>
    %351 = vector.broadcast %350 : vector<16x1xf32> to vector<16x8xf32>
    %352 = arith.subf %348, %351 : vector<16x8xf32>
    %353 = math.exp %352 : vector<16x8xf32>
    %cst_159 = arith.constant dense<0.000000e+00> : vector<16xf32>
    %354 = vector.multi_reduction <add>, %353, %cst_159 [1] : vector<16x8xf32> to vector<16xf32>
    %355 = vector.shape_cast %354 : vector<16xf32> to vector<16x1xf32>
    %356 = tpu.reciprocal %355 {approx = true} : vector<16x1xf32> -> vector<16x1xf32>
    %357 = vector.broadcast %356 : vector<16x1xf32> to vector<16x8xf32>
    %358 = arith.mulf %353, %357 : vector<16x8xf32>
    %359 = vector.extract_strided_slice %292 {offsets = [0, 48], sizes = [8, 16], strides = [1, 1]} : vector<8x64xf32> to vector<8x16xf32>
    %cst_160 = arith.constant dense<0.000000e+00> : vector<16x16xf32>
    %360 = tpu.matmul %358, %359, %cst_160 {dimension_numbers = #tpu.dot_dimension_numbers<[1], [0], [0], [1], [0, 0, 1, 1], [], []>} : vector<16x8xf32>, vector<8x16xf32>, vector<16x16xf32> -> vector<16x16xf32>
    %361 = tpu.concatenate %309, %326, %343, %360 in 1 : vector<16x16xf32>, vector<16x16xf32>, vector<16x16xf32>, vector<16x16xf32> -> vector<16x64xf32>
    %362 = arith.addf %290, %361 : vector<16x64xf32>
    %cst_161 = arith.constant dense<0.000000e+00> : vector<16xf32>
    %363 = vector.multi_reduction <add>, %362, %cst_161 [1] : vector<16x64xf32> to vector<16xf32>
    %364 = vector.shape_cast %363 : vector<16xf32> to vector<16x1xf32>
    %cst_162 = arith.constant 6.400000e+01 : f32
    %365 = vector.broadcast %cst_162 : f32 to vector<16x1xf32>
    %366 = arith.divf %364, %365 : vector<16x1xf32>
    %367 = vector.broadcast %366 : vector<16x1xf32> to vector<16x64xf32>
    %368 = arith.subf %362, %367 : vector<16x64xf32>
    %369 = arith.mulf %368, %368 : vector<16x64xf32>
    %cst_163 = arith.constant dense<0.000000e+00> : vector<16xf32>
    %370 = vector.multi_reduction <add>, %369, %cst_163 [1] : vector<16x64xf32> to vector<16xf32>
    %371 = vector.shape_cast %370 : vector<16xf32> to vector<16x1xf32>
    %cst_164 = arith.constant 6.400000e+01 : f32
    %372 = vector.broadcast %cst_164 : f32 to vector<16x1xf32>
    %373 = arith.divf %371, %372 : vector<16x1xf32>
    %cst_165 = arith.constant 9.99999974E-6 : f32
    %374 = vector.broadcast %cst_165 : f32 to vector<16x1xf32>
    %375 = arith.addf %373, %374 : vector<16x1xf32>
    %376 = math.rsqrt %375 : vector<16x1xf32>
    %377 = vector.broadcast %376 : vector<16x1xf32> to vector<16x64xf32>
    %378 = arith.mulf %368, %377 : vector<16x64xf32>
    %cst_166 = arith.constant dense<0.000000e+00> : vector<16x64xf32>
    %379 = tpu.matmul %378, %288, %cst_166 {dimension_numbers = #tpu.dot_dimension_numbers<[1], [0], [0], [1], [0, 0, 1, 1], [], []>} : vector<16x64xf32>, vector<64x64xf32>, vector<16x64xf32> -> vector<16x64xf32>
    %380 = vector.broadcast %289 : vector<1x64xf32> to vector<16x64xf32>
    %381 = arith.addf %379, %380 : vector<16x64xf32>
    %cst_167 = arith.constant 0.000000e+00 : f32
    %382 = vector.broadcast %cst_167 : f32 to vector<16x64xf32>
    %383 = arith.maximumf %381, %382 : vector<16x64xf32>
    %384 = arith.addf %378, %383 : vector<16x64xf32>
    %cst_168 = arith.constant dense<0.000000e+00> : vector<16xf32>
    %385 = vector.multi_reduction <add>, %384, %cst_168 [1] : vector<16x64xf32> to vector<16xf32>
    %386 = vector.shape_cast %385 : vector<16xf32> to vector<16x1xf32>
    %cst_169 = arith.constant 6.400000e+01 : f32
    %387 = vector.broadcast %cst_169 : f32 to vector<16x1xf32>
    %388 = arith.divf %386, %387 : vector<16x1xf32>
    %389 = vector.broadcast %388 : vector<16x1xf32> to vector<16x64xf32>
    %390 = arith.subf %384, %389 : vector<16x64xf32>
    %391 = arith.mulf %390, %390 : vector<16x64xf32>
    %cst_170 = arith.constant dense<0.000000e+00> : vector<16xf32>
    %392 = vector.multi_reduction <add>, %391, %cst_170 [1] : vector<16x64xf32> to vector<16xf32>
    %393 = vector.shape_cast %392 : vector<16xf32> to vector<16x1xf32>
    %cst_171 = arith.constant 6.400000e+01 : f32
    %394 = vector.broadcast %cst_171 : f32 to vector<16x1xf32>
    %395 = arith.divf %393, %394 : vector<16x1xf32>
    %cst_172 = arith.constant 9.99999974E-6 : f32
    %396 = vector.broadcast %cst_172 : f32 to vector<16x1xf32>
    %397 = arith.addf %395, %396 : vector<16x1xf32>
    %398 = math.rsqrt %397 : vector<16x1xf32>
    %399 = vector.broadcast %398 : vector<16x1xf32> to vector<16x64xf32>
    %400 = arith.mulf %390, %399 : vector<16x64xf32>
    %c0_173 = arith.constant 0 : index
    %c0_174 = arith.constant 0 : index
    %401 = vector.load %arg23[%c0_173, %c0_174] : memref<64x32xf32, #tpu.memory_space<vmem>>, vector<64x32xf32>
    %c0_175 = arith.constant 0 : index
    %c0_176 = arith.constant 0 : index
    %402 = vector.load %arg24[%c0_175, %c0_176] : memref<1x32xf32, #tpu.memory_space<vmem>>, vector<1x32xf32>
    %c0_177 = arith.constant 0 : index
    %c0_178 = arith.constant 0 : index
    %403 = vector.load %arg25[%c0_177, %c0_178] : memref<32x2xf32, #tpu.memory_space<vmem>>, vector<32x2xf32>
    %c0_179 = arith.constant 0 : index
    %c0_180 = arith.constant 0 : index
    %404 = vector.load %arg26[%c0_179, %c0_180] : memref<1x2xf32, #tpu.memory_space<vmem>>, vector<1x2xf32>
    %cst_181 = arith.constant dense<0.000000e+00> : vector<16x32xf32>
    %405 = tpu.matmul %400, %401, %cst_181 {dimension_numbers = #tpu.dot_dimension_numbers<[1], [0], [0], [1], [0, 0, 1, 1], [], []>} : vector<16x64xf32>, vector<64x32xf32>, vector<16x32xf32> -> vector<16x32xf32>
    %406 = vector.broadcast %402 : vector<1x32xf32> to vector<16x32xf32>
    %407 = arith.addf %405, %406 : vector<16x32xf32>
    %cst_182 = arith.constant 0.000000e+00 : f32
    %408 = vector.broadcast %cst_182 : f32 to vector<16x32xf32>
    %409 = arith.maximumf %407, %408 : vector<16x32xf32>
    %cst_183 = arith.constant dense<0.000000e+00> : vector<16x2xf32>
    %410 = tpu.matmul %409, %403, %cst_183 {dimension_numbers = #tpu.dot_dimension_numbers<[1], [0], [0], [1], [0, 0, 1, 1], [], []>} : vector<16x32xf32>, vector<32x2xf32>, vector<16x2xf32> -> vector<16x2xf32>
    %411 = vector.broadcast %404 : vector<1x2xf32> to vector<16x2xf32>
    %412 = arith.addf %410, %411 : vector<16x2xf32>
    %413 = vector.extract_strided_slice %412 {offsets = [0, 0], sizes = [16, 1], strides = [1, 1]} : vector<16x2xf32> to vector<16x1xf32>
    %414 = vector.extract_strided_slice %412 {offsets = [0, 1], sizes = [16, 1], strides = [1, 1]} : vector<16x2xf32> to vector<16x1xf32>
    %415 = arith.subf %5, %413 : vector<16x1xf32>
    %cst_184 = arith.constant 0.000000e+00 : f32
    %416 = vector.broadcast %cst_184 : f32 to vector<16x1xf32>
    %417 = arith.subf %416, %414 : vector<16x1xf32>
    %418 = math.exp %417 : vector<16x1xf32>
    %419 = arith.mulf %415, %418 : vector<16x1xf32>
    %cst_185 = arith.constant -5.000000e-01 : f32
    %420 = vector.broadcast %cst_185 : f32 to vector<16x1xf32>
    %421 = arith.mulf %420, %419 : vector<16x1xf32>
    %422 = arith.mulf %421, %419 : vector<16x1xf32>
    %423 = arith.subf %422, %414 : vector<16x1xf32>
    %cst_186 = arith.constant 0.918938517 : f32
    %424 = vector.broadcast %cst_186 : f32 to vector<16x1xf32>
    %425 = arith.subf %423, %424 : vector<16x1xf32>
    %cst_187 = arith.constant dense<0.000000e+00> : vector<16xf32>
    %426 = vector.multi_reduction <add>, %425, %cst_187 [1] : vector<16x1xf32> to vector<16xf32>
    %427 = vector.shape_cast %426 : vector<16xf32> to vector<16x1xf32>
    %c0_188 = arith.constant 0 : index
    %c0_189 = arith.constant 0 : index
    %c0_190 = arith.constant 0 : index
    %428 = vector.load %arg27[%c0_188, %c0_189, %c0_190] : memref<1x16x1xf32, #tpu.memory_space<vmem>>, vector<1x16x1xf32>
    %429 = vector.shape_cast %428 : vector<1x16x1xf32> to vector<16x1xf32>
    %430 = vector.shape_cast %427 : vector<16x1xf32> to vector<1x16x1xf32>
    tpu.vector_store %arg27[%c0_188, %c0_189, %c0_190], %430 {strides = array<i32>} : memref<1x16x1xf32, #tpu.memory_space<vmem>>, vector<1x16x1xf32>,
    return
  }
  func.func @transform_0(%arg0: i32) -> (i32, i32, i32) {
    %c0_i32 = arith.constant 0 : i32
    %c0_i32_0 = arith.constant 0 : i32
    %c0_i32_1 = arith.constant 0 : i32
    return %arg0, %c0_i32, %c0_i32_0 : i32, i32, i32
  }
  func.func @transform_1(%arg0: i32) -> (i32, i32, i32) {
    %c0_i32 = arith.constant 0 : i32
    %c0_i32_0 = arith.constant 0 : i32
    %c0_i32_1 = arith.constant 0 : i32
    return %arg0, %c0_i32, %c0_i32_0 : i32, i32, i32
  }
  func.func @transform_2(%arg0: i32) -> (i32, i32, i32) {
    %c0_i32 = arith.constant 0 : i32
    %c0_i32_0 = arith.constant 0 : i32
    %c0_i32_1 = arith.constant 0 : i32
    return %arg0, %c0_i32, %c0_i32_0 : i32, i32, i32
  }
  func.func @transform_3(%arg0: i32) -> (i32, i32) {
    %c0_i32 = arith.constant 0 : i32
    %c0_i32_0 = arith.constant 0 : i32
    %c0_i32_1 = arith.constant 0 : i32
    return %c0_i32, %c0_i32_0 : i32, i32
  }
  func.func @transform_4(%arg0: i32) -> (i32, i32) {
    %c0_i32 = arith.constant 0 : i32
    %c0_i32_0 = arith.constant 0 : i32
    %c0_i32_1 = arith.constant 0 : i32
    return %c0_i32, %c0_i32_0 : i32, i32
  }
  func.func @transform_5(%arg0: i32) -> (i32, i32) {
    %c0_i32 = arith.constant 0 : i32
    %c0_i32_0 = arith.constant 0 : i32
    %c0_i32_1 = arith.constant 0 : i32
    return %c0_i32, %c0_i32_0 : i32, i32
  }
  func.func @transform_6(%arg0: i32) -> (i32, i32) {
    %c0_i32 = arith.constant 0 : i32
    %c0_i32_0 = arith.constant 0 : i32
    %c0_i32_1 = arith.constant 0 : i32
    return %c0_i32, %c0_i32_0 : i32, i32
  }
  func.func @transform_7(%arg0: i32) -> (i32, i32) {
    %c0_i32 = arith.constant 0 : i32
    %c0_i32_0 = arith.constant 0 : i32
    %c0_i32_1 = arith.constant 0 : i32
    return %c0_i32, %c0_i32_0 : i32, i32
  }
  func.func @transform_8(%arg0: i32) -> (i32, i32, i32) {
    %c0_i32 = arith.constant 0 : i32
    %c0_i32_0 = arith.constant 0 : i32
    %c0_i32_1 = arith.constant 0 : i32
    %c0_i32_2 = arith.constant 0 : i32
    return %c0_i32, %c0_i32_0, %c0_i32_1 : i32, i32, i32
  }
  func.func @transform_9(%arg0: i32) -> (i32, i32, i32) {
    %c0_i32 = arith.constant 0 : i32
    %c0_i32_0 = arith.constant 0 : i32
    %c0_i32_1 = arith.constant 0 : i32
    %c0_i32_2 = arith.constant 0 : i32
    return %c0_i32, %c0_i32_0, %c0_i32_1 : i32, i32, i32
  }
  func.func @transform_10(%arg0: i32) -> (i32, i32, i32) {
    %c0_i32 = arith.constant 0 : i32
    %c0_i32_0 = arith.constant 0 : i32
    %c0_i32_1 = arith.constant 0 : i32
    %c0_i32_2 = arith.constant 0 : i32
    return %c0_i32, %c0_i32_0, %c0_i32_1 : i32, i32, i32
  }
  func.func @transform_11(%arg0: i32) -> (i32, i32, i32) {
    %c0_i32 = arith.constant 0 : i32
    %c0_i32_0 = arith.constant 0 : i32
    %c0_i32_1 = arith.constant 0 : i32
    %c0_i32_2 = arith.constant 0 : i32
    return %c0_i32, %c0_i32_0, %c0_i32_1 : i32, i32, i32
  }
  func.func @transform_12(%arg0: i32) -> (i32, i32, i32) {
    %c0_i32 = arith.constant 0 : i32
    %c0_i32_0 = arith.constant 0 : i32
    %c0_i32_1 = arith.constant 0 : i32
    %c0_i32_2 = arith.constant 0 : i32
    return %c0_i32, %c0_i32_0, %c0_i32_1 : i32, i32, i32
  }
  func.func @transform_13(%arg0: i32) -> (i32, i32) {
    %c0_i32 = arith.constant 0 : i32
    %c0_i32_0 = arith.constant 0 : i32
    %c0_i32_1 = arith.constant 0 : i32
    return %c0_i32, %c0_i32_0 : i32, i32
  }
  func.func @transform_14(%arg0: i32) -> (i32, i32) {
    %c0_i32 = arith.constant 0 : i32
    %c0_i32_0 = arith.constant 0 : i32
    %c0_i32_1 = arith.constant 0 : i32
    return %c0_i32, %c0_i32_0 : i32, i32
  }
  func.func @transform_15(%arg0: i32) -> (i32, i32) {
    %c0_i32 = arith.constant 0 : i32
    %c0_i32_0 = arith.constant 0 : i32
    %c0_i32_1 = arith.constant 0 : i32
    return %c0_i32, %c0_i32_0 : i32, i32
  }
  func.func @transform_16(%arg0: i32) -> (i32, i32) {
    %c0_i32 = arith.constant 0 : i32
    %c0_i32_0 = arith.constant 0 : i32
    %c0_i32_1 = arith.constant 0 : i32
    return %c0_i32, %c0_i32_0 : i32, i32
  }
  func.func @transform_17(%arg0: i32) -> (i32, i32) {
    %c0_i32 = arith.constant 0 : i32
    %c0_i32_0 = arith.constant 0 : i32
    %c0_i32_1 = arith.constant 0 : i32
    return %c0_i32, %c0_i32_0 : i32, i32
  }
  func.func @transform_18(%arg0: i32) -> (i32, i32) {
    %c0_i32 = arith.constant 0 : i32
    %c0_i32_0 = arith.constant 0 : i32
    %c0_i32_1 = arith.constant 0 : i32
    return %c0_i32, %c0_i32_0 : i32, i32
  }
  func.func @transform_19(%arg0: i32) -> (i32, i32) {
    %c0_i32 = arith.constant 0 : i32
    %c0_i32_0 = arith.constant 0 : i32
    %c0_i32_1 = arith.constant 0 : i32
    return %c0_i32, %c0_i32_0 : i32, i32
  }
  func.func @transform_20(%arg0: i32) -> (i32, i32) {
    %c0_i32 = arith.constant 0 : i32
    %c0_i32_0 = arith.constant 0 : i32
    %c0_i32_1 = arith.constant 0 : i32
    return %c0_i32, %c0_i32_0 : i32, i32
  }
  func.func @transform_21(%arg0: i32) -> (i32, i32) {
    %c0_i32 = arith.constant 0 : i32
    %c0_i32_0 = arith.constant 0 : i32
    %c0_i32_1 = arith.constant 0 : i32
    return %c0_i32, %c0_i32_0 : i32, i32
  }
  func.func @transform_22(%arg0: i32) -> (i32, i32) {
    %c0_i32 = arith.constant 0 : i32
    %c0_i32_0 = arith.constant 0 : i32
    %c0_i32_1 = arith.constant 0 : i32
    return %c0_i32, %c0_i32_0 : i32, i32
  }
  func.func @transform_23(%arg0: i32) -> (i32, i32) {
    %c0_i32 = arith.constant 0 : i32
    %c0_i32_0 = arith.constant 0 : i32
    %c0_i32_1 = arith.constant 0 : i32
    return %c0_i32, %c0_i32_0 : i32, i32
  }
  func.func @transform_24(%arg0: i32) -> (i32, i32) {
    %c0_i32 = arith.constant 0 : i32
    %c0_i32_0 = arith.constant 0 : i32
    %c0_i32_1 = arith.constant 0 : i32
    return %c0_i32, %c0_i32_0 : i32, i32
  }
  func.func @transform_25(%arg0: i32) -> (i32, i32) {
    %c0_i32 = arith.constant 0 : i32
    %c0_i32_0 = arith.constant 0 : i32
    %c0_i32_1 = arith.constant 0 : i32
    return %c0_i32, %c0_i32_0 : i32, i32
  }
  func.func @transform_26(%arg0: i32) -> (i32, i32, i32) {
    %c0_i32 = arith.constant 0 : i32
    %c0_i32_0 = arith.constant 0 : i32
    %c0_i32_1 = arith.constant 0 : i32
    return %arg0, %c0_i32, %c0_i32_0 : i32, i32, i32
  }
}

</mosaic_0001>

<bundles_post_ra>
// kernel: ipnp_forward.1
= control target key start
LH: loop header
LB: loop body
LE: loop exit
PB: predicated region body
PF: predicated region fallthrough
CT: control target
= control target key end

     0   :  { %s7996_s0 = inlined_call_operand.vmem [shape: f32[2,8,2], index: 0, kind: input, shape index: {}]   ;;  %s7997_s1 = inlined_call_operand.vmem [shape: f32[2,16,1], index: 1, kind: input, shape index: {}]   ;;  %s7998_s2 = inlined_call_operand.vmem [shape: f32[2,16,1], index: 2, kind: input, shape index: {}]   ;;  %s7999_s3 = inlined_call_operand.hbm [shape: f32[8,64], index: 3, kind: input, shape index: {}]   ;;  %s8000_s4 = inlined_call_operand.hbm [shape: f32[2,64], index: 4, kind: input, shape index: {}]   ;;  %s8001_s5 = inlined_call_operand.hbm [shape: f32[1,64], index: 5, kind: input, shape index: {}]   ;;  %s8002_s6 = inlined_call_operand.hbm [shape: f32[64,64], index: 6, kind: input, shape index: {}]   ;;  %s8003_s7 = inlined_call_operand.hbm [shape: f32[1,64], index: 7, kind: input, shape index: {}]   ;;  %s8004_s8 = inlined_call_operand.vmem [shape: f32[2,64,64], index: 8, kind: input, shape index: {}]   ;;  %s8005_s9 = inlined_call_operand.vmem [shape: f32[2,64,64], index: 9, kind: input, shape index: {}]   ;;  %s8006_s10 = inlined_call_operand.vmem [shape: f32[2,64,64], index: 10, kind: input, shape index: {}]   ;;  %s8007_s11 = inlined_call_operand.hbm [shape: f32[2,64,64], index: 11, kind: input, shape index: {}]   ;;  %s8008_s12 = inlined_call_operand.hbm [shape: f32[2,1,64], index: 12, kind: input, shape index: {}]   ;;  %s8009_s13 = inlined_call_operand.hbm [shape: f32[1,64], index: 13, kind: input, shape index: {}]   ;;  %s8010_s14 = inlined_call_operand.hbm [shape: f32[1,64], index: 14, kind: input, shape index: {}]   ;;  %s8011_s15 = inlined_call_operand.hbm [shape: f32[64,64], index: 15, kind: input, shape index: {}]   ;;  %s8012_s16 = inlined_call_operand.hbm [shape: f32[1,64], index: 16, kind: input, shape index: {}]   ;;  %s8013_s17 = inlined_call_operand.hbm [shape: f32[64,64], index: 17, kind: input, shape index: {}]   ;;  %s8014_s18 = inlined_call_operand.hbm [shape: f32[64,64], index: 18, kind: input, shape index: {}]   ;;  %s8015_s19 = inlined_call_operand.vmem [shape: f32[64,64], index: 19, kind: input, shape index: {}]   ;;  %s8016_s20 = inlined_call_operand.hbm [shape: f32[64,64], index: 20, kind: input, shape index: {}]   ;;  %s8017_s21 = inlined_call_operand.hbm [shape: f32[1,64], index: 21, kind: input, shape index: {}]   ;;  %s8018_s22 = inlined_call_operand.vmem [shape: f32[64,32], index: 22, kind: input, shape index: {}]   ;;  %s8019_s23 = inlined_call_operand.hbm [shape: f32[1,32], index: 23, kind: input, shape index: {}]   ;;  %s8020_s24 = inlined_call_operand.vmem [shape: f32[32,2], index: 24, kind: input, shape index: {}]   ;;  %s8021_s25 = inlined_call_operand.hbm [shape: f32[1,2], index: 25, kind: input, shape index: {}]   ;;  %s8022_s26 = inlined_call_operand.vmem [shape: f32[2,16,1], index: 26, kind: output, shape index: {}]  }
   0x1   :  { %8044 = sst [smem:[#allocation38_spill]] %s7996_s0 }
   0x2   :  { %8045 = sst [smem:[#allocation39_spill]] %s7997_s1 }
   0x3   :  { %8046 = sst [smem:[#allocation40_spill]] %s7998_s2 }
   0x4   :  { %8047 = sst [smem:[#allocation41_spill]] %s7999_s3 }
   0x5   :  { %8048 = sst [smem:[#allocation42_spill]] %s8000_s4 }
   0x6   :  { %8049 = sst [smem:[#allocation43_spill]] %s8001_s5 }
   0x7   :  { %8050 = sst [smem:[#allocation44_spill]] %s8002_s6 }
   0x8   :  { %8051 = sst [smem:[#allocation45_spill]] %s8003_s7 }
   0x9   :  { %8052 = sst [smem:[#allocation46_spill]] %s8004_s8 }
   0xa   :  { %8053 = sst [smem:[#allocation47_spill]] %s8005_s9 }
   0xb   :  { %8054 = sst [smem:[#allocation48_spill]] %s8006_s10 }
   0xc   :  { %8055 = sst [smem:[#allocation49_spill]] %s8007_s11 }
   0xd   :  { %8056 = sst [smem:[#allocation50_spill]] %s8009_s13 }
   0xe   :  { %8057 = sst [smem:[#allocation51_spill]] %s8011_s15 }
   0xf   :  { %8058 = sst [smem:[#allocation52_spill]] %s8015_s19 }
  0x10   :  { %8059 = sst [smem:[#allocation53_spill]] %s8018_s22 }
  0x11   :  { %8060 = sst [smem:[#allocation54_spill]] %s8020_s24 }
  0x12   :  { %8061 = sst [smem:[#allocation55_spill]] %s8022_s26 }
  0x13   :  { %31 = vsyncpa [#allocation3], 0 }
  0x14   :  { %32 = vsyncpa [#allocation5], 0 }
  0x15   :  { %33 = vsyncpa [#allocation8], 0 }
  0x16   :  { %34 = vsyncpa [#allocation11], 0 }
  0x17   :  { %35 = vsyncpa [#allocation14], 0 }
  0x18   :  { %36 = vsyncpa [#allocation17], 0 }
  0x19   :  { %37 = vsyncpa [#allocation20], 0 }
  0x1a   :  { %38 = vsyncpa [#allocation23], 0 }
  0x1b   :  { %39 = vsyncpa [#allocation26], 0  ;;  %s7001_s27 = smov 0  }
  0x1c LB: > { %8062 = sst [smem:[#allocation37_spill]] %s6831_s27  ;;  %s6833_s3 = smov [#allocation4]   ;;  %s6831_s27 = sphi %s7001_s27, %s45_s27  }
  0x1d   : > { %s661_s7 = sshll.u32 %s6833_s3, 4  ;;  %s7007_s28 = sadd.s32 4294967295, %s6831_s27   ;;  %s7012_s7 = int_to_ptr.vmem [resolvable:$true] %s661_s7 }
  0x1e   : > { %p5059_p0 = scmp.ge.s32.totalorder %s6831_s27, 1  ;;  %p637_p1 = scmp.lt.s32.totalorder %s6831_s27, 3 }
  0x1f   : > { %p8036_p2 = scmp.eq.s32.totalorder %s7007_s28, 0  ;;  %s6834_s4 = smov [#allocation7]  }
  0x20   : > { %p7014_p3 = pnand %p5059_p0, %p637_p1  ;;  %s682_s29 = sshll.u32 %s6834_s4, 4  ;;  %s7020_s29 = int_to_ptr.vmem [resolvable:$true] %s682_s29 }
  0x21   : > { %s6835_s9 = smov [#allocation10]   ;;  %s6836_s2 = smov [#allocation13]  }
  0x22   : > { %s8063_s8 = scalar_select %p7014_p3, 1, 0 }
  0x23   : > { %p6098_p4 = pneg %p7014_p3  ;;  %s715_s30 = sshll.u32 %s6835_s9, 4  ;;  %s7028_s30 = int_to_ptr.vmem [resolvable:$true] %s715_s30 }
  0x24   : > { %s7030_s5 = sshll.u32 %s6836_s2, 4  ;;  %s8065_s1 = sld [smem:[#allocation42_spill]]  ;;  %s743_s5 = int_to_ptr.vmem [resolvable:$true] %s7030_s5 }
  0x25   : > { %p7024_p5 = pnand %p8036_p2, %p6098_p4 }
  0x27   : > { %p7040_p7 = pneg %p7024_p5 }
  0x2a   : > { %s6313_s3 = scalar_lea.hbm %s8065_s1, 32 }
  0x2b   : > { %p6314_p6 = scmp.ne.s32.totalorder %s8065_s1, %s6313_s3  ;;  %p6320_p10 = scmp.lt.u32.totalorder %s6313_s3, %s8065_s1 }
  0x2d   : > { %p6316_p8 = pnand %p7040_p7, %p6314_p6 }
  0x2f   : > { %p6317_p9 = pneg %p6316_p8 }
  0x31   : > { %p6322_p11 = pnand %p6320_p10, %p6317_p9 }
  0x33   : > { %6325 = shalt.err (!%p6322_p11)
}
  0x34   : > { %s6326_s27 = scalar_lea.vmem %s7012_s7, 32  ;;  %p6334_p1 = scmp.lt.s32.totalorder %s7012_s7, %s7012_s7 }
  0x35   : > { %p6327_p12 = scmp.ne.s32.totalorder %s7012_s7, %s6326_s27  ;;  %p6335_p4 = scmp.lt.s32.totalorder %s6326_s27, %s6326_s27 }
  0x37   : > { %p6329_p13 = pnand %p6327_p12, %p7040_p7  ;;  %p6336_p6 = por %p6335_p4, %p6334_p1 }
  0x39   : > { %p6330_p0 = pneg %p6329_p13 }
  0x3b   : > { %p6337_p8 = pnand %p6336_p6, %p6330_p0 }
  0x3d   : > { %6340 = shalt.err (!%p6337_p8)
}
  0x3e   : > { %6104 = dma.hbm_to_vmem [thread:$0]  (!%p7024_p5), %s8065_s1, 32, %s7012_s7, [#allocation5]  }
  0x3f   : > { %s8067_s9 = sld [smem:[#allocation44_spill]] }
  0x45   : > { %s6341_s2 = scalar_lea.hbm %s8067_s9, 1024 }
  0x46   : > { %p6342_p9 = scmp.ne.s32.totalorder %s8067_s9, %s6341_s2  ;;  %p6348_p12 = scmp.lt.u32.totalorder %s6341_s2, %s8067_s9 }
  0x48   : > { %p6344_p10 = pnand %p6342_p9, %p7040_p7 }
  0x4a   : > { %p6345_p11 = pneg %p6344_p10 }
  0x4c   : > { %p6350_p13 = pnand %p6348_p12, %p6345_p11 }
  0x4e   : > { %6353 = shalt.err (!%p6350_p13)
}
  0x4f   : > { %s6354_s7 = scalar_lea.vmem %s7020_s29, 1024  ;;  %p6362_p6 = scmp.lt.s32.totalorder %s7020_s29, %s7020_s29 }
  0x50   : > { %p6355_p0 = scmp.ne.s32.totalorder %s7020_s29, %s6354_s7  ;;  %p6363_p8 = scmp.lt.s32.totalorder %s6354_s7, %s6354_s7 }
  0x52   : > { %p6357_p1 = pnand %p6355_p0, %p7040_p7  ;;  %p6364_p9 = por %p6363_p8, %p6362_p6 }
  0x54   : > { %p6358_p4 = pneg %p6357_p1 }
  0x56   : > { %p6365_p10 = pnand %p6364_p9, %p6358_p4 }
  0x58   : > { %6368 = shalt.err (!%p6365_p10)
}
  0x59   : > { %s8038_s22 = smov 128   ;;  %s8041_s19 = smov 8  }
  0x5a   : > { %6110 = dma.hbm_to_vmem [thread:$0]  (!%p7024_p5), %s8067_s9, 1024, %s7020_s29, [#allocation8], %s8038_s22, %s8038_s22, %s8041_s19  }
  0x5b   : > { %s8068_s11 = sld [smem:[#allocation49_spill]] }
  0x61   : > { %s6369_s4 = scalar_lea.hbm %s8068_s11, 2048 }
  0x62   : > { %p6370_p11 = scmp.ne.s32.totalorder %s8068_s11, %s6369_s4  ;;  %p6376_p0 = scmp.lt.u32.totalorder %s6369_s4, %s8068_s11 }
  0x64   : > { %p6372_p12 = pnand %p6370_p11, %p7040_p7 }
  0x66   : > { %p6373_p13 = pneg %p6372_p12 }
  0x68   : > { %p6378_p1 = pnand %p6376_p0, %p6373_p13 }
  0x6a   : > { %6381 = shalt.err (!%p6378_p1)
}
  0x6b   : > { %s6382_s29 = scalar_lea.vmem %s7028_s30, 2048  ;;  %p6390_p9 = scmp.lt.s32.totalorder %s7028_s30, %s7028_s30 }
  0x6c   : > { %p6383_p4 = scmp.ne.s32.totalorder %s7028_s30, %s6382_s29  ;;  %p6391_p10 = scmp.lt.s32.totalorder %s6382_s29, %s6382_s29 }
  0x6e   : > { %p6385_p6 = pnand %p6383_p4, %p7040_p7  ;;  %p6392_p11 = por %p6391_p10, %p6390_p9 }
  0x70   : > { %p6386_p8 = pneg %p6385_p6 }
  0x72   : > { %p6393_p12 = pnand %p6392_p11, %p6386_p8 }
  0x74   : > { %6396 = shalt.err (!%p6393_p12)
}
  0x75   : > { %6116 = dma.hbm_to_vmem [thread:$0]  (!%p7024_p5), %s8068_s11, 2048, %s7028_s30, [#allocation11], %s8038_s22, %s8038_s22, %s8041_s19  }
  0x76   : > { %s8069_s13 = sld [smem:[#allocation50_spill]] }
  0x7c   : > { %s6397_s3 = scalar_lea.hbm %s8069_s13, 16 }
  0x7d   : > { %p6398_p13 = scmp.ne.s32.totalorder %s8069_s13, %s6397_s3  ;;  %p6404_p4 = scmp.lt.u32.totalorder %s6397_s3, %s8069_s13 }
  0x7f   : > { %p6400_p0 = pnand %p6398_p13, %p7040_p7 }
  0x81   : > { %p6401_p1 = pneg %p6400_p0 }
  0x83   : > { %p6406_p6 = pnand %p6404_p4, %p6401_p1 }
  0x85   : > { %6409 = shalt.err (!%p6406_p6)
}
  0x86   : > { %s6410_s29 = scalar_lea.vmem %s743_s5, 16  ;;  %s6417_s30 = scalar_lea.vmem %s743_s5, 32 }
  0x87   : > { %p6411_p8 = scmp.ne.s32.totalorder %s743_s5, %s6410_s29  ;;  %p6418_p11 = scmp.lt.s32.totalorder %s743_s5, %s743_s5 }
  0x88   : > { %p6419_p12 = scmp.lt.s32.totalorder %s6417_s30, %s6410_s29 }
  0x89   : > { %p6413_p9 = pnand %p6411_p8, %p7040_p7 }
  0x8a   : > { %p6420_p2 = por %p6419_p12, %p6418_p11 }
  0x8b   : > { %p6414_p10 = pneg %p6413_p9 }
  0x8d   : > { %p6421_p3 = pnand %p6420_p2, %p6414_p10 }
  0x8f   : > { %6424 = shalt.err (!%p6421_p3)
}
  0x90   : > { %6122 = dma.hbm_to_vmem [thread:$0]  (!%p7024_p5), %s8069_s13, 16, %s743_s5, [#allocation14]  }
  0x91   : > { %s6839_s10 = smov [#allocation16]   ;;  %s6840_s3 = smov [#allocation19]  }
  0x92   : > { %s763_s6 = sshll.u32 %s6839_s10, 4  ;;  %s787_s4 = sshll.u32 %s6840_s3, 4  ;;  %s764_s6 = int_to_ptr.vmem [resolvable:$true] %s763_s6  ;;  %s788_s4 = int_to_ptr.vmem [resolvable:$true] %s787_s4 }
  0x93   : > { %s8070_s15 = sld [smem:[#allocation51_spill]] }
  0x99   : > { %s6425_s7 = scalar_lea.hbm %s8070_s15, 1024 }
  0x9a   : > { %p6426_p2 = scmp.ne.s32.totalorder %s8070_s15, %s6425_s7  ;;  %p6432_p0 = scmp.lt.u32.totalorder %s6425_s7, %s8070_s15 }
  0x9c   : > { %p6428_p3 = pnand %p6426_p2, %p7040_p7 }
  0x9e   : > { %p6429_p13 = pneg %p6428_p3 }
  0xa0   : > { %p6434_p1 = pnand %p6432_p0, %p6429_p13 }
  0xa2   : > { %6437 = shalt.err (!%p6434_p1)
}
  0xa3   : > { %s6438_s5 = scalar_lea.vmem %s764_s6, 1024  ;;  %p6446_p9 = scmp.lt.s32.totalorder %s764_s6, %s764_s6 }
  0xa4   : > { %p6439_p4 = scmp.ne.s32.totalorder %s764_s6, %s6438_s5  ;;  %p6447_p10 = scmp.lt.s32.totalorder %s6438_s5, %s6438_s5 }
  0xa6   : > { %p6441_p6 = pnand %p6439_p4, %p7040_p7  ;;  %p6448_p11 = por %p6447_p10, %p6446_p9 }
  0xa8   : > { %p6442_p8 = pneg %p6441_p6 }
  0xaa   : > { %p6449_p12 = pnand %p6448_p11, %p6442_p8 }
  0xac   : > { %6452 = shalt.err (!%p6449_p12)
}
  0xad   : > { %s8071_s24 = smov 128   ;;  %s6453_s27 = scalar_lea.hbm %s8013_s17, 1024 }
  0xae   : > { %6128 = dma.hbm_to_vmem [thread:$0]  (!%p7024_p5), %s8070_s15, 1024, %s764_s6, [#allocation17], %s8071_s24, %s8071_s24, %s8041_s19  }
  0xaf   : > { %p6454_p2 = scmp.ne.s32.totalorder %s8013_s17, %s6453_s27  ;;  %p6460_p0 = scmp.lt.u32.totalorder %s6453_s27, %s8013_s17 }
  0xb1   : > { %p6456_p3 = pnand %p6454_p2, %p7040_p7 }
  0xb3   : > { %p6457_p13 = pneg %p6456_p3 }
  0xb5   : > { %p6462_p1 = pnand %p6460_p0, %p6457_p13 }
  0xb7   : > { %6465 = shalt.err (!%p6462_p1)
}
  0xb8   : > { %s6466_s5 = scalar_lea.vmem %s788_s4, 1024  ;;  %p6474_p9 = scmp.lt.s32.totalorder %s788_s4, %s788_s4 }
  0xb9   : > { %p6467_p4 = scmp.ne.s32.totalorder %s788_s4, %s6466_s5  ;;  %p6475_p10 = scmp.lt.s32.totalorder %s6466_s5, %s6466_s5 }
  0xbb   : > { %p6469_p6 = pnand %p6467_p4, %p7040_p7  ;;  %p6476_p11 = por %p6475_p10, %p6474_p9 }
  0xbd   : > { %p6470_p8 = pneg %p6469_p6 }
  0xbf   : > { %p6477_p12 = pnand %p6476_p11, %p6470_p8 }
  0xc1   : > { %6480 = shalt.err (!%p6477_p12)
}
  0xc2   : > { %6134 = dma.hbm_to_vmem [thread:$0]  (!%p7024_p5), %s8013_s17, 1024, %s788_s4, [#allocation20], %s8071_s24, %s8071_s24, %s8041_s19  }
  0xc3   : > { %s6841_s10 = smov [#allocation22]   ;;  %s6842_s2 = smov [#allocation25]  }
  0xc4   : > { %s816_s3 = sshll.u32 %s6841_s10, 4  ;;  %s844_s27 = sshll.u32 %s6842_s2, 4  ;;  %s817_s3 = int_to_ptr.vmem [resolvable:$true] %s816_s3  ;;  %s845_s27 = int_to_ptr.vmem [resolvable:$true] %s844_s27 }
  0xc5   : > { %s6481_s30 = scalar_lea.hbm %s8016_s20, 1024 }
  0xc6   : > { %p6482_p2 = scmp.ne.s32.totalorder %s8016_s20, %s6481_s30  ;;  %p6488_p0 = scmp.lt.u32.totalorder %s6481_s30, %s8016_s20 }
  0xc8   : > { %p6484_p3 = pnand %p6482_p2, %p7040_p7 }
  0xca   : > { %p6485_p13 = pneg %p6484_p3 }
  0xcc   : > { %p6490_p1 = pnand %p6488_p0, %p6485_p13 }
  0xce   : > { %6493 = shalt.err (!%p6490_p1)
}
  0xcf   : > { %s6494_s4 = scalar_lea.vmem %s817_s3, 1024  ;;  %p6502_p9 = scmp.lt.s32.totalorder %s817_s3, %s817_s3 }
  0xd0   : > { %p6495_p4 = scmp.ne.s32.totalorder %s817_s3, %s6494_s4  ;;  %p6503_p10 = scmp.lt.s32.totalorder %s6494_s4, %s6494_s4 }
  0xd2   : > { %p6497_p6 = pnand %p6495_p4, %p7040_p7  ;;  %p6504_p11 = por %p6503_p10, %p6502_p9 }
  0xd4   : > { %p6498_p8 = pneg %p6497_p6 }
  0xd6   : > { %p6505_p12 = pnand %p6504_p11, %p6498_p8 }
  0xd8   : > { %6508 = shalt.err (!%p6505_p12)
}
  0xd9   : > { %6140 = dma.hbm_to_vmem [thread:$0]  (!%p7024_p5), %s8016_s20, 1024, %s817_s3, [#allocation23], %s8071_s24, %s8071_s24, %s8041_s19  }
  0xda   : > { %s6509_s7 = scalar_lea.hbm %s8019_s23, 16 }
  0xdb   : > { %p6510_p2 = scmp.ne.s32.totalorder %s8019_s23, %s6509_s7  ;;  %p6516_p0 = scmp.lt.u32.totalorder %s6509_s7, %s8019_s23 }
  0xdd   : > { %p6512_p3 = pnand %p6510_p2, %p7040_p7 }
  0xdf   : > { %p6513_p13 = pneg %p6512_p3 }
  0xe1   : > { %p6518_p1 = pnand %p6516_p0, %p6513_p13 }
  0xe3   : > { %6521 = shalt.err (!%p6518_p1)
}
  0xe4   : > { %s6522_s6 = scalar_lea.vmem %s845_s27, 16  ;;  %s6529_s3 = scalar_lea.vmem %s845_s27, 32 }
  0xe5   : > { %p6523_p4 = scmp.ne.s32.totalorder %s845_s27, %s6522_s6  ;;  %p6530_p9 = scmp.lt.s32.totalorder %s845_s27, %s845_s27 }
  0xe6   : > { %p6531_p10 = scmp.lt.s32.totalorder %s6529_s3, %s6522_s6 }
  0xe7   : > { %p6525_p6 = pnand %p6523_p4, %p7040_p7 }
  0xe8   : > { %p6532_p11 = por %p6531_p10, %p6530_p9 }
  0xe9   : > { %p6526_p8 = pneg %p6525_p6 }
  0xeb   : > { %p6533_p12 = pnand %p6532_p11, %p6526_p8 }
  0xed   : > { %6536 = shalt.err (!%p6533_p12)
}
  0xee   : > { %6146 = dma.hbm_to_vmem [thread:$0]  (!%p7024_p5), %s8019_s23, 16, %s845_s27, [#allocation26]  }
  0xef   : > { %s6843_s22 = smov [#allocation2]   ;;  %s6844_s2 = smov [#allocation6]  }
  0xf0   : > { %s650_s10 = sshll.u32 %s6843_s22, 4  ;;  %s672_s7 = sshll.u32 %s6844_s2, 4  ;;  %s651_s10 = int_to_ptr.vmem [resolvable:$true] %s650_s10  ;;  %s673_s7 = int_to_ptr.vmem [resolvable:$true] %s672_s7 }
  0xf1   : > { %s8072_s1 = sld [smem:[#allocation41_spill]] }
  0xf7   : > { %s6537_s5 = scalar_lea.hbm %s8072_s1, 128 }
  0xf8   : > { %p6538_p2 = scmp.ne.s32.totalorder %s8072_s1, %s6537_s5  ;;  %p6544_p0 = scmp.lt.u32.totalorder %s6537_s5, %s8072_s1 }
  0xfa   : > { %p6540_p3 = pnand %p6538_p2, %p7040_p7 }
  0xfc   : > { %p6541_p13 = pneg %p6540_p3 }
  0xfe   : > { %p6546_p1 = pnand %p6544_p0, %p6541_p13 }
 0x100   : > { %6549 = shalt.err (!%p6546_p1)
}
 0x101   : > { %s6550_s27 = scalar_lea.vmem %s651_s10, 128  ;;  %p6558_p9 = scmp.lt.s32.totalorder %s651_s10, %s651_s10 }
 0x102   : > { %p6551_p4 = scmp.ne.s32.totalorder %s651_s10, %s6550_s27  ;;  %p6559_p10 = scmp.lt.s32.totalorder %s6550_s27, %s6550_s27 }
 0x104   : > { %p6553_p6 = pnand %p6551_p4, %p7040_p7  ;;  %p6560_p11 = por %p6559_p10, %p6558_p9 }
 0x106   : > { %p6554_p8 = pneg %p6553_p6 }
 0x108   : > { %p6561_p12 = pnand %p6560_p11, %p6554_p8 }
 0x10a   : > { %6564 = shalt.err (!%p6561_p12)
}
 0x10b   : > { %6101 = dma.hbm_to_vmem [thread:$0]  (!%p7024_p5), %s8072_s1, 128, %s651_s10, [#allocation3]  }
 0x10c   : > { %s8073_s29 = sld [smem:[#allocation43_spill]] }
 0x112   : > { %s6565_s30 = scalar_lea.hbm %s8073_s29, 16 }
 0x113   : > { %p6566_p2 = scmp.ne.s32.totalorder %s8073_s29, %s6565_s30  ;;  %p6572_p0 = scmp.lt.u32.totalorder %s6565_s30, %s8073_s29 }
 0x115   : > { %p6568_p3 = pnand %p6566_p2, %p7040_p7 }
 0x117   : > { %p6569_p13 = pneg %p6568_p3 }
 0x119   : > { %p6574_p1 = pnand %p6572_p0, %p6569_p13 }
 0x11b   : > { %6577 = shalt.err (!%p6574_p1)
}
 0x11c   : > { %s6578_s27 = scalar_lea.vmem %s673_s7, 16  ;;  %s6585_s10 = scalar_lea.vmem %s673_s7, 32 }
 0x11d   : > { %p6579_p4 = scmp.ne.s32.totalorder %s673_s7, %s6578_s27  ;;  %p6586_p9 = scmp.lt.s32.totalorder %s673_s7, %s673_s7 }
 0x11e   : > { %p6587_p10 = scmp.lt.s32.totalorder %s6585_s10, %s6578_s27 }
 0x11f   : > { %p6581_p6 = pnand %p6579_p4, %p7040_p7 }
 0x120   : > { %p6588_p11 = por %p6587_p10, %p6586_p9 }
 0x121   : > { %p6582_p8 = pneg %p6581_p6 }
 0x123   : > { %p6589_p12 = pnand %p6588_p11, %p6582_p8 }
 0x125   : > { %6592 = shalt.err (!%p6589_p12)
}
 0x126   : > { %6107 = dma.hbm_to_vmem [thread:$0]  (!%p7024_p5), %s8073_s29, 16, %s673_s7, [#allocation5]  }
 0x127   : > { %s6845_s19 = smov [#allocation9]   ;;  %s6846_s30 = smov [#allocation12]  }
 0x128   : > { %s696_s2 = sshll.u32 %s6845_s19, 4  ;;  %s728_s5 = sshll.u32 %s6846_s30, 4  ;;  %s697_s2 = int_to_ptr.vmem [resolvable:$true] %s696_s2  ;;  %s729_s5 = int_to_ptr.vmem [resolvable:$true] %s728_s5 }
 0x129   : > { %s8074_s4 = sld [smem:[#allocation45_spill]] }
 0x12f   : > { %s6593_s1 = scalar_lea.hbm %s8074_s4, 16 }
 0x130   : > { %p6594_p2 = scmp.ne.s32.totalorder %s8074_s4, %s6593_s1  ;;  %p6600_p0 = scmp.lt.u32.totalorder %s6593_s1, %s8074_s4 }
 0x132   : > { %p6596_p3 = pnand %p6594_p2, %p7040_p7 }
 0x134   : > { %p6597_p13 = pneg %p6596_p3 }
 0x136   : > { %p6602_p1 = pnand %p6600_p0, %p6597_p13 }
 0x138   : > { %6605 = shalt.err (!%p6602_p1)
}
 0x139   : > { %s6606_s7 = scalar_lea.vmem %s697_s2, 16  ;;  %s6613_s22 = scalar_lea.vmem %s697_s2, 32 }
 0x13a   : > { %p6607_p4 = scmp.ne.s32.totalorder %s697_s2, %s6606_s7  ;;  %p6614_p9 = scmp.lt.s32.totalorder %s697_s2, %s697_s2 }
 0x13b   : > { %p6615_p10 = scmp.lt.s32.totalorder %s6613_s22, %s6606_s7 }
 0x13c   : > { %p6609_p6 = pnand %p6607_p4, %p7040_p7 }
 0x13d   : > { %p6616_p11 = por %p6615_p10, %p6614_p9 }
 0x13e   : > { %p6610_p8 = pneg %p6609_p6 }
 0x140   : > { %p6617_p12 = pnand %p6616_p11, %p6610_p8 }
 0x142   : > { %6620 = shalt.err (!%p6617_p12)
}
 0x143   : > { %6113 = dma.hbm_to_vmem [thread:$0]  (!%p7024_p5), %s8074_s4, 16, %s697_s2, [#allocation8]  }
 0x144   : > { %s6621_s6 = scalar_lea.hbm %s8008_s12, 32 }
 0x145   : > { %p6622_p2 = scmp.ne.s32.totalorder %s8008_s12, %s6621_s6  ;;  %p6628_p0 = scmp.lt.u32.totalorder %s6621_s6, %s8008_s12 }
 0x147   : > { %p6624_p3 = pnand %p6622_p2, %p7040_p7 }
 0x149   : > { %p6625_p13 = pneg %p6624_p3 }
 0x14b   : > { %p6630_p1 = pnand %p6628_p0, %p6625_p13 }
 0x14d   : > { %6633 = shalt.err (!%p6630_p1)
}
 0x14e   : > { %s6634_s7 = scalar_lea.vmem %s729_s5, 32  ;;  %p6642_p9 = scmp.lt.s32.totalorder %s729_s5, %s729_s5 }
 0x14f   : > { %p6635_p4 = scmp.ne.s32.totalorder %s729_s5, %s6634_s7  ;;  %p6643_p10 = scmp.lt.s32.totalorder %s6634_s7, %s6634_s7 }
 0x151   : > { %p6637_p6 = pnand %p6635_p4, %p7040_p7  ;;  %p6644_p11 = por %p6643_p10, %p6642_p9 }
 0x153   : > { %p6638_p8 = pneg %p6637_p6 }
 0x155   : > { %p6645_p12 = pnand %p6644_p11, %p6638_p8 }
 0x157   : > { %6648 = shalt.err (!%p6645_p12)
}
 0x158   : > { %s6847_s2 = smov 16   ;;  %s6848_s22 = smov 1  }
 0x159   : > { %6119 = dma.hbm_to_vmem [thread:$0]  (!%p7024_p5), %s8008_s12, 32, %s729_s5, [#allocation11], %s6847_s2, %s6847_s2, %s6848_s22  }
 0x15a   : > { %s6849_s11 = smov [#allocation15]   ;;  %s6850_s6 = smov [#allocation18]  }
 0x15b   : > { %s753_s1 = sshll.u32 %s6849_s11, 4  ;;  %s777_s3 = sshll.u32 %s6850_s6, 4  ;;  %s754_s1 = int_to_ptr.vmem [resolvable:$true] %s753_s1  ;;  %s778_s3 = int_to_ptr.vmem [resolvable:$true] %s777_s3 }
 0x15c   : > { %s6649_s9 = scalar_lea.hbm %s8010_s14, 16 }
 0x15d   : > { %p6650_p2 = scmp.ne.s32.totalorder %s8010_s14, %s6649_s9  ;;  %p6656_p0 = scmp.lt.u32.totalorder %s6649_s9, %s8010_s14 }
 0x15f   : > { %p6652_p3 = pnand %p6650_p2, %p7040_p7 }
 0x161   : > { %p6653_p13 = pneg %p6652_p3 }
 0x163   : > { %p6658_p1 = pnand %p6656_p0, %p6653_p13 }
 0x165   : > { %6661 = shalt.err (!%p6658_p1)
}
 0x166   : > { %s6662_s5 = scalar_lea.vmem %s754_s1, 16  ;;  %s6669_s2 = scalar_lea.vmem %s754_s1, 32 }
 0x167   : > { %p6663_p4 = scmp.ne.s32.totalorder %s754_s1, %s6662_s5  ;;  %p6670_p9 = scmp.lt.s32.totalorder %s754_s1, %s754_s1 }
 0x168   : > { %p6671_p10 = scmp.lt.s32.totalorder %s6669_s2, %s6662_s5 }
 0x169   : > { %p6665_p6 = pnand %p6663_p4, %p7040_p7 }
 0x16a   : > { %p6672_p11 = por %p6671_p10, %p6670_p9 }
 0x16b   : > { %p6666_p8 = pneg %p6665_p6 }
 0x16d   : > { %p6673_p12 = pnand %p6672_p11, %p6666_p8 }
 0x16f   : > { %6676 = shalt.err (!%p6673_p12)
}
 0x170   : > { %6125 = dma.hbm_to_vmem [thread:$0]  (!%p7024_p5), %s8010_s14, 16, %s754_s1, [#allocation14]  }
 0x171   : > { %s6677_s19 = scalar_lea.hbm %s8012_s16, 16 }
 0x172   : > { %p6678_p2 = scmp.ne.s32.totalorder %s8012_s16, %s6677_s19  ;;  %p6684_p0 = scmp.lt.u32.totalorder %s6677_s19, %s8012_s16 }
 0x174   : > { %p6680_p3 = pnand %p6678_p2, %p7040_p7 }
 0x176   : > { %p6681_p13 = pneg %p6680_p3 }
 0x178   : > { %p6686_p1 = pnand %p6684_p0, %p6681_p13 }
 0x17a   : > { %6689 = shalt.err (!%p6686_p1)
}
 0x17b   : > { %s6690_s10 = scalar_lea.vmem %s778_s3, 16  ;;  %s6697_s1 = scalar_lea.vmem %s778_s3, 32 }
 0x17c   : > { %p6691_p4 = scmp.ne.s32.totalorder %s778_s3, %s6690_s10  ;;  %p6698_p9 = scmp.lt.s32.totalorder %s778_s3, %s778_s3 }
 0x17d   : > { %p6699_p10 = scmp.lt.s32.totalorder %s6697_s1, %s6690_s10 }
 0x17e   : > { %p6693_p6 = pnand %p6691_p4, %p7040_p7 }
 0x17f   : > { %p6700_p11 = por %p6699_p10, %p6698_p9 }
 0x180   : > { %p6694_p8 = pneg %p6693_p6 }
 0x182   : > { %p6701_p12 = pnand %p6700_p11, %p6694_p8 }
 0x184   : > { %6704 = shalt.err (!%p6701_p12)
}
 0x185   : > { %6131 = dma.hbm_to_vmem [thread:$0]  (!%p7024_p5), %s8012_s16, 16, %s778_s3, [#allocation17]  }
 0x186   : > { %s6851_s5 = smov [#allocation21]   ;;  %s6852_s4 = smov [#allocation24]  }
 0x187   : > { %s800_s2 = sshll.u32 %s6851_s5, 4  ;;  %s830_s22 = sshll.u32 %s6852_s4, 4  ;;  %s801_s2 = int_to_ptr.vmem [resolvable:$true] %s800_s2  ;;  %s831_s22 = int_to_ptr.vmem [resolvable:$true] %s830_s22 }
 0x188   : > { %s6705_s19 = scalar_lea.hbm %s8014_s18, 1024 }
 0x189   : > { %p6706_p2 = scmp.ne.s32.totalorder %s8014_s18, %s6705_s19  ;;  %p6712_p0 = scmp.lt.u32.totalorder %s6705_s19, %s8014_s18 }
 0x18b   : > { %p6708_p3 = pnand %p6706_p2, %p7040_p7 }
 0x18d   : > { %p6709_p13 = pneg %p6708_p3 }
 0x18f   : > { %p6714_p1 = pnand %p6712_p0, %p6709_p13 }
 0x191   : > { %6717 = shalt.err (!%p6714_p1)
}
 0x192   : > { %s6718_s3 = scalar_lea.vmem %s801_s2, 1024  ;;  %p6726_p9 = scmp.lt.s32.totalorder %s801_s2, %s801_s2 }
 0x193   : > { %p6719_p4 = scmp.ne.s32.totalorder %s801_s2, %s6718_s3  ;;  %p6727_p10 = scmp.lt.s32.totalorder %s6718_s3, %s6718_s3 }
 0x195   : > { %p6721_p6 = pnand %p6719_p4, %p7040_p7  ;;  %p6728_p11 = por %p6727_p10, %p6726_p9 }
 0x197   : > { %p6722_p8 = pneg %p6721_p6 }
 0x199   : > { %p6729_p12 = pnand %p6728_p11, %p6722_p8 }
 0x19b   : > { %6732 = shalt.err (!%p6729_p12)
}
 0x19c   : > { %s8075_s10 = smov 8   ;;  %s6733_s4 = scalar_lea.hbm %s8017_s21, 16 }
 0x19d   : > { %6137 = dma.hbm_to_vmem [thread:$0]  (!%p7024_p5), %s8014_s18, 1024, %s801_s2, [#allocation20], %s8071_s24, %s8071_s24, %s8075_s10  }
 0x19e   : > { %p6734_p2 = scmp.ne.s32.totalorder %s8017_s21, %s6733_s4  ;;  %p6740_p0 = scmp.lt.u32.totalorder %s6733_s4, %s8017_s21 }
 0x1a0   : > { %p6736_p3 = pnand %p6734_p2, %p7040_p7 }
 0x1a2   : > { %p6737_p13 = pneg %p6736_p3 }
 0x1a4   : > { %p6742_p1 = pnand %p6740_p0, %p6737_p13 }
 0x1a6   : > { %6745 = shalt.err (!%p6742_p1)
}
 0x1a7   : > { %s6746_s11 = scalar_lea.vmem %s831_s22, 16  ;;  %s6753_s24 = scalar_lea.vmem %s831_s22, 32 }
 0x1a8   : > { %p6747_p4 = scmp.ne.s32.totalorder %s831_s22, %s6746_s11  ;;  %p6754_p9 = scmp.lt.s32.totalorder %s831_s22, %s831_s22 }
 0x1a9   : > { %p6755_p10 = scmp.lt.s32.totalorder %s6753_s24, %s6746_s11 }
 0x1aa   : > { %p6749_p6 = pnand %p6747_p4, %p7040_p7 }
 0x1ab   : > { %p6756_p11 = por %p6755_p10, %p6754_p9 }
 0x1ac   : > { %p6750_p8 = pneg %p6749_p6 }
 0x1ae   : > { %p6757_p12 = pnand %p6756_p11, %p6750_p8 }
 0x1b0   : > { %6760 = shalt.err (!%p6757_p12)
}
 0x1b1   : > { %6143 = dma.hbm_to_vmem [thread:$0]  (!%p7024_p5), %s8017_s21, 16, %s831_s22, [#allocation23]  }
 0x1b2   : > { %s6853_s27 = smov [#allocation27]   ;;  %s6761_s9 = scalar_lea.hbm %s8021_s25, 16 }
 0x1b3   : > { %s858_s3 = sshll.u32 %s6853_s27, 4  ;;  %p6762_p2 = scmp.ne.s32.totalorder %s8021_s25, %s6761_s9  ;;  %s859_s3 = int_to_ptr.vmem [resolvable:$true] %s858_s3 }
 0x1b4   : > { %p6768_p0 = scmp.lt.u32.totalorder %s6761_s9, %s8021_s25 }
 0x1b5   : > { %p6764_p3 = pnand %p6762_p2, %p7040_p7 }
 0x1b7   : > { %p6765_p13 = pneg %p6764_p3 }
 0x1b9   : > { %p6770_p1 = pnand %p6768_p0, %p6765_p13 }
 0x1bb   : > { %6773 = shalt.err (!%p6770_p1)
}
 0x1bc   : > { %s6774_s22 = scalar_lea.vmem %s859_s3, 16  ;;  %s6781_s15 = scalar_lea.vmem %s859_s3, 32 }
 0x1bd   : > { %p6775_p4 = scmp.ne.s32.totalorder %s859_s3, %s6774_s22  ;;  %p6782_p9 = scmp.lt.s32.totalorder %s859_s3, %s859_s3 }
 0x1be   : > { %p6783_p10 = scmp.lt.s32.totalorder %s6781_s15, %s6774_s22 }
 0x1bf   : > { %p6777_p6 = pnand %p6775_p4, %p7040_p7 }
 0x1c0   : > { %p6784_p11 = por %p6783_p10, %p6782_p9 }
 0x1c1   : > { %p6778_p8 = pneg %p6777_p6 }
 0x1c3   : > { %p6785_p12 = pnand %p6784_p11, %p6778_p8 }
 0x1c5   : > { %6788 = shalt.err (!%p6785_p12)
}
 0x1c6   : > { %6149 = dma.hbm_to_vmem [thread:$0]  (!%p7024_p5), %s8021_s25, 16, %s859_s3, [#allocation26]  }
 0x1c7   : > { %p8076_p2 = scmp.ne.s32.totalorder %s8063_s8, 0 }
 0x1c8   : > { %p8077_p3 = scmp.eq.s32.totalorder (!%p8076_p2), %s7007_s28, 0 }
 0x1c9   : > { %894 = sbr.rel (%p8076_p2) target bundleno = 8105 (0x1fa9), region = 124 }
 0x1d0   : > { %6794 = dma.done.wait (%p8077_p3), [#allocation3], 128   ;;  %p8078_p7 = pmov %p8077_p3 }
 0x1d1   : > { %p8079_p13 = pmov %p8077_p3 }
 0x1d2   : > { %6796 = vsyncadd (%p8078_p7), [#allocation3], 4294967168 }
 0x1d3   : > { %6798 = dma.done.wait (%p8079_p13), [#allocation5], 48   ;;  %p8080_p0 = pmov %p8077_p3 }
 0x1d5   : > { %6800 = vsyncadd (%p8080_p0), [#allocation5], 4294967248  ;;  %p8081_p1 = pmov %p8080_p0 }
 0x1d6   : > { %p8082_p5 = pmov %p8080_p0 }
 0x1d7   : > { %6802 = dma.done.wait (%p8081_p1), [#allocation8], 1040  }
 0x1d8   : > { %6804 = vsyncadd (%p8082_p5), [#allocation8], 4294966256  ;;  %p8083_p4 = pmov %p8080_p0 }
 0x1d9   : > { %p8084_p6 = pmov %p8080_p0 }
 0x1da   : > { %6806 = dma.done.wait (%p8083_p4), [#allocation11], 2080  }
 0x1db   : > { %6808 = vsyncadd (%p8084_p6), [#allocation11], 4294965216  ;;  %p8085_p8 = pmov %p8080_p0 }
 0x1dc   : > { %p8086_p9 = pmov %p8080_p0 }
 0x1dd   : > { %6810 = dma.done.wait (%p8085_p8), [#allocation14], 32  }
 0x1de   : > { %6812 = vsyncadd (%p8086_p9), [#allocation14], 4294967264  ;;  %p8087_p10 = pmov %p8080_p0 }
 0x1df   : > { %p8088_p11 = pmov %p8080_p0 }
 0x1e0   : > { %6814 = dma.done.wait (%p8087_p10), [#allocation17], 1040  }
 0x1e1   : > { %6816 = vsyncadd (%p8088_p11), [#allocation17], 4294966256  ;;  %p8089_p12 = pmov %p8080_p0 }
 0x1e2   : > { %p8090_p2 = pmov %p8080_p0 }
 0x1e3   : > { %6818 = dma.done.wait (%p8089_p12), [#allocation20], 2048  }
 0x1e4   : > { %6820 = vsyncadd (%p8090_p2), [#allocation20], 4294965248  ;;  %p8091_p3 = pmov %p8080_p0 }
 0x1e5   : > { %p8092_p7 = pmov %p8080_p0 }
 0x1e6   : > { %6822 = dma.done.wait (%p8091_p3), [#allocation23], 1040  }
 0x1e7   : > { %6824 = vsyncadd (%p8092_p7), [#allocation23], 4294966256  ;;  %p8093_p13 = pmov %p8080_p0 }
 0x1e9   : > { %6826 = dma.done.wait (%p8093_p13), [#allocation26], 32  }
 0x1ea   : > { %6828 = vsyncadd (%p8080_p0), [#allocation26], 4294967264  ;;  %p1037_p1 = scmp.lt.s32.totalorder %s7007_s28, 1  ;;  %v6854_v0 = vmov 0   ;;  %v6855_v1 = vmov 0.0|0.0   ;;  %s8094_s11 = sld [smem:[#allocation38_spill]]  ;;  %v1077_v39 = vlaneseq }
 0x1eb   : > { %6225 = vset.pattern.permute.xlu0 %v6854_v0  ;;  %5826 = vmatprep.subr.bf16.mxu0 %v6855_v1  ;;  %v1063_v3 = vld [vmem:[#allocation7] sm:$0xff]  ;;  %v1064_v4 = vld [vmem:[#allocation7 + $0x8] sm:$0xff]  ;;  %v1065_v6 = vld [vmem:[#allocation7 + $0x10] sm:$0xff]  ;;  %v6856_v11 = vmov 1   ;;  %vm6857_vm0 = vmmov 0   ;;  %v6858_v16 = vmov 0.0  }
 0x1ec   : > { %s8107_s28 = smov (!%p1037_p1, %s7007_s28), 1  ;;  %5838 = vmatprep.subr.bf16.mxu1 %v6855_v1  ;;  %6228 = vset.pattern.permute.xlu1 %v6854_v0  ;;  %v5827_v5 = vpack.c.bf16 %v1064_v4, %v1063_v3  ;;  %v1066_v7 = vld [vmem:[#allocation7 + $0x18] sm:$0xff]  ;;  %v1067_v9 = vld [vmem:[#allocation7 + $0x20] sm:$0xff]  ;;  %v1068_v10 = vld [vmem:[#allocation7 + $0x28] sm:$0xff]  ;;  %s8095_s27 = sld [smem:[#allocation46_spill]]  ;;  %vm1106_vm1 = vcmask 523264  }
 0x1ed   : > { %s5096_s26 = sshll.u32 %s8107_s28, 3  ;;  %v5830_v8 = vpack.c.bf16 %v1066_v7, %v1065_v6  ;;  %v5833_v12 = vpack.c.bf16 %v1068_v10, %v1067_v9  ;;  %v1069_v13 = vld [vmem:[#allocation7 + $0x30] sm:$0xff]  ;;  %v1070_v14 = vld [vmem:[#allocation7 + $0x38] sm:$0xff]  ;;  %5426 = vmatprep.mubr.msk.f32.mxu0 %vm6857_vm0, %v6858_v16  ;;  %5445 = vmatprep.mubr.msk.f32.mxu1 %vm6857_vm0, %v6858_v16  ;;  %s8097_s2 = sld [smem:[#allocation48_spill]]  ;;  %v1078_v40 = vshrl.u32 %v1077_v39, 7  ;;  %vm1430_vm2 = vcmask 130048  }
 0x1ee   : > { %5828 = vmatpush3.bf16.msra.mxu0 %v5827_v5  ;;  %v5836_v15 = vpack.c.bf16 %v1070_v14, %v1069_v13  ;;  %v1180_v31 = vld [vmem:[#allocation2] sm:$0xff]  ;;  %v1061_v43 = vld [vmem:[#allocation4] sm:$0x3]  ;;  %v5103_v50 = vld [vmem:[#allocation6] ss:$0 sm:$0xff]  ;;  %s8098_s30 = sld [smem:[#allocation47_spill]] }
 0x1ef   : > { %5829 = vmatprep.subr.bf16.mxu0 %v6855_v1  ;;  %v1079_v41 = vsub.s32 0, %v1078_v40  ;;  %v1088_v42 = vsub.s32 1, %v1078_v40  ;;  %s6859_s8 = smov 96   ;;  %s6860_s0 = smov 112   ;;  %vm1508_vm3 = vcmask 64512   ;;  %vm2105_vm4 = vcmask 261120  }
 0x1f0   : > { %s1040_s24 = scalar_lea.vmem %s8094_s11, %s5096_s26  ;;  %s6861_s11 = smov 80   ;;  %vm2107_vm5 = vcmask 392192   ;;  %vm4811_vm6 = vcmask 7168  }
 0x1f1   : > { %v1056_v2 = vld [vmem:[%s1040_s24] sm:$0xff]  ;;  %v1080_v45 = vrot.slane %v1061_v43, %v1079_v41  ;;  %v1089_v46 = vrot.slane %v1061_v43, %v1088_v42  ;;  %s6862_s24 = smov 16   ;;  %s6863_s6 = smov 32  }
 0x1f2   : > { %1074 = vperm.xlu0 %6225, %v1056_v2   ;;  %5831 = vmatpush3.bf16.msra.mxu0 %v5830_v8  ;;  %s8096_s3 = smov %s8095_s27  ;;  %v1181_v17 = vld [vmem:[%s8095_s27] sm:$0xff]  ;;  %v5104_v8 = vld [vmem:[#allocation9] ss:$0 sm:$0xff]  ;;  %s6864_s27 = smov 48  }
 0x1f3   : > { %5832 = vmatprep.subr.bf16.mxu0 %v6855_v1  ;;  %v1182_v18 = vld [vmem:[%s8096_s3 + $0x8] sm:$0xff]  ;;  %v1183_v19 = vld [vmem:[%s8096_s3 + $0x10] sm:$0xff]  ;;  %v1184_v21 = vld [vmem:[%s8096_s3 + $0x18] sm:$0xff]  ;;  %s7793_s5 = sshll.u32 %s8107_s28, 4  ;;  %s8099_s22 = sld [smem:[#allocation39_spill]] }
 0x1f4   : > { %v5839_v20 = vpack.c.bf16 %v1182_v18, %v1181_v17  ;;  %v5842_v22 = vpack.c.bf16 %v1184_v21, %v1183_v19  ;;  %v1185_v23 = vld [vmem:[%s8096_s3 + $0x20] sm:$0xff]  ;;  %v1186_v24 = vld [vmem:[%s8096_s3 + $0x28] sm:$0xff]  ;;  %v1187_v26 = vld [vmem:[%s8096_s3 + $0x30] sm:$0xff]  ;;  %s8100_s26 = sld [smem:[#allocation52_spill]]  ;;  %s6865_s19 = smov 127  }
 0x1f5   : > { %v5845_v25 = vpack.c.bf16 %v1186_v24, %v1185_v23  ;;  %v1188_v27 = vld [vmem:[%s8096_s3 + $0x38] sm:$0xff]  ;;  %v1197_v29 = vld [vmem:[%s8097_s2] sm:$0xff]  ;;  %v1198_v30 = vld [vmem:[%s8097_s2 + $0x8] sm:$0xff]  ;;  %s8103_s9 = sld [smem:[#allocation40_spill]] }
 0x1f6   : > { %6226 = vset.pattern.permute.xlu0 %v6856_v11  ;;  %5834 = vmatpush3.bf16.msra.mxu0 %v5833_v12  ;;  %v5848_v28 = vpack.c.bf16 %v1188_v27, %v1187_v26  ;;  %v5863_v32 = vpack.c.bf16 %v1198_v30, %v1197_v29  ;;  %v1199_v33 = vld [vmem:[%s8097_s2 + $0x10] sm:$0xff]  ;;  %v1200_v34 = vld [vmem:[%s8097_s2 + $0x18] sm:$0xff]  ;;  %v1201_v36 = vld [vmem:[%s8097_s2 + $0x20] sm:$0xff] }
 0x1f7   : > { %1083 = vperm.xlu0 %6226, %v1056_v2   ;;  %5835 = vmatprep.subr.bf16.mxu0 %v6855_v1  ;;  %v5866_v35 = vpack.c.bf16 %v1200_v34, %v1199_v33  ;;  %v1202_v37 = vld [vmem:[%s8097_s2 + $0x28] sm:$0xff]  ;;  %v1189_v52 = vld [vmem:[%s8098_s30] sm:$0xff]  ;;  %v1191_v57 = vld [vmem:[%s8098_s30 + $0x10] sm:$0xff] }
 0x1f8   : > { %5840 = vmatpush3.bf16.msra.mxu1 %v5839_v20  ;;  %v5869_v38 = vpack.c.bf16 %v1202_v37, %v1201_v36  ;;  %v1190_v53 = vld [vmem:[%s8098_s30 + $0x8] sm:$0xff]  ;;  %v1192_v58 = vld [vmem:[%s8098_s30 + $0x18] sm:$0xff]  ;;  %v1193_v60 = vld [vmem:[%s8098_s30 + $0x20] sm:$0xff] }
 0x1f9   : > { %5841 = vmatprep.subr.bf16.mxu1 %v6855_v1  ;;  %v5851_v55 = vpack.c.bf16 %v1190_v53, %v1189_v52  ;;  %v5854_v59 = vpack.c.bf16 %v1192_v58, %v1191_v57  ;;  %v1194_v61 = vld [vmem:[%s8098_s30 + $0x28] sm:$0xff]  ;;  %v1195_v63 = vld [vmem:[%s8098_s30 + $0x30] sm:$0xff]  ;;  %v1204_v4 = vld [vmem:[%s8097_s2 + $0x38] sm:$0xff]  ;;  %s1045_s15 = scalar_lea.vmem %s8099_s22, %s7793_s5 }
 0x1fa   : > { %5837 = vmatpush3.bf16.msra.mxu0 %v5836_v15  ;;  %v5857_v62 = vpack.c.bf16 %v1194_v61, %v1193_v60  ;;  %v1203_v2 = vld [vmem:[%s8097_s2 + $0x30] sm:$0xff] }
 0x1fb   : > { %6227 = vset.pattern.permute.xlu0 %v6854_v0  ;;  %5850 = vmatprep.subr.bf16.mxu0 %v6855_v1  ;;  %v1196_v0 = vld [vmem:[%s8098_s30 + $0x38] sm:$0xff]  ;;  %v5872_v5 = vpack.c.bf16 %v1204_v4, %v1203_v2  ;;  %s1050_s7 = scalar_lea.vmem %s8103_s9, %s7793_s5 }
 0x1fc   : > { %5843 = vmatpush3.bf16.msra.mxu1 %v5842_v22  ;;  %v5860_v3 = vpack.c.bf16 %v1196_v0, %v1195_v63 }
 0x1fd   : > { %5844 = vmatprep.subr.bf16.mxu1 %v6855_v1 }
 0x200   : > { %5846 = vmatpush3.bf16.msra.mxu1 %v5845_v25 }
 0x201   : > { %5847 = vmatprep.subr.bf16.mxu1 %v6855_v1 }
 0x204   : > { %5849 = vmatpush3.bf16.msra.mxu1 %v5848_v28 }
 0x205   : > { %5862 = vmatprep.subr.bf16.mxu1 %v6855_v1 }
 0x207   : > { %5446 = vmatmul.mubr.msk.f32.vlgmr.msra.gmra.mrb[0].mxu1 %vm1106_vm1, %v1180_v31 }
 0x208   : > { %5864 = vmatpush3.bf16.msra.mxu1 %v5863_v32  ;;  %5483 = vmatprep.mubr.msk.f32.mxu1 %vm6857_vm0, %v6858_v16 }
 0x209   : > { %5865 = vmatprep.subr.bf16.mxu1 %v6855_v1 }
 0x20c   : > { %5867 = vmatpush3.bf16.msra.mxu1 %v5866_v35 }
 0x20d   : > { %5868 = vmatprep.subr.bf16.mxu1 %v6855_v1 }
 0x210   : > { %5870 = vmatpush3.bf16.msra.mxu1 %v5869_v38 }
 0x211   : > { %5871 = vmatprep.subr.bf16.mxu1 %v6855_v1 }
 0x214   : > { %5873 = vmatpush3.bf16.msra.mxu1 %v5872_v5 }
 0x215   : > { %5486 = vmatprep.subr.mxu1 %v6858_v16 }
 0x271   : > { %v1075_v44 = vpop.permute.xlu0 %1074 }
 0x272   : > { %v1081_v48 = vmul.f32 %v1080_v45, %v1075_v44 }
 0x276   : > { %v1084_v47 = vpop.permute.xlu0 %1083 }
 0x277   : > { %v1090_v49 = vmul.f32 %v1089_v46, %v1084_v47 }
 0x279   : > { %v1091_v51 = vadd.f32 %v1090_v49, %v1081_v48 }
 0x27b   : > { %v1098_v54 = vadd.f32 %v5103_v50, %v1091_v51 }
 0x27d   : > { %v1099_v56 = vmax.f32 %v1098_v54, 0.0 }
 0x27f   : > { %5427 = vmatmul.mubr.msk.f32.vlgmr.msra.gmra.mrb[0].mxu0 %vm1106_vm1, %v1099_v56 }
 0x280   : > { %5852 = vmatpush3.bf16.msra.mxu0 %v5851_v55  ;;  %5464 = vmatprep.mubr.msk.f32.mxu0 %vm6857_vm0, %v6858_v16 }
 0x281   : > { %5853 = vmatprep.subr.bf16.mxu0 %v6855_v1 }
 0x284   : > { %5855 = vmatpush3.bf16.msra.mxu0 %v5854_v59 }
 0x285   : > { %5856 = vmatprep.subr.bf16.mxu0 %v6855_v1 }
 0x288   : > { %5858 = vmatpush3.bf16.msra.mxu0 %v5857_v62 }
 0x289   : > { %5859 = vmatprep.subr.bf16.mxu0 %v6855_v1 }
 0x28c   : > { %5861 = vmatpush3.bf16.msra.mxu0 %v5860_v3 }
 0x28d   : > { %5496 = vmatprep.subr.mxu0 %v6858_v16 }
 0x2da   : > { %v7524_v6 = vpop.f32.mrb[0].mxu1 }
 0x2db   : > { %1760 = vrot.lane.b32.xlu0 %v7524_v6, %s6859_s8  ;;  %v5447_v7 = vpop.f32.mrb[1].mxu1  ;;  %1593 = vrot.lane.b32.xlu1 %v7524_v6, %s6860_s0 }
 0x2df   : > { %1926 = vrot.lane.b32.xlu0 %v7524_v6, %s6861_s11 }
 0x34d   : > { %v1594_v17 = vpop.permute.xlu1 %1593  ;;  %v1761_v20 = vpop.permute.xlu0 %1760 }
 0x351   : > { %v1927_v22 = vpop.permute.xlu0 %1926 }
 0x352   : > { %v1176_v9 = vpop.f32.mrb[0].mxu0 }
 0x353   : > { %v7532_v10 = vadd.f32 %v5104_v8, %v1176_v9  ;;  %v5428_v11 = vpop.f32.mrb[1].mxu0 }
 0x355   : > { %5465 = vmatmul.mubr.msk.f32.vlgmr.msra.gmra.mrb[2].mxu0 %vm1106_vm1, %v7532_v10  ;;  %5484 = vmatmul.mubr.msk.f32.vlgmr.msra.gmra.mrb[2].mxu1 %vm1106_vm1, %v7532_v10 }
 0x356   : > { %5488 = vmatprep.mubr.msk.f32.mxu1 %vm6857_vm0, %v6858_v16  ;;  %5498 = vmatprep.mubr.msk.f32.mxu0 %vm6857_vm0, %v6858_v16 }
 0x428   : > { %v1356_v12 = vpop.f32.mrb[2].mxu0  ;;  %v7542_v13 = vpop.f32.mrb[2].mxu1 }
 0x429   : > { %v5485_v14 = vpop.f32.mrb[3].mxu1  ;;  %1595 = vrot.lane.b32.xlu1 %v1356_v12, %s6860_s0  ;;  %v5466_v15 = vpop.f32.mrb[3].mxu0  ;;  %5487 = vmatpush3.xpose.msk.msra.mxu1 %vm1430_vm2, %v1356_v12 }
 0x42a   : > { %5491 = vmatprep.subr.mxu1 %v6858_v16 }
 0x42c   : > { %5489 = vmatmul.mubr.msk.f32.vlgmr.msra.gmra.mrb[4].mxu1 %vm1430_vm2, %v7524_v6 }
 0x42d   : > { %1762 = vrot.lane.b32.xlu1 %v1356_v12, %s6859_s8  ;;  %5492 = vmatpush3.msra.mxu1 %v7542_v13 }
 0x42e   : > { %5493 = vmatprep.mubr.msk.f32.mxu1 %vm6857_vm0, %v6858_v16  ;;  %5501 = vmatprep.subr.mxu1 %v6858_v16 }
 0x431   : > { %1928 = vrot.lane.b32.xlu1 %v1356_v12, %s6861_s11 }
 0x49b   : > { %v1596_v18 = vpop.permute.xlu1 %1595 }
 0x49c   : > { %5497 = vmatpush3.xpose.msk.msra.mxu0 %vm1430_vm2, %v1596_v18 }
 0x49d   : > { %5506 = vmatprep.subr.mxu0 %v6858_v16 }
 0x49f   : > { %5499 = vmatmul.mubr.msk.f32.vlgmr.msra.gmra.mrb[4].mxu0 %vm1430_vm2, %v1594_v17  ;;  %v1763_v19 = vpop.permute.xlu1 %1762 }
 0x4a0   : > { %5507 = vmatpush3.xpose.msk.msra.mxu0 %vm1430_vm2, %v1763_v19  ;;  %5508 = vmatprep.mubr.msk.f32.mxu0 %vm6857_vm0, %v6858_v16 }
 0x4a1   : > { %5516 = vmatprep.subr.mxu0 %v6858_v16 }
 0x4a3   : > { %v1929_v21 = vpop.permute.xlu1 %1928  ;;  %5509 = vmatmul.mubr.msk.f32.vlgmr.msra.gmra.mrb[6].mxu0 %vm1430_vm2, %v1761_v20 }
 0x4a4   : > { %5517 = vmatpush3.xpose.msk.msra.mxu0 %vm1430_vm2, %v1929_v21  ;;  %5518 = vmatprep.mubr.msk.f32.mxu0 %vm6857_vm0, %v6858_v16 }
 0x4a5   : > { %5874 = vmatprep.subr.bf16.mxu0 %v6855_v1 }
 0x4a7   : > { %5519 = vmatmul.mubr.msk.f32.vlgmr.msra.gmra.mrb[8].mxu0 %vm1430_vm2, %v1927_v22 }
 0x4a8   : > { %5542 = vmatprep.mubr.msk.f32.mxu0 %vm6857_vm0, %v6858_v16 }
 0x4ff   : > { %v1503_v23 = vpop.f32.mrb[4].mxu1 }
 0x500   : > { %v1507_v24 = vmul.f32 0.125, %v1503_v23  ;;  %v5490_v25 = vpop.f32.mrb[5].mxu1 }
 0x502   : > { %v1509_v26 = vsel %vm1508_vm3, %v1507_v24, -inf }
 0x503   : > { %1510 = vmax.xlane.f32.xlu1 %v1509_v26 }
 0x572   : > { %v1667_v27 = vpop.f32.mrb[4].mxu0 }
 0x573   : > { %v1671_v28 = vmul.f32 0.125, %v1667_v27  ;;  %v5500_v29 = vpop.f32.mrb[5].mxu0 }
 0x575   : > { %v1672_v30 = vsel %vm1508_vm3, %v1671_v28, -inf }
 0x576   : > { %1673 = vmax.xlane.f32.xlu0 %v1672_v30  ;;  %v1834_v31 = vpop.f32.mrb[6].mxu0 }
 0x577   : > { %v1838_v32 = vmul.f32 0.125, %v1834_v31  ;;  %v5510_v33 = vpop.f32.mrb[7].mxu0 }
 0x579   : > { %v1839_v34 = vsel %vm1508_vm3, %v1838_v32, -inf }
 0x57a   : > { %1840 = vmax.xlane.f32.xlu0 %v1839_v34  ;;  %v2000_v35 = vpop.f32.mrb[8].mxu0 }
 0x57b   : > { %v2004_v36 = vmul.f32 0.125, %v2000_v35  ;;  %v5520_v37 = vpop.f32.mrb[9].mxu0  ;;  %v1205_v35 = vld [vmem:[#allocation10] sm:$0xff] }
 0x57d   : > { %v2005_v38 = vsel %vm1508_vm3, %v2004_v36, -inf }
 0x57e   : > { %2006 = vmax.xlane.f32.xlu1 %v2005_v38  ;;  %v1207_v38 = vld [vmem:[#allocation10 + $0x10] sm:$0xff] }
 0x590   : > { %v1511_v39 = vpop.xlane.xlu1 %1510 }
 0x591   : > { %v1512_v40 = vsub.f32 %v1507_v24, %v1511_v39  ;;  %v1208_v39 = vld [vmem:[#allocation10 + $0x18] sm:$0xff] }
 0x593   : > { %v1513_v41 = vmul.f32 1.442695, %v1512_v40  ;;  %v5878_v40 = vpack.c.bf16 %v1208_v39, %v1207_v38  ;;  %v5142_v38 = vld [vmem:[%s8097_s2 + $0x58] sm:$0xff] }
 0x595   : > { %6229 = vpow2.f32 %v1513_v41  ;;  %v1210_v41 = vld [vmem:[#allocation10 + $0x28] sm:$0xff] }
 0x59f   : > { %v6230_v42 = vpop.eup %6229 }
 0x5a0   : > { %v1515_v43 = vsel %vm1508_vm3, %v6230_v42, 0.0 }
 0x5a1   : > { %1516 = vadd.xlane.f32.xlu0 %v1515_v43  ;;  %v1211_v43 = vld [vmem:[#allocation10 + $0x30] sm:$0xff] }
 0x603   : > { %v1674_v44 = vpop.xlane.xlu0 %1673 }
 0x604   : > { %v1675_v45 = vsub.f32 %v1671_v28, %v1674_v44  ;;  %v1212_v44 = vld [vmem:[#allocation10 + $0x38] sm:$0xff] }
 0x606   : > { %v1676_v46 = vmul.f32 1.442695, %v1675_v45  ;;  %v5884_v45 = vpack.c.bf16 %v1212_v44, %v1211_v43  ;;  %v5146_v43 = vld [vmem:[%s8097_s2 + $0x78] sm:$0xff] }
 0x607   : > { %v1841_v47 = vpop.xlane.xlu0 %1840 }
 0x608   : > { %6231 = vpow2.f32 %v1676_v46  ;;  %v1842_v48 = vsub.f32 %v1838_v32, %v1841_v47 }
 0x60a   : > { %v1843_v49 = vmul.f32 1.442695, %v1842_v48 }
 0x60b   : > { %v2007_v55 = vpop.xlane.xlu1 %2006 }
 0x60c   : > { %6233 = vpow2.f32 %v1843_v49  ;;  %v2008_v56 = vsub.f32 %v2004_v36, %v2007_v55  ;;  %v1206_v36 = vld [vmem:[#allocation10 + $0x8] sm:$0xff]  ;;  %v5131_v49 = vld [vmem:[%s8098_s30 + $0x40] sm:$0xff] }
 0x60d   : > { %v5875_v37 = vpack.c.bf16 %v1206_v36, %v1205_v35  ;;  %v5134_v55 = vld [vmem:[%s8098_s30 + $0x58] sm:$0xff] }
 0x60e   : > { %v2009_v57 = vmul.f32 1.442695, %v2008_v56 }
 0x60f   : > { %5876 = vmatpush3.bf16.msra.mxu0 %v5875_v37  ;;  %v5141_v37 = vld [vmem:[%s8097_s2 + $0x50] sm:$0xff] }
 0x610   : > { %5877 = vmatprep.subr.bf16.mxu0 %v6855_v1  ;;  %v5914_v39 = vpack.c.bf16 %v5142_v38, %v5141_v37 }
 0x612   : > { %v6232_v50 = vpop.eup %6231 }
 0x613   : > { %v1678_v51 = vsel %vm1508_vm3, %v6232_v50, 0.0  ;;  %5879 = vmatpush3.bf16.msra.mxu0 %v5878_v40  ;;  %v5143_v40 = vld [vmem:[%s8097_s2 + $0x60] sm:$0xff] }
 0x614   : > { %1679 = vadd.xlane.f32.xlu1 %v1678_v51  ;;  %5880 = vmatprep.subr.bf16.mxu0 %v6855_v1 }
 0x616   : > { %v6234_v52 = vpop.eup %6233 }
 0x617   : > { %v1845_v53 = vsel %vm1508_vm3, %v6234_v52, 0.0 }
 0x618   : > { %1846 = vadd.xlane.f32.xlu0 %v1845_v53 }
 0x625   : > { %1850 = vrot.lane.b32.xlu1 %v7542_v13, %s6859_s8 }
 0x62e   : > { %1684 = vrot.lane.b32.xlu0 %v7542_v13, %s6860_s0  ;;  %v1517_v54 = vpop.xlane.xlu0 %1516 }
 0x62f   : > { %6235 = vrcp.f32 %v1517_v54  ;;  %v5133_v54 = vld [vmem:[%s8098_s30 + $0x50] sm:$0xff] }
 0x630   : > { %6237 = vpow2.f32 %v2009_v57  ;;  %v5902_v56 = vpack.c.bf16 %v5134_v55, %v5133_v54  ;;  %v5135_v57 = vld [vmem:[%s8098_s30 + $0x60] sm:$0xff] }
 0x639   : > { %v6236_v58 = vpop.eup %6235 }
 0x63a   : > { %v1519_v59 = vmul.f32 %v6236_v58, %v6230_v42  ;;  %v6238_v60 = vpop.eup %6237  ;;  %v5136_v58 = vld [vmem:[%s8098_s30 + $0x68] sm:$0xff] }
 0x63b   : > { %v2011_v61 = vsel %vm1508_vm3, %v6238_v60, 0.0 }
 0x63c   : > { %5494 = vmatmul.mubr.msk.f32.vlgmr.msra.gmra.mrb[6].mxu1 %vm1508_vm3, %v1519_v59  ;;  %v5905_v59 = vpack.c.bf16 %v5136_v58, %v5135_v57 }
 0x63d   : > { %5503 = vmatprep.mubr.msk.f32.mxu1 %vm6857_vm0, %v6858_v16 }
 0x649   : > { %2012 = vadd.xlane.f32.xlu1 %v2011_v61  ;;  %v5138_v61 = vld [vmem:[%s8098_s30 + $0x78] sm:$0xff] }
 0x65a   : > { %2016 = vrot.lane.b32.xlu1 %v7542_v13, %s6861_s11 }
 0x6a1   : > { %v1680_v62 = vpop.xlane.xlu1 %1679 }
 0x6a2   : > { %6239 = vrcp.f32 %v1680_v62 }
 0x6a5   : > { %v1847_v63 = vpop.xlane.xlu0 %1846  ;;  %v1851_v4 = vpop.permute.xlu1 %1850 }
 0x6a6   : > { %6241 = vrcp.f32 %v1847_v63  ;;  %v5121_v63 = vld [vmem:[#allocation12] ss:$0 sm:$0xff] }
 0x6a9   : > { %v1685_v0 = vpop.permute.xlu0 %1684 }
 0x6aa   : > { %5502 = vmatpush3.msra.mxu1 %v1685_v0 }
 0x6ab   : > { %5511 = vmatprep.subr.mxu1 %v6858_v16 }
 0x6ac   : > { %v6240_v2 = vpop.eup %6239 }
 0x6ad   : > { %v1682_v3 = vmul.f32 %v6240_v2, %v6232_v50  ;;  %v5132_v50 = vld [vmem:[%s8098_s30 + $0x48] sm:$0xff] }
 0x6af   : > { %5504 = vmatmul.mubr.msk.f32.vlgmr.msra.gmra.mrb[8].mxu1 %vm1508_vm3, %v1682_v3 }
 0x6b0   : > { %v6242_v5 = vpop.eup %6241  ;;  %5512 = vmatpush3.msra.mxu1 %v1851_v4  ;;  %5513 = vmatprep.mubr.msk.f32.mxu1 %vm6857_vm0, %v6858_v16 }
 0x6b1   : > { %v1849_v7 = vmul.f32 %v6242_v5, %v6234_v52  ;;  %5521 = vmatprep.subr.mxu1 %v6858_v16  ;;  %v5899_v52 = vpack.c.bf16 %v5132_v50, %v5131_v49 }
 0x6b3   : > { %5514 = vmatmul.mubr.msk.f32.vlgmr.msra.gmra.mrb[10].mxu1 %vm1508_vm3, %v1849_v7 }
 0x6b4   : > { %5523 = vmatprep.mubr.msk.f32.mxu1 %vm6857_vm0, %v6858_v16 }
 0x6d6   : > { %v2013_v8 = vpop.xlane.xlu1 %2012 }
 0x6d7   : > { %6243 = vrcp.f32 %v2013_v8 }
 0x6da   : > { %v2017_v9 = vpop.permute.xlu1 %2016 }
 0x6db   : > { %5522 = vmatpush3.msra.mxu1 %v2017_v9 }
 0x6dc   : > { %5886 = vmatprep.subr.bf16.mxu1 %v6855_v1 }
 0x6e1   : > { %v6244_v11 = vpop.eup %6243 }
 0x6e2   : > { %v2015_v12 = vmul.f32 %v6244_v11, %v6238_v60  ;;  %v5137_v60 = vld [vmem:[%s8098_s30 + $0x70] sm:$0xff] }
 0x6e3   : > { %v5908_v62 = vpack.c.bf16 %v5138_v61, %v5137_v60 }
 0x6e4   : > { %5524 = vmatmul.mubr.msk.f32.vlgmr.msra.gmra.mrb[12].mxu1 %vm1508_vm3, %v2015_v12 }
 0x6e5   : > { %5561 = vmatprep.mubr.msk.f32.mxu1 %vm6857_vm0, %v6858_v16 }
 0x70f   : > { %v1589_v13 = vpop.f32.mrb[6].mxu1 }
 0x710   : > { %v5495_v14 = vpop.f32.mrb[7].mxu1 }
 0x782   : > { %v1756_v15 = vpop.f32.mrb[8].mxu1 }
 0x783   : > { %2093 = vrot.lane.b32.xlu0 %v1756_v15, %s6862_s24  ;;  %v5505_v17 = vpop.f32.mrb[9].mxu1 }
 0x784   : > { %v5123_v17 = vld [vmem:[%s8096_s3 + $0x40] sm:$0xff] }
 0x786   : > { %v1922_v18 = vpop.f32.mrb[10].mxu1 }
 0x787   : > { %2097 = vrot.lane.b32.xlu1 %v1922_v18, %s6863_s6  ;;  %v5515_v19 = vpop.f32.mrb[11].mxu1  ;;  %v5124_v18 = vld [vmem:[%s8096_s3 + $0x48] sm:$0xff] }
 0x788   : > { %v5887_v19 = vpack.c.bf16 %v5124_v18, %v5123_v17 }
 0x78a   : > { %5888 = vmatpush3.bf16.msra.mxu1 %v5887_v19 }
 0x78b   : > { %5889 = vmatprep.subr.bf16.mxu1 %v6855_v1 }
 0x7b7   : > { %v2088_v20 = vpop.f32.mrb[12].mxu1 }
 0x7b8   : > { %2101 = vrot.lane.b32.xlu0 %v2088_v20, %s6864_s27  ;;  %v5525_v21 = vpop.f32.mrb[13].mxu1  ;;  %v5125_v20 = vld [vmem:[%s8096_s3 + $0x50] sm:$0xff] }
 0x7b9   : > { %v5126_v21 = vld [vmem:[%s8096_s3 + $0x58] sm:$0xff] }
 0x7f5   : > { %v2094_v22 = vpop.permute.xlu0 %2093 }
 0x7f6   : > { %v2104_v24 = vsel %vm1430_vm2, %v1589_v13, %v2094_v22  ;;  %v5890_v22 = vpack.c.bf16 %v5126_v21, %v5125_v20 }
 0x7f8   : > { %5891 = vmatpush3.bf16.msra.mxu1 %v5890_v22 }
 0x7f9   : > { %v2098_v23 = vpop.permute.xlu1 %2097  ;;  %5892 = vmatprep.subr.bf16.mxu1 %v6855_v1 }
 0x7fa   : > { %v2106_v25 = vsel %vm2105_vm4, %v2104_v24, %v2098_v23  ;;  %v5127_v23 = vld [vmem:[%s8096_s3 + $0x60] sm:$0xff]  ;;  %v5128_v24 = vld [vmem:[%s8096_s3 + $0x68] sm:$0xff] }
 0x82a   : > { %v2102_v26 = vpop.permute.xlu0 %2101 }
 0x82b   : > { %v2108_v27 = vsel %vm2107_vm5, %v2106_v25, %v2102_v26  ;;  %v5893_v25 = vpack.c.bf16 %v5128_v24, %v5127_v23  ;;  %v5129_v26 = vld [vmem:[%s8096_s3 + $0x70] sm:$0xff] }
 0x82c   : > { %v2109_v28 = vadd.f32 %v2108_v27, %v7524_v6  ;;  %v1209_v6 = vld [vmem:[#allocation10 + $0x20] sm:$0xff]  ;;  %v5130_v27 = vld [vmem:[%s8096_s3 + $0x78] sm:$0xff] }
 0x82d   : > { %v5881_v42 = vpack.c.bf16 %v1210_v41, %v1209_v6  ;;  %5894 = vmatpush3.bf16.msra.mxu1 %v5893_v25  ;;  %v5144_v6 = vld [vmem:[%s8097_s2 + $0x68] sm:$0xff] }
 0x82e   : > { %v2110_v29 = vsel %vm1106_vm1, %v2109_v28, 0.0  ;;  %5895 = vmatprep.subr.bf16.mxu1 %v6855_v1  ;;  %v5917_v41 = vpack.c.bf16 %v5144_v6, %v5143_v40 }
 0x82f   : > { %2111 = vadd.xlane.f32.xlu1 %v2110_v29  ;;  %5882 = vmatpush3.bf16.msra.mxu0 %v5881_v42  ;;  %v5145_v42 = vld [vmem:[%s8097_s2 + $0x70] sm:$0xff] }
 0x830   : > { %5883 = vmatprep.subr.bf16.mxu0 %v6855_v1  ;;  %v5920_v44 = vpack.c.bf16 %v5146_v43, %v5145_v42 }
 0x833   : > { %5885 = vmatpush3.bf16.msra.mxu0 %v5884_v45 }
 0x834   : > { %5898 = vmatprep.subr.bf16.mxu0 %v6855_v1 }
 0x8bc   : > { %v2112_v30 = vpop.xlane.xlu1 %2111 }
 0x8bd   : > { %v2114_v31 = vmul.f32 0.015625, %v2112_v30 }
 0x8bf   : > { %v2115_v32 = vsub.f32 %v2109_v28, %v2114_v31  ;;  %v5896_v28 = vpack.c.bf16 %v5130_v27, %v5129_v26 }
 0x8c1   : > { %v2116_v33 = vmul.f32 %v2115_v32, %v2115_v32  ;;  %5897 = vmatpush3.bf16.msra.mxu1 %v5896_v28 }
 0x8c2   : > { %5910 = vmatprep.subr.bf16.mxu1 %v6855_v1 }
 0x8c3   : > { %v2117_v34 = vsel %vm1106_vm1, %v2116_v33, 0.0  ;;  %v5140_v33 = vld [vmem:[%s8097_s2 + $0x48] sm:$0xff] }
 0x8c4   : > { %2118 = vadd.xlane.f32.xlu0 %v2117_v34 }
 0x951   : > { %v2119_v46 = vpop.xlane.xlu0 %2118 }
 0x952   : > { %v2120_v47 = vmul.f32 0.015625, %v2119_v46 }
 0x954   : > { %v2121_v48 = vadd.f32 1e-05, %v2120_v47 }
 0x956   : > { %6245 = vrsqrt.f32 %v2121_v48 }
 0x960   : > { %v6246_v51 = vpop.eup %6245 }
 0x961   : > { %v2123_v53 = vmul.f32 %v6246_v51, %v2115_v32  ;;  %v5139_v32 = vld [vmem:[%s8097_s2 + $0x40] sm:$0xff] }
 0x962   : > { %v5911_v35 = vpack.c.bf16 %v5140_v33, %v5139_v32 }
 0x963   : > { %5543 = vmatmul.mubr.msk.f32.vlgmr.msra.gmra.mrb[10].mxu0 %vm1106_vm1, %v2123_v53 }
 0x964   : > { %5900 = vmatpush3.bf16.msra.mxu0 %v5899_v52  ;;  %5580 = vmatprep.mubr.msk.f32.mxu0 %vm6857_vm0, %v6858_v16 }
 0x965   : > { %5901 = vmatprep.subr.bf16.mxu0 %v6855_v1 }
 0x968   : > { %5903 = vmatpush3.bf16.msra.mxu0 %v5902_v56 }
 0x969   : > { %5904 = vmatprep.subr.bf16.mxu0 %v6855_v1 }
 0x96c   : > { %5906 = vmatpush3.bf16.msra.mxu0 %v5905_v59 }
 0x96d   : > { %5907 = vmatprep.subr.bf16.mxu0 %v6855_v1 }
 0x970   : > { %5909 = vmatpush3.bf16.msra.mxu0 %v5908_v62 }
 0x971   : > { %5602 = vmatprep.subr.mxu0 %v6858_v16 }
 0x973   : > { %5581 = vmatmul.mubr.msk.f32.vlgmr.msra.gmra.mrb[12].mxu0 %vm1106_vm1, %v7532_v10 }
 0x974   : > { %5604 = vmatprep.mubr.msk.f32.mxu0 %vm6857_vm0, %v6858_v16 }
 0xa36   : > { %v2199_v0 = vpop.f32.mrb[10].mxu0 }
 0xa37   : > { %v2200_v2 = vadd.f32 %v5121_v63, %v2199_v0  ;;  %v5544_v3 = vpop.f32.mrb[11].mxu0 }
 0xa39   : > { %v2203_v4 = vmax.f32 %v2200_v2, 0.0 }
 0xa3b   : > { %v2204_v5 = vadd.f32 %v2203_v4, %v2123_v53 }
 0xa3d   : > { %v2205_v7 = vsel %vm1106_vm1, %v2204_v5, 0.0 }
 0xa3e   : > { %2206 = vadd.xlane.f32.xlu0 %v2205_v7 }
 0xa46   : > { %v7648_v8 = vpop.f32.mrb[12].mxu0 }
 0xa47   : > { %v5582_v9 = vpop.f32.mrb[13].mxu0  ;;  %5603 = vmatpush3.xpose.msk.msra.mxu0 %vm1430_vm2, %v7648_v8 }
 0xa48   : > { %5612 = vmatprep.subr.mxu0 %v6858_v16 }
 0xa54   : > { %2632 = vrot.lane.b32.xlu0 %v7648_v8, %s6860_s0 }
 0xacb   : > { %v2207_v11 = vpop.xlane.xlu0 %2206 }
 0xacc   : > { %v2208_v12 = vmul.f32 0.015625, %v2207_v11 }
 0xace   : > { %v2209_v13 = vsub.f32 %v2204_v5, %v2208_v12 }
 0xacf   : > { %v2633_v47 = vpop.permute.xlu0 %2632 }
 0xad0   : > { %v2210_v14 = vmul.f32 %v2209_v13, %v2209_v13 }
 0xad2   : > { %v2211_v15 = vsel %vm1106_vm1, %v2210_v14, 0.0 }
 0xad3   : > { %2212 = vadd.xlane.f32.xlu1 %v2211_v15 }
 0xb60   : > { %v2213_v29 = vpop.xlane.xlu1 %2212 }
 0xb61   : > { %v2214_v30 = vmul.f32 0.015625, %v2213_v29 }
 0xb63   : > { %v2215_v31 = vadd.f32 1e-05, %v2214_v30 }
 0xb65   : > { %6247 = vrsqrt.f32 %v2215_v31 }
 0xb6f   : > { %v6248_v34 = vpop.eup %6247 }
 0xb70   : > { %v2217_v36 = vmul.f32 %v6248_v34, %v2209_v13 }
 0xb72   : > { %5562 = vmatmul.mubr.msk.f32.vlgmr.msra.gmra.mrb[14].mxu1 %vm1106_vm1, %v2217_v36 }
 0xb73   : > { %5912 = vmatpush3.bf16.msra.mxu1 %v5911_v35  ;;  %5599 = vmatprep.mubr.msk.f32.mxu1 %vm6857_vm0, %v6858_v16 }
 0xb74   : > { %5913 = vmatprep.subr.bf16.mxu1 %v6855_v1 }
 0xb77   : > { %5915 = vmatpush3.bf16.msra.mxu1 %v5914_v39 }
 0xb78   : > { %5916 = vmatprep.subr.bf16.mxu1 %v6855_v1 }
 0xb7b   : > { %5918 = vmatpush3.bf16.msra.mxu1 %v5917_v41 }
 0xb7c   : > { %5919 = vmatprep.subr.bf16.mxu1 %v6855_v1 }
 0xb7f   : > { %5921 = vmatpush3.bf16.msra.mxu1 %v5920_v44 }
 0xb80   : > { %5607 = vmatprep.subr.mxu1 %v6858_v16 }
 0xb82   : > { %5600 = vmatmul.mubr.msk.f32.vlgmr.msra.gmra.mrb[16].mxu1 %vm1106_vm1, %v7532_v10 }
 0xb83   : > { %5609 = vmatprep.mubr.msk.f32.mxu1 %vm6857_vm0, %v6858_v16 }
 0xc45   : > { %v7719_v45 = vpop.f32.mrb[14].mxu1 }
 0xc46   : > { %2797 = vrot.lane.b32.xlu0 %v7719_v45, %s6859_s8  ;;  %2630 = vrot.lane.b32.xlu1 %v7719_v45, %s6860_s0  ;;  %v5563_v46 = vpop.f32.mrb[15].mxu1 }
 0xc47   : > { %5605 = vmatmul.mubr.msk.f32.vlgmr.msra.gmra.mrb[14].mxu0 %vm1430_vm2, %v7719_v45 }
 0xc48   : > { %5613 = vmatpush3.xpose.msk.msra.mxu0 %vm1430_vm2, %v2633_v47  ;;  %5614 = vmatprep.mubr.msk.f32.mxu0 %vm6857_vm0, %v6858_v16 }
 0xc49   : > { %5622 = vmatprep.subr.mxu0 %v6858_v16 }
 0xc4a   : > { %2963 = vrot.lane.b32.xlu0 %v7719_v45, %s6861_s11  ;;  %2799 = vrot.lane.b32.xlu1 %v7648_v8, %s6859_s8 }
 0xc4e   : > { %2965 = vrot.lane.b32.xlu1 %v7648_v8, %s6861_s11 }
 0xc55   : > { %v7737_v10 = vpop.f32.mrb[16].mxu1 }
 0xc56   : > { %v5601_v48 = vpop.f32.mrb[17].mxu1  ;;  %5608 = vmatpush3.msra.mxu1 %v7737_v10 }
 0xc57   : > { %5617 = vmatprep.subr.mxu1 %v6858_v16 }
 0xcb8   : > { %v2631_v49 = vpop.permute.xlu1 %2630  ;;  %v2798_v51 = vpop.permute.xlu0 %2797 }
 0xcb9   : > { %5615 = vmatmul.mubr.msk.f32.vlgmr.msra.gmra.mrb[16].mxu0 %vm1430_vm2, %v2631_v49 }
 0xcba   : > { %5624 = vmatprep.mubr.msk.f32.mxu0 %vm6857_vm0, %v6858_v16 }
 0xcbc   : > { %v2800_v50 = vpop.permute.xlu1 %2799  ;;  %v2964_v53 = vpop.permute.xlu0 %2963 }
 0xcbd   : > { %5623 = vmatpush3.xpose.msk.msra.mxu0 %vm1430_vm2, %v2800_v50 }
 0xcbe   : > { %5632 = vmatprep.subr.mxu0 %v6858_v16 }
 0xcc0   : > { %v2966_v52 = vpop.permute.xlu1 %2965  ;;  %5625 = vmatmul.mubr.msk.f32.vlgmr.msra.gmra.mrb[18].mxu0 %vm1430_vm2, %v2798_v51 }
 0xcc1   : > { %5633 = vmatpush3.xpose.msk.msra.mxu0 %vm1430_vm2, %v2966_v52  ;;  %5634 = vmatprep.mubr.msk.f32.mxu0 %vm6857_vm0, %v6858_v16 }
 0xcc2   : > { %5922 = vmatprep.subr.bf16.mxu0 %v6855_v1 }
 0xcc4   : > { %5635 = vmatmul.mubr.msk.f32.vlgmr.msra.gmra.mrb[20].mxu0 %vm1430_vm2, %v2964_v53 }
 0xcc5   : > { %5658 = vmatprep.mubr.msk.f32.mxu0 %vm6857_vm0, %v6858_v16 }
 0xd1a   : > { %v2541_v54 = vpop.f32.mrb[14].mxu0 }
 0xd1b   : > { %v2545_v55 = vmul.f32 0.125, %v2541_v54  ;;  %v5606_v56 = vpop.f32.mrb[15].mxu0 }
 0xd1d   : > { %v2546_v57 = vsel %vm1508_vm3, %v2545_v55, -inf }
 0xd1e   : > { %2547 = vmax.xlane.f32.xlu1 %v2546_v57 }
 0xd8c   : > { %v2704_v58 = vpop.f32.mrb[16].mxu0 }
 0xd8d   : > { %v2708_v59 = vmul.f32 0.125, %v2704_v58  ;;  %v5616_v60 = vpop.f32.mrb[17].mxu0 }
 0xd8f   : > { %v2709_v61 = vsel %vm1508_vm3, %v2708_v59, -inf }
 0xd90   : > { %2710 = vmax.xlane.f32.xlu0 %v2709_v61 }
 0xd93   : > { %v2871_v62 = vpop.f32.mrb[18].mxu0 }
 0xd94   : > { %v2875_v63 = vmul.f32 0.125, %v2871_v62  ;;  %v5626_v0 = vpop.f32.mrb[19].mxu0 }
 0xd96   : > { %v2876_v2 = vsel %vm1508_vm3, %v2875_v63, -inf }
 0xd97   : > { %2877 = vmax.xlane.f32.xlu0 %v2876_v2  ;;  %v3037_v3 = vpop.f32.mrb[20].mxu0  ;;  %v2246_v2 = vld [vmem:[#allocation10 + $0x40] sm:$0xff] }
 0xd98   : > { %v3041_v4 = vmul.f32 0.125, %v3037_v3  ;;  %v5636_v5 = vpop.f32.mrb[21].mxu0  ;;  %v2247_v3 = vld [vmem:[#allocation10 + $0x48] sm:$0xff] }
 0xd99   : > { %v2248_v5 = vld [vmem:[#allocation10 + $0x50] sm:$0xff] }
 0xd9a   : > { %v3042_v7 = vsel %vm1508_vm3, %v3041_v4, -inf }
 0xd9b   : > { %3043 = vmax.xlane.f32.xlu1 %v3042_v7  ;;  %v2249_v7 = vld [vmem:[#allocation10 + $0x58] sm:$0xff] }
 0xdab   : > { %v2548_v8 = vpop.xlane.xlu1 %2547 }
 0xdac   : > { %v2549_v9 = vsub.f32 %v2545_v55, %v2548_v8  ;;  %v2250_v8 = vld [vmem:[#allocation10 + $0x60] sm:$0xff] }
 0xdae   : > { %v2550_v11 = vmul.f32 1.442695, %v2549_v9  ;;  %v2251_v9 = vld [vmem:[#allocation10 + $0x68] sm:$0xff] }
 0xdb0   : > { %6249 = vpow2.f32 %v2550_v11  ;;  %v5929_v11 = vpack.c.bf16 %v2251_v9, %v2250_v8 }
 0xdba   : > { %v6250_v12 = vpop.eup %6249 }
 0xdbb   : > { %v2552_v13 = vsel %vm1508_vm3, %v6250_v12, 0.0 }
 0xdbc   : > { %2553 = vadd.xlane.f32.xlu0 %v2552_v13  ;;  %v2253_v13 = vld [vmem:[#allocation10 + $0x78] sm:$0xff] }
 0xe1d   : > { %v2711_v14 = vpop.xlane.xlu0 %2710 }
 0xe1e   : > { %v2712_v15 = vsub.f32 %v2708_v59, %v2711_v14 }
 0xe20   : > { %v2713_v17 = vmul.f32 1.442695, %v2712_v15  ;;  %v1057_v15 = vld [vmem:[%s1045_s15] sm:$0xff] }
 0xe22   : > { %6251 = vpow2.f32 %v2713_v17  ;;  %v1058_v17 = vld [vmem:[%s1045_s15 + $0x8] sm:$0xff] }
 0xe24   : > { %v2878_v18 = vpop.xlane.xlu0 %2877 }
 0xe25   : > { %v2879_v19 = vsub.f32 %v2875_v63, %v2878_v18 }
 0xe27   : > { %v2880_v20 = vmul.f32 1.442695, %v2879_v19 }
 0xe28   : > { %v3044_v26 = vpop.xlane.xlu1 %3043 }
 0xe29   : > { %6253 = vpow2.f32 %v2880_v20  ;;  %v3045_v27 = vsub.f32 %v3041_v4, %v3044_v26  ;;  %v5923_v4 = vpack.c.bf16 %v2247_v3, %v2246_v2 }
 0xe2b   : > { %v3046_v28 = vmul.f32 1.442695, %v3045_v27  ;;  %5924 = vmatpush3.bf16.msra.mxu0 %v5923_v4 }
 0xe2c   : > { %v6252_v21 = vpop.eup %6251  ;;  %5925 = vmatprep.subr.bf16.mxu0 %v6855_v1 }
 0xe2d   : > { %v2715_v22 = vsel %vm1508_vm3, %v6252_v21, 0.0 }
 0xe2e   : > { %2716 = vadd.xlane.f32.xlu1 %v2715_v22 }
 0xe33   : > { %v6254_v23 = vpop.eup %6253 }
 0xe34   : > { %v2882_v24 = vsel %vm1508_vm3, %v6254_v23, 0.0 }
 0xe35   : > { %2883 = vadd.xlane.f32.xlu0 %v2882_v24  ;;  %v3255_v24 = vld [vmem:[#allocation16 + $0x8] sm:$0xff] }
 0xe3f   : > { %2887 = vrot.lane.b32.xlu1 %v7737_v10, %s6859_s8 }
 0xe49   : > { %v2554_v25 = vpop.xlane.xlu0 %2553 }
 0xe4a   : > { %6255 = vrcp.f32 %v2554_v25  ;;  %v3256_v25 = vld [vmem:[#allocation16 + $0x10] sm:$0xff] }
 0xe4b   : > { %2721 = vrot.lane.b32.xlu0 %v7737_v10, %s6860_s0  ;;  %6257 = vpow2.f32 %v3046_v28  ;;  %v3257_v28 = vld [vmem:[#allocation16 + $0x18] sm:$0xff] }
 0xe54   : > { %v6256_v29 = vpop.eup %6255 }
 0xe55   : > { %v2556_v30 = vmul.f32 %v6256_v29, %v6250_v12  ;;  %v6258_v31 = vpop.eup %6257  ;;  %v2252_v12 = vld [vmem:[#allocation10 + $0x70] sm:$0xff]  ;;  %v3258_v29 = vld [vmem:[#allocation16 + $0x20] sm:$0xff] }
 0xe56   : > { %v3048_v32 = vsel %vm1508_vm3, %v6258_v31, 0.0  ;;  %v5932_v14 = vpack.c.bf16 %v2253_v13, %v2252_v12  ;;  %v3387_v12 = vld [vmem:[#allocation21 + $0x8] sm:$0xff] }
 0xe57   : > { %5610 = vmatmul.mubr.msk.f32.vlgmr.msra.gmra.mrb[18].mxu1 %vm1508_vm3, %v2556_v30  ;;  %v5938_v30 = vpack.c.bf16 %v3257_v28, %v3256_v25  ;;  %v3394_v13 = vld [vmem:[%s8100_s26] sm:$0xff] }
 0xe58   : > { %5619 = vmatprep.mubr.msk.f32.mxu1 %vm6857_vm0, %v6858_v16  ;;  %v3398_v25 = vld [vmem:[%s8100_s26 + $0x20] sm:$0xff] }
 0xe63   : > { %3049 = vadd.xlane.f32.xlu1 %v3048_v32  ;;  %v5164_v32 = vld [vmem:[#allocation13] ss:$0 sm:$0xff] }
 0xe74   : > { %3053 = vrot.lane.b32.xlu1 %v7737_v10, %s6861_s11 }
 0xebb   : > { %v2717_v33 = vpop.xlane.xlu1 %2716 }
 0xebc   : > { %6259 = vrcp.f32 %v2717_v33  ;;  %v5165_v33 = vld [vmem:[#allocation15] ss:$0 sm:$0xff] }
 0xebf   : > { %v2888_v38 = vpop.permute.xlu1 %2887 }
 0xec2   : > { %v2884_v34 = vpop.xlane.xlu0 %2883 }
 0xec3   : > { %6261 = vrcp.f32 %v2884_v34 }
 0xec6   : > { %v6260_v35 = vpop.eup %6259  ;;  %v2722_v36 = vpop.permute.xlu0 %2721 }
 0xec7   : > { %v2719_v37 = vmul.f32 %v6260_v35, %v6252_v21  ;;  %5618 = vmatpush3.msra.mxu1 %v2722_v36 }
 0xec8   : > { %5627 = vmatprep.subr.mxu1 %v6858_v16 }
 0xec9   : > { %5620 = vmatmul.mubr.msk.f32.vlgmr.msra.gmra.mrb[20].mxu1 %vm1508_vm3, %v2719_v37 }
 0xeca   : > { %5628 = vmatpush3.msra.mxu1 %v2888_v38  ;;  %5629 = vmatprep.mubr.msk.f32.mxu1 %vm6857_vm0, %v6858_v16  ;;  %v3260_v38 = vld [vmem:[#allocation16 + $0x30] sm:$0xff] }
 0xecb   : > { %5637 = vmatprep.subr.mxu1 %v6858_v16 }
 0xecd   : > { %v6262_v39 = vpop.eup %6261 }
 0xece   : > { %v2886_v40 = vmul.f32 %v6262_v39, %v6254_v23  ;;  %v3254_v23 = vld [vmem:[#allocation16] sm:$0xff]  ;;  %v3261_v39 = vld [vmem:[#allocation16 + $0x38] sm:$0xff] }
 0xecf   : > { %v5934_v27 = vpack.c.bf16 %v3255_v24, %v3254_v23  ;;  %v3391_v23 = vld [vmem:[#allocation21 + $0x28] sm:$0xff] }
 0xed0   : > { %5630 = vmatmul.mubr.msk.f32.vlgmr.msra.gmra.mrb[22].mxu1 %vm1508_vm3, %v2886_v40 }
 0xed1   : > { %5639 = vmatprep.mubr.msk.f32.mxu1 %vm6857_vm0, %v6858_v16 }
 0xef0   : > { %v3050_v6 = vpop.xlane.xlu1 %3049 }
 0xef1   : > { %6263 = vrcp.f32 %v3050_v6 }
 0xef4   : > { %v3054_v41 = vpop.permute.xlu1 %3053 }
 0xef5   : > { %5638 = vmatpush3.msra.mxu1 %v3054_v41  ;;  %v5946_v41 = vpack.c.bf16 %v3261_v39, %v3260_v38 }
 0xef6   : > { %5935 = vmatprep.subr.bf16.mxu1 %v5934_v27 }
 0xefb   : > { %v6264_v42 = vpop.eup %6263 }
 0xefc   : > { %v3052_v43 = vmul.f32 %v6264_v42, %v6258_v31  ;;  %v3259_v31 = vld [vmem:[#allocation16 + $0x28] sm:$0xff] }
 0xefd   : > { %v5942_v36 = vpack.c.bf16 %v3259_v31, %v3258_v29  ;;  %v3392_v29 = vld [vmem:[#allocation21 + $0x30] sm:$0xff]  ;;  %v3400_v31 = vld [vmem:[%s8100_s26 + $0x30] sm:$0xff] }
 0xefe   : > { %5640 = vmatmul.mubr.msk.f32.vlgmr.msra.gmra.mrb[24].mxu1 %vm1508_vm3, %v3052_v43 }
 0xeff   : > { %5937 = vmatpush3.bf16.msra.mxu1 %v5934_v27 }
 0xf00   : > { %5939 = vmatprep.subr.bf16.mxu1 %v5938_v30 }
 0xf03   : > { %5941 = vmatpush3.bf16.msra.mxu1 %v5938_v30  ;;  %v3393_v30 = vld [vmem:[#allocation21 + $0x38] sm:$0xff] }
 0xf04   : > { %5943 = vmatprep.subr.bf16.mxu1 %v5942_v36 }
 0xf07   : > { %5945 = vmatpush3.bf16.msra.mxu1 %v5942_v36 }
 0xf08   : > { %5947 = vmatprep.subr.bf16.mxu1 %v5946_v41 }
 0xf0b   : > { %5949 = vmatpush3.bf16.msra.mxu1 %v5946_v41 }
 0xf0c   : > { %5966 = vmatprep.subr.bf16.mxu1 %v6855_v1 }
 0xf2a   : > { %v2626_v44 = vpop.f32.mrb[18].mxu1 }
 0xf2b   : > { %v5611_v46 = vpop.f32.mrb[19].mxu1 }
 0xf9c   : > { %v2793_v47 = vpop.f32.mrb[20].mxu1 }
 0xf9d   : > { %3130 = vrot.lane.b32.xlu0 %v2793_v47, %s6862_s24  ;;  %v5621_v10 = vpop.f32.mrb[21].mxu1 }
 0xfa3   : > { %v2959_v48 = vpop.f32.mrb[22].mxu1 }
 0xfa4   : > { %3134 = vrot.lane.b32.xlu1 %v2959_v48, %s6863_s6  ;;  %v5631_v49 = vpop.f32.mrb[23].mxu1 }
 0xfd1   : > { %v3125_v50 = vpop.f32.mrb[24].mxu1 }
 0xfd2   : > { %3138 = vrot.lane.b32.xlu0 %v3125_v50, %s6864_s27  ;;  %v5641_v51 = vpop.f32.mrb[25].mxu1 }
 0xfd3   : > { %v3378_v51 = vld [vmem:[#allocation19] sm:$0xff] }
0x100f   : > { %v3131_v52 = vpop.permute.xlu0 %3130 }
0x1010   : > { %v3141_v54 = vsel %vm1430_vm2, %v2626_v44, %v3131_v52  ;;  %v5162_v44 = vld [vmem:[#allocation12 + $0x1] ss:$0 sm:$0xff]  ;;  %v3379_v52 = vld [vmem:[#allocation19 + $0x8] sm:$0xff] }
0x1016   : > { %v3135_v53 = vpop.permute.xlu1 %3134 }
0x1017   : > { %v3142_v55 = vsel %vm2105_vm4, %v3141_v54, %v3135_v53  ;;  %v3380_v53 = vld [vmem:[#allocation19 + $0x10] sm:$0xff]  ;;  %v5950_v54 = vpack.c.bf16 %v3379_v52, %v3378_v51 }
0x1044   : > { %v3139_v56 = vpop.permute.xlu0 %3138 }
0x1045   : > { %v3143_v57 = vsel %vm2107_vm5, %v3142_v55, %v3139_v56  ;;  %v3381_v55 = vld [vmem:[#allocation19 + $0x18] sm:$0xff] }
0x1046   : > { %v3144_v58 = vadd.f32 %v3143_v57, %v7719_v45  ;;  %v5926_v45 = vpack.c.bf16 %v2249_v7, %v2248_v5  ;;  %v5954_v56 = vpack.c.bf16 %v3381_v55, %v3380_v53  ;;  %v3382_v57 = vld [vmem:[#allocation19 + $0x20] sm:$0xff] }
0x1048   : > { %v3145_v59 = vsel %vm1106_vm1, %v3144_v58, 0.0  ;;  %5927 = vmatpush3.bf16.msra.mxu0 %v5926_v45 }
0x1049   : > { %3146 = vadd.xlane.f32.xlu1 %v3145_v59  ;;  %5928 = vmatprep.subr.bf16.mxu0 %v6855_v1 }
0x104c   : > { %5930 = vmatpush3.bf16.msra.mxu0 %v5929_v11  ;;  %v3386_v11 = vld [vmem:[#allocation21] sm:$0xff] }
0x104d   : > { %5931 = vmatprep.subr.bf16.mxu0 %v6855_v1 }
0x1050   : > { %5933 = vmatpush3.bf16.msra.mxu0 %v5932_v14  ;;  %v5967_v14 = vpack.c.bf16 %v3387_v12, %v3386_v11 }
0x1051   : > { %5951 = vmatprep.subr.bf16.mxu0 %v5950_v54 }
0x105a   : > { %3270 = vperm.xlu1 %6228, %v1058_v17  }
0x10d6   : > { %v3147_v60 = vpop.xlane.xlu1 %3146 }
0x10d7   : > { %v3148_v61 = vmul.f32 0.015625, %v3147_v60  ;;  %v3384_v60 = vld [vmem:[#allocation19 + $0x30] sm:$0xff] }
0x10d9   : > { %v3149_v62 = vsub.f32 %v3144_v58, %v3148_v61  ;;  %v3383_v58 = vld [vmem:[#allocation19 + $0x28] sm:$0xff]  ;;  %v3385_v61 = vld [vmem:[#allocation19 + $0x38] sm:$0xff] }
0x10da   : > { %v3271_v35 = vpop.permute.xlu1 %3270  ;;  %v5958_v59 = vpack.c.bf16 %v3383_v58, %v3382_v57 }
0x10db   : > { %v3150_v63 = vmul.f32 %v3149_v62, %v3149_v62  ;;  %v3280_v6 = vmul.f32 %v5164_v32, %v3271_v35 }
0x10dd   : > { %v3151_v0 = vsel %vm1106_vm1, %v3150_v63, 0.0  ;;  %v3288_v42 = vadd.f32 %v5165_v33, %v3280_v6  ;;  %v5166_v63 = vld [vmem:[#allocation18] ss:$0 sm:$0xff] }
0x10de   : > { %3152 = vadd.xlane.f32.xlu0 %v3151_v0 }
0x10df   : > { %v3290_v43 = vmax.f32 %v3288_v42, 0.0 }
0x10f4   : > { %3265 = vperm.xlu0 %6227, %v1057_v15   ;;  %v3395_v15 = vld [vmem:[%s8100_s26 + $0x8] sm:$0xff] }
0x10f5   : > { %v5979_v17 = vpack.c.bf16 %v3395_v15, %v3394_v13 }
0x116b   : > { %v3153_v18 = vpop.xlane.xlu0 %3152 }
0x116c   : > { %v3154_v19 = vmul.f32 0.015625, %v3153_v18  ;;  %v3389_v18 = vld [vmem:[#allocation21 + $0x18] sm:$0xff] }
0x116e   : > { %v3155_v20 = vadd.f32 1e-05, %v3154_v19  ;;  %v3396_v19 = vld [vmem:[%s8100_s26 + $0x10] sm:$0xff] }
0x1170   : > { %6265 = vrsqrt.f32 %v3155_v20 }
0x1173   : > { %v3266_v26 = vpop.permute.xlu0 %3265 }
0x1174   : > { %v3279_v34 = vmul.f32 %v5164_v32, %v3266_v26  ;;  %v3399_v26 = vld [vmem:[%s8100_s26 + $0x28] sm:$0xff]  ;;  %v3401_v32 = vld [vmem:[%s8100_s26 + $0x38] sm:$0xff] }
0x1175   : > { %v5985_v28 = vpack.c.bf16 %v3399_v26, %v3398_v25 }
0x1176   : > { %v3287_v37 = vadd.f32 %v5165_v33, %v3279_v34  ;;  %v5976_v33 = vpack.c.bf16 %v3393_v30, %v3392_v29  ;;  %v5988_v34 = vpack.c.bf16 %v3401_v32, %v3400_v31 }
0x1178   : > { %v3289_v40 = vmax.f32 %v3287_v37, 0.0 }
0x117a   : > { %v6266_v21 = vpop.eup %6265  ;;  %5677 = vmatprep.mubr.msk.f32.mxu1 %vm1106_vm1, %v3289_v40 }
0x117b   : > { %v3157_v22 = vmul.f32 %v6266_v21, %v3149_v62  ;;  %5678 = vmatmul.mubr.msk.f32.vlgmr.msra.gmra.mrb[26].mxu1 %vm1106_vm1, %v3290_v43  ;;  %v5962_v62 = vpack.c.bf16 %v3385_v61, %v3384_v60  ;;  %v3397_v21 = vld [vmem:[%s8100_s26 + $0x18] sm:$0xff] }
0x117c   : > { %5715 = vmatprep.mubr.msk.f32.mxu1 %vm6857_vm0, %v6858_v16  ;;  %5968 = vmatpush3.bf16.msra.mxu1 %v5967_v14  ;;  %v5982_v24 = vpack.c.bf16 %v3397_v21, %v3396_v19 }
0x117d   : > { %5659 = vmatmul.mubr.msk.f32.vlgmr.msra.gmra.mrb[22].mxu0 %vm1106_vm1, %v3157_v22  ;;  %5969 = vmatprep.subr.bf16.mxu1 %v6855_v1 }
0x117e   : > { %5953 = vmatpush3.bf16.msra.mxu0 %v5950_v54 }
0x117f   : > { %5955 = vmatprep.subr.bf16.mxu0 %v5954_v56 }
0x1182   : > { %5957 = vmatpush3.bf16.msra.mxu0 %v5954_v56 }
0x1183   : > { %5959 = vmatprep.subr.bf16.mxu0 %v5958_v59 }
0x1186   : > { %5961 = vmatpush3.bf16.msra.mxu0 %v5958_v59 }
0x1187   : > { %5963 = vmatprep.subr.bf16.mxu0 %v5962_v62 }
0x118a   : > { %5965 = vmatpush3.bf16.msra.mxu0 %v5962_v62 }
0x118b   : > { %5978 = vmatprep.subr.bf16.mxu0 %v6855_v1 }
0x124e   : > { %v5679_v0 = vpop.f32.mrb[26].mxu1 }
0x124f   : > { %v3375_v2 = vadd.f32 %v5679_v0, %v5166_v63  ;;  %v3369_v3 = vpop.f32.mrb[27].mxu1 }
0x1250   : > { %v3233_v46 = vpop.f32.mrb[22].mxu0  ;;  %v3370_v4 = vadd.f32 %v5166_v63, %v3369_v3 }
0x1251   : > { %v3234_v47 = vadd.f32 %v5162_v44, %v3233_v46  ;;  %v5660_v10 = vpop.f32.mrb[23].mxu0 }
0x1252   : > { %5696 = vmatprep.mubr.msk.f32.mxu0 %vm1106_vm1, %v3370_v4 }
0x1253   : > { %v3237_v48 = vmax.f32 %v3234_v47, 0.0  ;;  %5697 = vmatmul.mubr.msk.f32.vlgmr.msra.gmra.mrb[24].mxu0 %vm1106_vm1, %v3375_v2 }
0x1254   : > { %5734 = vmatprep.mubr.msk.f32.mxu0 %vm6857_vm0, %v6858_v16  ;;  %v3388_v16 = vld [vmem:[#allocation21 + $0x10] sm:$0xff]  ;;  %5980 = vmatpush3.bf16.msra.mxu0 %v5979_v17 }
0x1255   : > { %v3238_v49 = vadd.f32 %v3237_v48, %v3157_v22  ;;  %v5970_v20 = vpack.c.bf16 %v3389_v18, %v3388_v16  ;;  %v3390_v22 = vld [vmem:[#allocation21 + $0x20] sm:$0xff]  ;;  %5981 = vmatprep.subr.bf16.mxu0 %v6855_v1 }
0x1256   : > { %v5973_v27 = vpack.c.bf16 %v3391_v23, %v3390_v22 }
0x1257   : > { %v3239_v50 = vsel %vm1106_vm1, %v3238_v49, 0.0  ;;  %5971 = vmatpush3.bf16.msra.mxu1 %v5970_v20 }
0x1258   : > { %3240 = vadd.xlane.f32.xlu1 %v3239_v50  ;;  %5983 = vmatpush3.bf16.msra.mxu0 %v5982_v24 }
0x1259   : > { %5972 = vmatprep.subr.bf16.mxu1 %v6855_v1  ;;  %5984 = vmatprep.subr.bf16.mxu0 %v6855_v1 }
0x125b   : > { %5974 = vmatpush3.bf16.msra.mxu1 %v5973_v27 }
0x125c   : > { %5986 = vmatpush3.bf16.msra.mxu0 %v5985_v28  ;;  %5975 = vmatprep.subr.bf16.mxu1 %v6855_v1 }
0x125d   : > { %5987 = vmatprep.subr.bf16.mxu0 %v6855_v1 }
0x125f   : > { %5977 = vmatpush3.bf16.msra.mxu1 %v5976_v33 }
0x1260   : > { %5989 = vmatpush3.bf16.msra.mxu0 %v5988_v34 }
0x12e5   : > { %v3241_v5 = vpop.xlane.xlu1 %3240 }
0x12e6   : > { %v3242_v7 = vmul.f32 0.015625, %v3241_v5 }
0x12e8   : > { %v3243_v45 = vsub.f32 %v3238_v49, %v3242_v7 }
0x12ea   : > { %v3244_v8 = vmul.f32 %v3243_v45, %v3243_v45 }
0x12ec   : > { %v3245_v9 = vsel %vm1106_vm1, %v3244_v8, 0.0 }
0x12ed   : > { %3246 = vadd.xlane.f32.xlu0 %v3245_v9 }
0x1326   : > { %v7844_v40 = vpop.f32.mrb[24].mxu0 }
0x1327   : > { %v7846_v6 = vpop.f32.mrb[25].mxu0 }
0x1328   : > { %3824 = vrot.lane.b32.xlu0 %v7846_v6, %s6860_s0 }
0x132c   : > { %4022 = vrot.lane.b32.xlu0 %v7844_v40, %s6859_s8 }
0x1330   : > { %4215 = vrot.lane.b32.xlu0 %v7846_v6, %s6861_s11 }
0x137a   : > { %v3247_v35 = vpop.xlane.xlu0 %3246 }
0x137b   : > { %v3248_v36 = vmul.f32 0.015625, %v3247_v35 }
0x137d   : > { %v3249_v37 = vadd.f32 1e-05, %v3248_v36 }
0x137f   : > { %6267 = vrsqrt.f32 %v3249_v37 }
0x1389   : > { %v6268_v38 = vpop.eup %6267 }
0x138a   : > { %v3251_v39 = vmul.f32 %v6268_v38, %v3243_v45 }
0x138c   : > { %5716 = vmatmul.mubr.msk.f32.vlgmr.msra.gmra.mrb[28].mxu1 %vm1106_vm1, %v3251_v39  ;;  %5735 = vmatmul.mubr.msk.f32.vlgmr.msra.gmra.mrb[26].mxu0 %vm1106_vm1, %v3251_v39 }
0x138d   : > { %5739 = vmatprep.mubr.msk.f32.mxu1 %vm1430_vm2, %v7846_v6 }
0x139a   : > { %v3825_v57 = vpop.permute.xlu0 %3824 }
0x139e   : > { %v4023_v59 = vpop.permute.xlu0 %4022 }
0x13a2   : > { %v4216_v2 = vpop.permute.xlu0 %4215 }
0x145f   : > { %v3561_v1 = vpop.f32.mrb[28].mxu1  ;;  %v7856_v41 = vpop.f32.mrb[26].mxu0 }
0x1460   : > { %v5717_v42 = vpop.f32.mrb[29].mxu1  ;;  %v5736_v43 = vpop.f32.mrb[27].mxu0  ;;  %5737 = vmatprep.subr.msk.mxu1 %vm1430_vm2, %v3561_v1 }
0x1461   : > { %5738 = vmatpush3.xpose.msk.msra.mxu1 %vm1430_vm2, %v3561_v1 }
0x1462   : > { %5742 = vmatprep.subr.mxu1 %v7856_v41 }
0x1464   : > { %5740 = vmatmul.mubr.msk.f32.vlgmr.msra.gmra.mrb[30].mxu1 %vm1430_vm2, %v7844_v40 }
0x1465   : > { %5743 = vmatpush3.msra.mxu1 %v7856_v41 }
0x1537   : > { %v5741_v44 = vpop.f32.mrb[30].mxu1 }
0x1538   : > { %v3710_v46 = vpop.f32.mrb[31].mxu1  ;;  %v3720_v10 = vmul.f32 0.125, %v5741_v44 }
0x1539   : > { %v3719_v47 = vmul.f32 0.125, %v3710_v46 }
0x153a   : > { %v3724_v49 = vsel %vm1508_vm3, %v3720_v10, -inf }
0x153b   : > { %v3721_v48 = vsel %vm1508_vm3, %v3719_v47, -inf }
0x153c   : > { %3722 = vmax.xlane.f32.xlu1 %v3721_v48 }
0x1540   : > { %3725 = vmax.xlane.f32.xlu1 %v3724_v49 }
0x1551   : > { %3828 = vrot.lane.b32.xlu1 %v3561_v1, %s6860_s0 }
0x1555   : > { %3826 = vrot.lane.b32.xlu1 %v7844_v40, %s6860_s0 }
0x1559   : > { %4024 = vrot.lane.b32.xlu1 %v3561_v1, %s6859_s8 }
0x155d   : > { %4020 = vrot.lane.b32.xlu1 %v7846_v6, %s6859_s8 }
0x15c9   : > { %v3723_v50 = vpop.xlane.xlu1 %3722 }
0x15ca   : > { %v3727_v51 = vsub.f32 %v3719_v47, %v3723_v50 }
0x15cc   : > { %v3729_v54 = vmul.f32 1.442695, %v3727_v51 }
0x15cd   : > { %v3726_v52 = vpop.xlane.xlu1 %3725 }
0x15ce   : > { %v3728_v53 = vsub.f32 %v3720_v10, %v3726_v52 }
0x15d0   : > { %v3731_v55 = vmul.f32 1.442695, %v3728_v53 }
0x15d1   : > { %v3829_v56 = vpop.permute.xlu1 %3828 }
0x15d2   : > { %6269 = vpow2.f32 %v3731_v55  ;;  %5747 = vmatprep.subr.msk.mxu1 %vm1430_vm2, %v3829_v56 }
0x15d3   : > { %6271 = vpow2.f32 %v3729_v54 }
0x15d5   : > { %v3827_v58 = vpop.permute.xlu1 %3826 }
0x15d9   : > { %v4025_v60 = vpop.permute.xlu1 %4024 }
0x15da   : > { %5757 = vmatprep.subr.msk.mxu0 %vm1430_vm2, %v4025_v60 }
0x15db   : > { %5758 = vmatpush3.xpose.msk.msra.mxu0 %vm1430_vm2, %v4025_v60 }
0x15dc   : > { %v6270_v61 = vpop.eup %6269 }
0x15dd   : > { %v4021_v62 = vpop.permute.xlu1 %4020  ;;  %v3736_v63 = vsel %vm1508_vm3, %v6270_v61, 0.0  ;;  %v6272_v0 = vpop.eup %6271 }
0x15de   : > { %3737 = vadd.xlane.f32.xlu1 %v3736_v63  ;;  %5759 = vmatprep.mubr.msk.f32.mxu0 %vm1430_vm2, %v4021_v62  ;;  %v3733_v3 = vsel %vm1508_vm3, %v6272_v0, 0.0 }
0x15df   : > { %5760 = vmatmul.mubr.msk.f32.vlgmr.msra.gmra.mrb[28].mxu0 %vm1430_vm2, %v4023_v59 }
0x15e0   : > { %5769 = vmatprep.mubr.msk.f32.mxu0 %vm1430_vm2, %v4216_v2 }
0x15e2   : > { %3734 = vadd.xlane.f32.xlu1 %v3733_v3 }
0x15f3   : > { %4219 = vrot.lane.b32.xlu1 %v3561_v1, %s6861_s11 }
0x15f7   : > { %4217 = vrot.lane.b32.xlu1 %v7844_v40, %s6861_s11 }
0x166b   : > { %v3738_v4 = vpop.xlane.xlu1 %3737 }
0x166c   : > { %6273 = vrcp.f32 %v3738_v4 }
0x166f   : > { %v3735_v5 = vpop.xlane.xlu1 %3734 }
0x1670   : > { %6275 = vrcp.f32 %v3735_v5 }
0x1673   : > { %v4220_v7 = vpop.permute.xlu1 %4219 }
0x1674   : > { %5767 = vmatprep.subr.msk.mxu0 %vm1430_vm2, %v4220_v7 }
0x1675   : > { %5768 = vmatpush3.xpose.msk.msra.mxu0 %vm1430_vm2, %v4220_v7 }
0x1676   : > { %v6274_v8 = vpop.eup %6273 }
0x1677   : > { %v4218_v45 = vpop.permute.xlu1 %4217  ;;  %v3742_v12 = vmul.f32 %v6274_v8, %v6270_v61 }
0x1678   : > { %5770 = vmatmul.mubr.msk.f32.vlgmr.msra.gmra.mrb[30].mxu0 %vm1430_vm2, %v4218_v45 }
0x167a   : > { %v6276_v9 = vpop.eup %6275 }
0x167b   : > { %v3741_v11 = vmul.f32 %v6276_v9, %v6272_v0 }
0x167d   : > { %5744 = vmatprep.mubr.msk.f32.mxu1 %vm1508_vm3, %v3741_v11 }
0x167e   : > { %5745 = vmatmul.mubr.msk.f32.vlgmr.msra.gmra.mrb[32].mxu1 %vm1508_vm3, %v3742_v12 }
0x167f   : > { %5748 = vmatpush3.xpose.msk.msra.mxu1 %vm1430_vm2, %v3829_v56  ;;  %5749 = vmatprep.mubr.msk.f32.mxu1 %vm1430_vm2, %v3825_v57 }
0x1682   : > { %5750 = vmatmul.mubr.msk.f32.vlgmr.msra.gmra.mrb[34].mxu1 %vm1430_vm2, %v3827_v58 }
0x16b2   : > { %v5761_v13 = vpop.f32.mrb[28].mxu0 }
0x16b3   : > { %v4098_v14 = vpop.f32.mrb[29].mxu0  ;;  %v4108_v28 = vmul.f32 0.125, %v5761_v13 }
0x16b4   : > { %v4107_v25 = vmul.f32 0.125, %v4098_v14 }
0x16b5   : > { %v4112_v31 = vsel %vm1508_vm3, %v4108_v28, -inf }
0x16b6   : > { %v4109_v29 = vsel %vm1508_vm3, %v4107_v25, -inf }
0x174b   : > { %v5771_v15 = vpop.f32.mrb[30].mxu0 }
0x174c   : > { %v4293_v17 = vpop.f32.mrb[31].mxu0  ;;  %v4303_v30 = vmul.f32 0.125, %v5771_v15 }
0x174d   : > { %v4302_v23 = vmul.f32 0.125, %v4293_v17 }
0x174e   : > { %v4307_v32 = vsel %vm1508_vm3, %v4303_v30, -inf }
0x174f   : > { %v4304_v27 = vsel %vm1508_vm3, %v4302_v23, -inf }
0x1751   : > { %v7891_v16 = vpop.f32.mrb[32].mxu1 }
0x1752   : > { %v7893_v18 = vpop.f32.mrb[33].mxu1 }
0x1755   : > { %v5751_v19 = vpop.f32.mrb[34].mxu1 }
0x1756   : > { %v3912_v20 = vmul.f32 0.125, %v5751_v19  ;;  %v3902_v21 = vpop.f32.mrb[35].mxu1 }
0x1757   : > { %v3911_v22 = vmul.f32 0.125, %v3902_v21 }
0x1758   : > { %v3916_v24 = vsel %vm1508_vm3, %v3912_v20, -inf }
0x1759   : > { %3917 = vmax.xlane.f32.xlu1 %v3916_v24  ;;  %v3913_v26 = vsel %vm1508_vm3, %v3911_v22, -inf }
0x175a   : > { %3914 = vmax.xlane.f32.xlu0 %v3913_v26 }
0x175d   : > { %4305 = vmax.xlane.f32.xlu1 %v4304_v27 }
0x175e   : > { %4110 = vmax.xlane.f32.xlu0 %v4109_v29 }
0x1762   : > { %4113 = vmax.xlane.f32.xlu0 %v4112_v31 }
0x1766   : > { %4308 = vmax.xlane.f32.xlu0 %v4307_v32 }
0x17e6   : > { %v3918_v33 = vpop.xlane.xlu1 %3917 }
0x17e7   : > { %v3915_v34 = vpop.xlane.xlu0 %3914  ;;  %v3920_v44 = vsub.f32 %v3912_v20, %v3918_v33 }
0x17e8   : > { %v3919_v60 = vsub.f32 %v3911_v22, %v3915_v34 }
0x17e9   : > { %v3923_v48 = vmul.f32 1.442695, %v3920_v44 }
0x17ea   : > { %v4306_v35 = vpop.xlane.xlu1 %4305  ;;  %v3921_v61 = vmul.f32 1.442695, %v3919_v60  ;;  %v3407_v60 = vld [vmem:[#allocation22 + $0x28] sm:$0xff] }
0x17eb   : > { %v4310_v36 = vsub.f32 %v4302_v23, %v4306_v35  ;;  %v4111_v37 = vpop.xlane.xlu0 %4110 }
0x17ec   : > { %v4115_v38 = vsub.f32 %v4107_v25, %v4111_v37 }
0x17ed   : > { %v4312_v39 = vmul.f32 1.442695, %v4310_v36 }
0x17ee   : > { %v4117_v1 = vmul.f32 1.442695, %v4115_v38 }
0x17ef   : > { %v4114_v42 = vpop.xlane.xlu0 %4113 }
0x17f0   : > { %6277 = vpow2.f32 %v4117_v1  ;;  %v4116_v43 = vsub.f32 %v4108_v28, %v4114_v42 }
0x17f1   : > { %6279 = vpow2.f32 %v4312_v39 }
0x17f2   : > { %v4119_v46 = vmul.f32 1.442695, %v4116_v43 }
0x17f3   : > { %v4309_v47 = vpop.xlane.xlu0 %4308 }
0x17f4   : > { %6281 = vpow2.f32 %v4119_v46  ;;  %v4311_v10 = vsub.f32 %v4303_v30, %v4309_v47 }
0x17f6   : > { %v4314_v49 = vmul.f32 1.442695, %v4311_v10 }
0x17f8   : > { %6283 = vpow2.f32 %v4314_v49 }
0x17f9   : > { %6285 = vpow2.f32 %v3923_v48 }
0x17fa   : > { %v6278_v50 = vpop.eup %6277  ;;  %6287 = vpow2.f32 %v3921_v61 }
0x17fb   : > { %v4121_v51 = vsel %vm1508_vm3, %v6278_v50, 0.0  ;;  %v6280_v52 = vpop.eup %6279 }
0x17fc   : > { %4122 = vadd.xlane.f32.xlu1 %v4121_v51  ;;  %v4316_v54 = vsel %vm1508_vm3, %v6280_v52, 0.0 }
0x17fe   : > { %v6282_v53 = vpop.eup %6281 }
0x17ff   : > { %v4124_v55 = vsel %vm1508_vm3, %v6282_v53, 0.0 }
0x1800   : > { %4317 = vadd.xlane.f32.xlu1 %v4316_v54  ;;  %4125 = vadd.xlane.f32.xlu0 %v4124_v55  ;;  %v3403_v54 = vld [vmem:[#allocation22 + $0x8] sm:$0xff] }
0x1802   : > { %v6284_v56 = vpop.eup %6283 }
0x1803   : > { %v4319_v57 = vsel %vm1508_vm3, %v6284_v56, 0.0  ;;  %v6286_v58 = vpop.eup %6285 }
0x1804   : > { %4320 = vadd.xlane.f32.xlu0 %v4319_v57  ;;  %v3928_v59 = vsel %vm1508_vm3, %v6286_v58, 0.0  ;;  %v6288_v62 = vpop.eup %6287  ;;  %v3405_v57 = vld [vmem:[#allocation22 + $0x18] sm:$0xff] }
0x1805   : > { %v3925_v63 = vsel %vm1508_vm3, %v6288_v62, 0.0 }
0x1808   : > { %3929 = vadd.xlane.f32.xlu0 %v3928_v59 }
0x1811   : > { %3936 = vrot.lane.b32.xlu1 %v7856_v41, %s6860_s0 }
0x181e   : > { %4131 = vrot.lane.b32.xlu0 %v7856_v41, %s6859_s8 }
0x1835   : > { %3926 = vadd.xlane.f32.xlu1 %v3925_v63  ;;  %v3409_v63 = vld [vmem:[#allocation22 + $0x38] sm:$0xff] }
0x1846   : > { %4326 = vrot.lane.b32.xlu1 %v7856_v41, %s6861_s11  ;;  %s8101_s11 = sld [smem:[#allocation53_spill]] }
0x1889   : > { %v4123_v0 = vpop.xlane.xlu1 %4122 }
0x188a   : > { %6289 = vrcp.f32 %v4123_v0 }
0x188d   : > { %v4318_v2 = vpop.xlane.xlu1 %4317  ;;  %v4126_v3 = vpop.xlane.xlu0 %4125 }
0x1891   : > { %v3937_v4 = vpop.permute.xlu1 %3936  ;;  %v4321_v5 = vpop.xlane.xlu0 %4320 }
0x1892   : > { %5752 = vmatprep.subr.mxu1 %v3937_v4 }
0x1893   : > { %5753 = vmatpush3.msra.mxu1 %v3937_v4 }
0x1894   : > { %v6290_v9 = vpop.eup %6289 }
0x1895   : > { %v3930_v7 = vpop.xlane.xlu0 %3929  ;;  %v4129_v15 = vmul.f32 %v6290_v9, %v6278_v50 }
0x1896   : > { %6291 = vrcp.f32 %v3930_v7 }
0x1899   : > { %v4132_v45 = vpop.permute.xlu0 %4131 }
0x189a   : > { %5762 = vmatprep.subr.mxu1 %v4132_v45 }
0x18a0   : > { %v6292_v11 = vpop.eup %6291 }
0x18a1   : > { %v3934_v13 = vmul.f32 %v6292_v11, %v6286_v58  ;;  %v3406_v58 = vld [vmem:[#allocation22 + $0x20] sm:$0xff] }
0x18a2   : > { %v5998_v61 = vpack.c.bf16 %v3407_v60, %v3406_v58  ;;  %v5196_v60 = vld [vmem:[#allocation25] ss:$0 sm:$0xff] }
0x18c2   : > { %v3927_v8 = vpop.xlane.xlu1 %3926 }
0x18c3   : > { %6293 = vrcp.f32 %v3927_v8 }
0x18c4   : > { %6295 = vrcp.f32 %v4126_v3 }
0x18c5   : > { %6297 = vrcp.f32 %v4318_v2 }
0x18c6   : > { %6299 = vrcp.f32 %v4321_v5  ;;  %v4327_v19 = vpop.permute.xlu1 %4326 }
0x18cd   : > { %v6294_v41 = vpop.eup %6293 }
0x18ce   : > { %v3933_v12 = vmul.f32 %v6294_v41, %v6288_v62  ;;  %v6296_v14 = vpop.eup %6295  ;;  %v3408_v62 = vld [vmem:[#allocation22 + $0x30] sm:$0xff] }
0x18cf   : > { %v6298_v17 = vpop.eup %6297  ;;  %v4130_v20 = vmul.f32 %v6296_v14, %v6282_v53  ;;  %v6002_v0 = vpack.c.bf16 %v3409_v63, %v3408_v62 }
0x18d0   : > { %5754 = vmatprep.mubr.msk.f32.mxu1 %vm1508_vm3, %v3933_v12  ;;  %v6300_v21 = vpop.eup %6299  ;;  %v4324_v22 = vmul.f32 %v6298_v17, %v6280_v52  ;;  %v5193_v12 = vld [vmem:[#allocation24] ss:$0 sm:$0xff] }
0x18d1   : > { %5755 = vmatmul.mubr.msk.f32.vlgmr.msra.gmra.mrb[36].mxu1 %vm1508_vm3, %v3934_v13  ;;  %v4325_v23 = vmul.f32 %v6300_v21, %v6284_v56  ;;  %v3404_v56 = vld [vmem:[#allocation22 + $0x10] sm:$0xff] }
0x18d2   : > { %5763 = vmatpush3.msra.mxu1 %v4132_v45  ;;  %5764 = vmatprep.mubr.msk.f32.mxu1 %vm1508_vm3, %v4129_v15  ;;  %v5994_v59 = vpack.c.bf16 %v3405_v57, %v3404_v56 }
0x18d3   : > { %5772 = vmatprep.subr.mxu1 %v4327_v19 }
0x18d5   : > { %5765 = vmatmul.mubr.msk.f32.vlgmr.msra.gmra.mrb[38].mxu1 %vm1508_vm3, %v4130_v20 }
0x18d6   : > { %5773 = vmatpush3.msra.mxu1 %v4327_v19  ;;  %5774 = vmatprep.mubr.msk.f32.mxu1 %vm1508_vm3, %v4324_v22 }
0x18d9   : > { %5775 = vmatmul.mubr.msk.f32.vlgmr.msra.gmra.mrb[40].mxu1 %vm1508_vm3, %v4325_v23 }
0x19a4   : > { %v5756_v24 = vpop.f32.mrb[36].mxu1 }
0x19a5   : > { %4414 = vrot.lane.b32.xlu0 %v5756_v24, %s6862_s24  ;;  %v4011_v25 = vpop.f32.mrb[37].mxu1 }
0x19a6   : > { %4412 = vrot.lane.b32.xlu1 %v4011_v25, %s6862_s24  ;;  %s8104_s24 = sld [smem:[#allocation55_spill]] }
0x19a8   : > { %v5766_v26 = vpop.f32.mrb[38].mxu1 }
0x19a9   : > { %4422 = vrot.lane.b32.xlu0 %v5766_v26, %s6863_s6  ;;  %v4206_v27 = vpop.f32.mrb[39].mxu1 }
0x19aa   : > { %4420 = vrot.lane.b32.xlu1 %v4206_v27, %s6863_s6  ;;  %s8102_s6 = sld [smem:[#allocation54_spill]] }
0x19ac   : > { %v5776_v28 = vpop.f32.mrb[40].mxu1 }
0x19ad   : > { %4430 = vrot.lane.b32.xlu0 %v5776_v28, %s6864_s27  ;;  %v4401_v29 = vpop.f32.mrb[41].mxu1 }
0x19ae   : > { %4428 = vrot.lane.b32.xlu1 %v4401_v29, %s6864_s27  ;;  %s1055_s27 = scalar_lea.vmem %s8104_s24, %s7793_s5 }
0x19b0   : > { %v4596_v57 = vld [vmem:[%s8102_s6 + $0x10] sm:$0xff]  ;;  %v4597_v58 = vld [vmem:[%s8102_s6 + $0x18] sm:$0xff] }
0x1a17   : > { %v4415_v30 = vpop.permute.xlu0 %4414 }
0x1a18   : > { %v4413_v31 = vpop.permute.xlu1 %4412  ;;  %v4435_v34 = vsel %vm1430_vm2, %v7891_v16, %v4415_v30 }
0x1a19   : > { %v4434_v35 = vsel %vm1430_vm2, %v7893_v18, %v4413_v31 }
0x1a1b   : > { %v4423_v32 = vpop.permute.xlu0 %4422 }
0x1a1c   : > { %v4421_v33 = vpop.permute.xlu1 %4420  ;;  %v4437_v36 = vsel %vm2105_vm4, %v4435_v34, %v4423_v32 }
0x1a1d   : > { %v4436_v38 = vsel %vm2105_vm4, %v4434_v35, %v4421_v33  ;;  %v4585_v35 = vld [vmem:[%s8101_s11] sm:$0xff] }
0x1a1f   : > { %v4431_v37 = vpop.permute.xlu0 %4430 }
0x1a20   : > { %v4439_v39 = vsel %vm2107_vm5, %v4437_v36, %v4431_v37  ;;  %v4429_v1 = vpop.permute.xlu1 %4428  ;;  %v4586_v36 = vld [vmem:[%s8101_s11 + $0x8] sm:$0xff] }
0x1a21   : > { %v4438_v42 = vsel %vm2107_vm5, %v4436_v38, %v4429_v1  ;;  %v4441_v43 = vadd.f32 %v7844_v40, %v4439_v39  ;;  %v6006_v37 = vpack.c.bf16 %v4586_v36, %v4585_v35  ;;  %v4587_v38 = vld [vmem:[%s8101_s11 + $0x10] sm:$0xff]  ;;  %v4588_v39 = vld [vmem:[%s8101_s11 + $0x18] sm:$0xff]  ;;  %v4589_v1 = vld [vmem:[%s8101_s11 + $0x20] sm:$0xff] }
0x1a22   : > { %v4440_v44 = vadd.f32 %v4438_v42, %v7846_v6  ;;  %v3402_v6 = vld [vmem:[#allocation22] sm:$0xff]  ;;  %v6010_v42 = vpack.c.bf16 %v4588_v39, %v4587_v38 }
0x1a23   : > { %v4445_v46 = vsel %vm1106_vm1, %v4441_v43, 0.0  ;;  %v5990_v55 = vpack.c.bf16 %v3403_v54, %v3402_v6  ;;  %6007 = vmatprep.subr.bf16.mxu1 %v6006_v37 }
0x1a24   : > { %4446 = vadd.xlane.f32.xlu0 %v4445_v46  ;;  %v4442_v16 = vsel %vm1106_vm1, %v4440_v44, 0.0  ;;  %6009 = vmatpush3.bf16.msra.mxu1 %v6006_v37  ;;  %v4591_v46 = vld [vmem:[%s8101_s11 + $0x30] sm:$0xff] }
0x1a25   : > { %4443 = vadd.xlane.f32.xlu1 %v4442_v16  ;;  %5991 = vmatprep.subr.bf16.mxu0 %v5990_v55  ;;  %v4592_v16 = vld [vmem:[%s8101_s11 + $0x38] sm:$0xff] }
0x1a26   : > { %5993 = vmatpush3.bf16.msra.mxu0 %v5990_v55  ;;  %6011 = vmatprep.subr.bf16.mxu1 %v6010_v42 }
0x1a27   : > { %5995 = vmatprep.subr.bf16.mxu0 %v5994_v59 }
0x1a28   : > { %6013 = vmatpush3.bf16.msra.mxu1 %v6010_v42 }
0x1a2a   : > { %5997 = vmatpush3.bf16.msra.mxu0 %v5994_v59  ;;  %v6026_v59 = vpack.c.bf16 %v4597_v58, %v4596_v57 }
0x1a2b   : > { %5999 = vmatprep.subr.bf16.mxu0 %v5998_v61 }
0x1a2e   : > { %6001 = vmatpush3.bf16.msra.mxu0 %v5998_v61 }
0x1a2f   : > { %6003 = vmatprep.subr.bf16.mxu0 %v6002_v0 }
0x1a32   : > { %6005 = vmatpush3.bf16.msra.mxu0 %v6002_v0 }
0x1ab1   : > { %v4447_v18 = vpop.xlane.xlu0 %4446 }
0x1ab2   : > { %v4449_v47 = vmul.f32 0.015625, %v4447_v18  ;;  %v4444_v10 = vpop.xlane.xlu1 %4443  ;;  %v6018_v18 = vpack.c.bf16 %v4592_v16, %v4591_v46 }
0x1ab3   : > { %v4448_v48 = vmul.f32 0.015625, %v4444_v10  ;;  %v4595_v10 = vld [vmem:[%s8102_s6 + $0x8] sm:$0xff] }
0x1ab4   : > { %v4451_v49 = vsub.f32 %v4441_v43, %v4449_v47  ;;  %v4590_v43 = vld [vmem:[%s8101_s11 + $0x28] sm:$0xff]  ;;  %v4594_v47 = vld [vmem:[%s8102_s6] sm:$0xff] }
0x1ab5   : > { %v4450_v50 = vsub.f32 %v4440_v44, %v4448_v48  ;;  %v6014_v44 = vpack.c.bf16 %v4590_v43, %v4589_v1  ;;  %v6022_v48 = vpack.c.bf16 %v4595_v10, %v4594_v47 }
0x1ab6   : > { %v4453_v51 = vmul.f32 %v4451_v49, %v4451_v49 }
0x1ab7   : > { %v4452_v52 = vmul.f32 %v4450_v50, %v4450_v50  ;;  %6015 = vmatprep.subr.bf16.mxu1 %v6014_v44  ;;  %6023 = vmatprep.subr.bf16.mxu0 %v6022_v48 }
0x1ab8   : > { %v4457_v53 = vsel %vm1106_vm1, %v4453_v51, 0.0  ;;  %6017 = vmatpush3.bf16.msra.mxu1 %v6014_v44 }
0x1ab9   : > { %4458 = vadd.xlane.f32.xlu1 %v4457_v53  ;;  %v4454_v40 = vsel %vm1106_vm1, %v4452_v52, 0.0  ;;  %6019 = vmatprep.subr.bf16.mxu1 %v6018_v18 }
0x1aba   : > { %4455 = vadd.xlane.f32.xlu0 %v4454_v40 }
0x1abc   : > { %6021 = vmatpush3.bf16.msra.mxu1 %v6018_v18 }
0x1b46   : > { %v4459_v2 = vpop.xlane.xlu1 %4458 }
0x1b47   : > { %v4461_v3 = vmul.f32 0.015625, %v4459_v2  ;;  %v4456_v4 = vpop.xlane.xlu0 %4455 }
0x1b48   : > { %v4460_v5 = vmul.f32 0.015625, %v4456_v4  ;;  %v5199_v4 = vld [vmem:[#allocation27] ss:$0 sm:$0xff] }
0x1b49   : > { %v4463_v7 = vadd.f32 1e-05, %v4461_v3 }
0x1b4a   : > { %v4462_v45 = vadd.f32 1e-05, %v4460_v5 }
0x1b4b   : > { %6301 = vrsqrt.f32 %v4463_v7 }
0x1b4c   : > { %6303 = vrsqrt.f32 %v4462_v45 }
0x1b55   : > { %v6302_v8 = vpop.eup %6301 }
0x1b56   : > { %v6304_v9 = vpop.eup %6303  ;;  %v4467_v41 = vmul.f32 %v6302_v8, %v4451_v49 }
0x1b57   : > { %v4466_v11 = vmul.f32 %v6304_v9, %v4450_v50 }
0x1b59   : > { %5793 = vmatprep.mubr.msk.f32.mxu0 %vm1106_vm1, %v4466_v11 }
0x1b5a   : > { %5794 = vmatmul.mubr.msk.f32.vlgmr.msra.gmra.mrb[32].mxu0 %vm1106_vm1, %v4467_v41 }
0x1b5b   : > { %6025 = vmatpush3.bf16.msra.mxu0 %v6022_v48 }
0x1b5c   : > { %6027 = vmatprep.subr.bf16.mxu0 %v6026_v59 }
0x1b5f   : > { %6029 = vmatpush3.bf16.msra.mxu0 %v6026_v59 }
0x1c2d   : > { %v5795_v13 = vpop.f32.mrb[32].mxu0 }
0x1c2e   : > { %v4552_v14 = vadd.f32 %v5795_v13, %v5193_v12  ;;  %v4546_v15 = vpop.f32.mrb[33].mxu0 }
0x1c2f   : > { %v4547_v17 = vadd.f32 %v5193_v12, %v4546_v15  ;;  %v1060_v15 = vld [vmem:[%s1050_s7 + $0x8] sm:$0xff] }
0x1c30   : > { %v4556_v19 = vmax.f32 %v4552_v14, 0.0 }
0x1c31   : > { %v4555_v20 = vmax.f32 %v4547_v17, 0.0  ;;  %v1059_v17 = vld [vmem:[%s1050_s7] sm:$0xff] }
0x1c32   : > { %v4558_v21 = vadd.f32 %v4556_v19, %v4467_v41 }
0x1c33   : > { %v4557_v22 = vadd.f32 %v4555_v20, %v4466_v11 }
0x1c34   : > { %v4562_v23 = vsel %vm1106_vm1, %v4558_v21, 0.0 }
0x1c35   : > { %4563 = vadd.xlane.f32.xlu1 %v4562_v23  ;;  %v4559_v24 = vsel %vm1106_vm1, %v4557_v22, 0.0 }
0x1c36   : > { %4560 = vadd.xlane.f32.xlu0 %v4559_v24 }
0x1cc2   : > { %v4564_v25 = vpop.xlane.xlu1 %4563 }
0x1cc3   : > { %v4566_v26 = vmul.f32 0.015625, %v4564_v25  ;;  %v4561_v27 = vpop.xlane.xlu0 %4560 }
0x1cc4   : > { %v4565_v28 = vmul.f32 0.015625, %v4561_v27 }
0x1cc5   : > { %v4568_v29 = vsub.f32 %v4558_v21, %v4566_v26 }
0x1cc6   : > { %v4567_v30 = vsub.f32 %v4557_v22, %v4565_v28 }
0x1cc7   : > { %v4570_v31 = vmul.f32 %v4568_v29, %v4568_v29 }
0x1cc8   : > { %v4569_v32 = vmul.f32 %v4567_v30, %v4567_v30 }
0x1cc9   : > { %v4574_v33 = vsel %vm1106_vm1, %v4570_v31, 0.0 }
0x1cca   : > { %4575 = vadd.xlane.f32.xlu1 %v4574_v33  ;;  %v4571_v34 = vsel %vm1106_vm1, %v4569_v32, 0.0 }
0x1ccb   : > { %4572 = vadd.xlane.f32.xlu0 %v4571_v34 }
0x1d57   : > { %v4576_v49 = vpop.xlane.xlu1 %4575 }
0x1d58   : > { %v4578_v50 = vmul.f32 0.015625, %v4576_v49  ;;  %v4573_v51 = vpop.xlane.xlu0 %4572 }
0x1d59   : > { %v4577_v52 = vmul.f32 0.015625, %v4573_v51 }
0x1d5a   : > { %v4580_v53 = vadd.f32 1e-05, %v4578_v50 }
0x1d5b   : > { %v4579_v40 = vadd.f32 1e-05, %v4577_v52 }
0x1d5c   : > { %6305 = vrsqrt.f32 %v4580_v53 }
0x1d5d   : > { %6307 = vrsqrt.f32 %v4579_v40 }
0x1d66   : > { %v6306_v6 = vpop.eup %6305 }
0x1d67   : > { %v6308_v54 = vpop.eup %6307  ;;  %v4584_v56 = vmul.f32 %v6306_v6, %v4568_v29 }
0x1d68   : > { %v4583_v55 = vmul.f32 %v6308_v54, %v4567_v30 }
0x1d6a   : > { %5812 = vmatprep.mubr.msk.f32.mxu1 %vm1106_vm1, %v4583_v55 }
0x1d6b   : > { %5813 = vmatmul.mubr.msk.f32.vlgmr.msra.gmra.mrb[42].mxu1 %vm1106_vm1, %v4584_v56 }
0x1e3e   : > { %v5814_v61 = vpop.f32.mrb[42].mxu1 }
0x1e3f   : > { %v4683_v62 = vadd.f32 %v5814_v61, %v5196_v60  ;;  %v4677_v63 = vpop.f32.mrb[43].mxu1 }
0x1e40   : > { %v4678_v0 = vadd.f32 %v5196_v60, %v4677_v63 }
0x1e41   : > { %v4687_v3 = vmax.f32 %v4683_v62, 0.0 }
0x1e42   : > { %v4686_v2 = vmax.f32 %v4678_v0, 0.0 }
0x1e44   : > { %5823 = vmatprep.mubr.msk.f32.mxu0 %vm2105_vm4, %v4686_v2 }
0x1e45   : > { %5824 = vmatmul.mubr.msk.f32.vlgmr.msra.gmra.mrb[34].mxu0 %vm2105_vm4, %v4687_v3 }
0x1f18   : > { %v5825_v5 = vpop.f32.mrb[34].mxu0 }
0x1f19   : > { %v4772_v7 = vadd.f32 %v5825_v5, %v5199_v4  ;;  %v4766_v45 = vpop.f32.mrb[35].mxu0 }
0x1f1a   : > { %v4767_v8 = vadd.f32 %v5199_v4, %v4766_v45 }
0x1f1b   : > { %v4778_v9 = vsub.f32 0.0, %v4772_v7  ;;  %v4776_v19 = vsub.f32 %v1060_v15, %v4772_v7 }
0x1f1c   : > { %v4777_v11 = vsub.f32 0.0, %v4767_v8  ;;  %v4775_v21 = vsub.f32 %v1059_v17, %v4767_v8 }
0x1f1d   : > { %v4781_v41 = vmul.f32 1.442695, %v4778_v9 }
0x1f1e   : > { %v4779_v12 = vmul.f32 1.442695, %v4777_v11 }
0x1f1f   : > { %6309 = vpow2.f32 %v4781_v41 }
0x1f20   : > { %6311 = vpow2.f32 %v4779_v12 }
0x1f29   : > { %v6310_v13 = vpop.eup %6309 }
0x1f2a   : > { %v6312_v14 = vpop.eup %6311  ;;  %4787 = vrot.lane.b32.xlu1 %v6310_v13, %s6865_s19 }
0x1f2b   : > { %4785 = vrot.lane.b32.xlu0 %v6312_v14, %s6865_s19 }
0x1f2e   : > { %4799 = vrot.lane.b32.xlu1 %v4767_v8, %s6865_s19 }
0x1f2f   : > { %4801 = vrot.lane.b32.xlu0 %v4772_v7, %s6865_s19 }
0x1f9c   : > { %v4788_v20 = vpop.permute.xlu1 %4787 }
0x1f9d   : > { %v4792_v22 = vmul.f32 %v4788_v20, %v4776_v19  ;;  %v4786_v23 = vpop.permute.xlu0 %4785 }
0x1f9e   : > { %v4791_v24 = vmul.f32 %v4786_v23, %v4775_v21 }
0x1f9f   : > { %v4794_v25 = vmul.f32 -0.5, %v4792_v22 }
0x1fa0   : > { %v4793_v26 = vmul.f32 -0.5, %v4791_v24  ;;  %v4800_v30 = vpop.permute.xlu1 %4799 }
0x1fa1   : > { %v4796_v27 = vmul.f32 %v4794_v25, %v4792_v22  ;;  %v4802_v28 = vpop.permute.xlu0 %4801 }
0x1fa2   : > { %v4795_v29 = vmul.f32 %v4793_v26, %v4791_v24 }
0x1fa3   : > { %v4806_v31 = vsub.f32 %v4796_v27, %v4802_v28 }
0x1fa4   : > { %v4805_v32 = vsub.f32 %v4795_v29, %v4800_v30 }
0x1fa5   : > { %v5203_v33 = vadd.f32 -0.9189385, %v4806_v31 }
0x1fa6   : > { %v5202_v34 = vadd.f32 -0.9189385, %v4805_v32 }
0x1fa7   : > { %4813 = vst.msk [vmem:[%s1055_s27 + $0x8] sm:$0xff] %vm4811_vm6, %v5203_v33 }
0x1fa8   : > { %4812 = vst.msk [vmem:[%s1055_s27] sm:$0xff] %vm4811_vm6, %v5202_v34 }
0x1fa9 PF: > { %s8105_s4 = sld [smem:[#allocation37_spill]] }
0x1faf   : > { %s45_s27 = sadd.s32 1, %s8105_s4  }
0x1fb0   : > { %p42_p5 = scmp.ge.s32.totalorder %s45_s27, 4  }
0x1fb2   :  { %44 = sbr.rel (!%p42_p5) target bundleno = 28 (0x1c), region = 234 }
0x1fb9   :  { %4835 = vsyncpa [#allocation3], 1 }
0x1fba   :  { %4837 = vsyncpa [#allocation3 + $0x1], 1 }
0x1fbb   :  { %4838 = vsyncpa [#allocation5], 1 }
0x1fbc   :  { %4839 = vsyncpa [#allocation8], 1 }
0x1fbd   :  { %4840 = vsyncpa [#allocation11], 1 }
0x1fbe   :  { %4841 = vsyncpa [#allocation14], 1 }
0x1fbf   :  { %4842 = vsyncpa [#allocation17], 1 }
0x1fc0   :  { %4843 = vsyncpa [#allocation20], 1 }
0x1fc1   :  { %4844 = vsyncpa [#allocation23], 1 }
0x1fc2   :  { %4845 = vsyncpa [#allocation26], 1 }

</bundles_post_ra>
